<compile_context>
chip_gen: v5e
topology: v5e:2x2
jax: 0.10.0
libtpu: 0.0.40
codegen_flags: <defaults>
</compile_context>

<pallas_src>
import functools
import numpy as np

import jax
import jax.numpy as jnp
from jax.experimental import pallas as pl
from jax.experimental.pallas import tpu as pltpu

LN_EPS = 1e-5                      # nn.LayerNorm default
MXU_DTYPE = jnp.bfloat16           # matmul operand dtype (accumulation stays f32);
                                   # set to jnp.float32 for exact-f32 parity with PyTorch.


# ----------------------------------------------------------------------------- helpers
def _erf_f32(x):
    # Abramowitz & Stegun 7.1.26 rational approximation (max abs err ~1.5e-7).
    # TODO(synk): on v5e, if the VALU slot saturates on the MLP, switch to the tanh-form
    # GELU (1 EUP tanh + ~6 VALU ops) instead of this erf polynomial.
    a1, a2, a3, a4, a5 = 0.254829592, -0.284496736, 1.421413741, -1.453152027, 1.061405429
    p = 0.3275911
    sgn = jnp.where(x >= 0.0, 1.0, -1.0)
    ax = jnp.abs(x)
    t = 1.0 / (1.0 + p * ax)
    poly = ((((a5 * t + a4) * t + a3) * t + a2) * t + a1) * t
    return sgn * (1.0 - poly * jnp.exp(-ax * ax))


def _gelu_exact(x):
    return 0.5 * x * (1.0 + _erf_f32(x * 0.7071067811865476))


def relative_position_index(ws):
    coords = np.stack(np.meshgrid(np.arange(ws), np.arange(ws), indexing="ij"))
    cf = coords.reshape(2, -1)
    rel = cf[:, :, None] - cf[:, None, :]
    rel = rel.transpose(1, 2, 0).astype(np.int64)
    rel[:, :, 0] += ws - 1
    rel[:, :, 1] += ws - 1
    rel[:, :, 0] *= 2 * ws - 1
    return rel.sum(-1)                                   # (N, N)


def compute_attn_mask(H, W, ws, shift):
    nW = (H // ws) * (W // ws)
    N = ws * ws
    if shift == 0:
        return np.zeros((nW, N, N), np.float32)
    img_mask = np.zeros((1, H, W, 1), np.float32)
    cnt = 0
    for hs in (slice(0, -ws), slice(-ws, -shift), slice(-shift, None)):
        for wsl in (slice(0, -ws), slice(-ws, -shift), slice(-shift, None)):
            img_mask[:, hs, wsl, :] = cnt
            cnt += 1
    m = img_mask.reshape(1, H // ws, ws, W // ws, ws, 1)
    m = m.transpose(0, 1, 3, 2, 4, 5).reshape(-1, N)     # (nW, N)
    attn_mask = m[:, None, :] - m[:, :, None]            # (nW, N, N)
    return np.where(attn_mask != 0, -100.0, 0.0).astype(np.float32)


def _win_to_img_map(H, W, ws, shift):
    # For windowed-token index t (layout of roll(-shift) + window_partition, window-major,
    # token row-major within a window) return the source token index in the original
    # row-major H*W image.  Pure numpy -> trace-time constant.
    nWw = W // ws
    idx = np.arange((H // ws) * (W // ws) * ws * ws)
    w_idx, n_idx = idx // (ws * ws), idx % (ws * ws)
    wr, wc = w_idx // nWw, w_idx % nWw
    ir, ic = n_idx // ws, n_idx % ws
    r = (wr * ws + ir + shift) % H
    c = (wc * ws + ic + shift) % W
    return (r * W + c).astype(np.int32)


def _chip_limits():
    # Chip-aware tiling: 512-row slabs on 128 MiB-VMEM chips (v5e/v6e), 256 on v7x (64 MiB).
    try:
        cap = int(pltpu.get_tpu_info().vmem_capacity_bytes)
    except Exception:
        cap = 64 << 20
    max_rows = 512 if cap >= (96 << 20) else 256
    vmem_limit = int(min(100 << 20, cap * 3 // 4))
    return max_rows, vmem_limit


def _pick_window_tile(n_windows, win_n, n_batch_windows, max_rows, min_grid=4):
    # Largest divisor of nW such that (a) the per-step token slab is <= max_rows rows and
    # (b) the flattened grid keeps >= min_grid steps (v7x megacore wants >= 2 per core).
    divs = [d for d in range(1, n_windows + 1)
            if n_windows % d == 0 and d * win_n <= max_rows]
    if not divs:
        return 1
    for floor in (min_grid, 2, 1):
        ok = [d for d in divs if n_batch_windows // d >= floor]
        if ok:
            return max(ok)
    return 1


# ----------------------------------------------------------------------------- fused block kernel
def _swin_block_kernel(*refs, wtile, win_n, num_heads, head_dim, use_mask):
    if use_mask:
        (x_ref, g1_ref, b1_ref, wqkv_ref, bqkv_ref, relb_ref, mask_ref,
         wproj_ref, bproj_ref, g2_ref, b2_ref,
         w1_ref, bfc1_ref, w2_ref, bfc2_ref, o_ref) = refs
    else:
        (x_ref, g1_ref, b1_ref, wqkv_ref, bqkv_ref, relb_ref,
         wproj_ref, bproj_ref, g2_ref, b2_ref,
         w1_ref, bfc1_ref, w2_ref, bfc2_ref, o_ref) = refs
        mask_ref = None

    T, C = x_ref.shape                                   # T = wtile * win_n
    x = x_ref[...].astype(jnp.float32)

    # ---------------- norm1 (f32 on VPU) ----------------
    mu = jnp.mean(x, axis=-1, keepdims=True)
    var = jnp.mean(jnp.square(x - mu), axis=-1, keepdims=True)
    xn = (x - mu) * jax.lax.rsqrt(var + LN_EPS)
    xn = xn * g1_ref[...] + b1_ref[...]

    # ---- fused QKV: one (T,C)@(C,3C) MXU matmul; weight pre-cast, q columns pre-scaled ----
    qkv = jnp.dot(xn.astype(wqkv_ref.dtype), wqkv_ref[...],
                  preferred_element_type=jnp.float32) + bqkv_ref[...]      # (T, 3C) f32

    mask = mask_ref[...] if use_mask else None                             # (wtile, N, N)

    # ---- windowed attention: wtile windows batched per dot_general, static head loop ----
    # (lane slices + leading-dim reshapes only: no axis-0 concatenates / relayouts)
    head_outs = []
    for h in range(num_heads):
        c0 = h * head_dim
        q = qkv[:, c0:c0 + head_dim].reshape(wtile, win_n, head_dim).astype(MXU_DTYPE)
        k = qkv[:, C + c0:C + c0 + head_dim].reshape(wtile, win_n, head_dim).astype(MXU_DTYPE)
        v = qkv[:, 2 * C + c0:2 * C + c0 + head_dim].reshape(wtile, win_n, head_dim).astype(MXU_DTYPE)

        s = jax.lax.dot_general(q, k, (((2,), (2,)), ((0,), (0,))),
                                preferred_element_type=jnp.float32)        # (wtile, N, N)
        s = s + relb_ref[h]                                                # (N, N) broadcast
        if use_mask:
            s = s + mask                                                   # shifted blocks only
        # TODO(synk): for ws=7 (N=49) pack two windows per 128-lane vreg here; at N=16/49
        # the softmax runs lane-sparse.
        s = s - jnp.max(s, axis=-1, keepdims=True)
        p = jnp.exp(s)
        p = p * pl.reciprocal(jnp.sum(p, axis=-1, keepdims=True), approx=True)   # EUP slot

        o_h = jax.lax.dot_general(p.astype(MXU_DTYPE), v, (((2,), (1,)), ((0,), (0,))),
                                  preferred_element_type=jnp.float32)      # (wtile, N, hd)
        head_outs.append(o_h.reshape(T, head_dim))
    attn = head_outs[0] if num_heads == 1 else jnp.concatenate(head_outs, axis=-1)  # (T, C)

    # ---------------- output projection + fused residual ----------------
    h_out = x + jnp.dot(attn.astype(wproj_ref.dtype), wproj_ref[...],
                        preferred_element_type=jnp.float32) + bproj_ref[...]

    # ---------------- norm2 + MLP(GELU) + residual ----------------
    mu2 = jnp.mean(h_out, axis=-1, keepdims=True)
    var2 = jnp.mean(jnp.square(h_out - mu2), axis=-1, keepdims=True)
    hn = (h_out - mu2) * jax.lax.rsqrt(var2 + LN_EPS)
    hn = hn * g2_ref[...] + b2_ref[...]

    m1 = jnp.dot(hn.astype(w1_ref.dtype), w1_ref[...],
                 preferred_element_type=jnp.float32) + bfc1_ref[...]
    m1 = _gelu_exact(m1)
    y = jnp.dot(m1.astype(w2_ref.dtype), w2_ref[...],
                preferred_element_type=jnp.float32) + bfc2_ref[...]

    # drop_path = 0, dropout = 0  ->  plain residual adds.
    o_ref[...] = (h_out + y).astype(o_ref.dtype)


# ----------------------------------------------------------------------------- pallas wrapper
def swin_block_call(tokens, p, rel_bias, mask, *, wtile, n_wt, num_heads, head_dim,
                    win_n, vmem_limit):
    # tokens: (B * nW * N, C) windowed token slab (row-major: batch, window, token).
    Ttot, C = tokens.shape
    rows = wtile * win_n
    hidden = p["w1"].shape[1]
    grid = (Ttot // rows,)                                 # = B * (nW // wtile), all parallel
    use_mask = mask is not None

    const2 = lambda i: (0, 0)
    const3 = lambda i: (0, 0, 0)

    in_specs = [
        pl.BlockSpec((rows, C), lambda i: (i, 0)),         # windowed tokens (also residual)
        pl.BlockSpec((1, C), const2),                      # norm1 gamma
        pl.BlockSpec((1, C), const2),                      # norm1 beta
        pl.BlockSpec((C, 3 * C), const2),                  # qkv weight (bf16, q pre-scaled)
        pl.BlockSpec((1, 3 * C), const2),                  # qkv bias (f32, q pre-scaled)
        pl.BlockSpec((num_heads, win_n, win_n), const3),   # rel-pos bias (constant)
    ]
    args = [tokens, p["g1"], p["b1"], p["wqkv"], p["bqkv"], rel_bias]
    if use_mask:
        # Rows are laid out (B, nW, N) row-major, so the grid iterates window-tiles
        # fastest within a batch image -> window-tile index within the image is i % n_wt.
        in_specs.append(pl.BlockSpec((wtile, win_n, win_n), lambda i: (i % n_wt, 0, 0)))
        args.append(mask)
    in_specs += [
        pl.BlockSpec((C, C), const2),                      # proj weight (bf16)
        pl.BlockSpec((1, C), const2),                      # proj bias
        pl.BlockSpec((1, C), const2),                      # norm2 gamma
        pl.BlockSpec((1, C), const2),                      # norm2 beta
        pl.BlockSpec((C, hidden), const2),                 # fc1 weight (bf16)
        pl.BlockSpec((1, hidden), const2),                 # fc1 bias
        pl.BlockSpec((hidden, C), const2),                 # fc2 weight (bf16)
        pl.BlockSpec((1, C), const2),                      # fc2 bias
    ]
    args += [p["wproj"], p["bproj"], p["g2"], p["b2"],
             p["w1"], p["bfc1"], p["w2"], p["bfc2"]]

    kernel = functools.partial(_swin_block_kernel, wtile=wtile, win_n=win_n,
                               num_heads=num_heads, head_dim=head_dim, use_mask=use_mask)

    # TODO(synk): at production C on v7x (64 MiB VMEM) single-buffer the constant-index-map
    # weight operands (pl.Buffered(1) pipeline_mode or manual residency); here bf16 weights
    # plus the chip-aware row tile keep the footprint comfortably inside the scoped limit.
    return pl.pallas_call(
        kernel,
        out_shape=jax.ShapeDtypeStruct((Ttot, C), tokens.dtype),
        grid=grid,
        in_specs=in_specs,
        # NOTE: C < 128 lowers the writeback to masked partial stores; padding/packing the
        # channel dim to 128 is the remaining lane-density lever for small-C stages.
        out_specs=pl.BlockSpec((rows, C), lambda i: (i, 0)),
        compiler_params=pltpu.CompilerParams(
            dimension_semantics=("parallel",),             # megacore split of window tiles
            vmem_limit_bytes=vmem_limit),
    )(*args)


# ----------------------------------------------------------------------------- params prep
def _prep_block_params(p, dim, head_dim):
    # bf16 pre-cast of all matmul weights + fold the qk scale into the q columns of
    # wqkv / bqkv (so the kernel does no weight casts and no q scaling).
    scale = head_dim ** -0.5
    col_scale = jnp.concatenate([jnp.full((dim,), scale, jnp.float32),
                                 jnp.ones((2 * dim,), jnp.float32)])[None, :]
    pp = dict(p)
    pp["wqkv"] = (p["wqkv"] * col_scale).astype(MXU_DTYPE)
    pp["bqkv"] = p["bqkv"] * col_scale
    pp["wproj"] = p["wproj"].astype(MXU_DTYPE)
    pp["w1"] = p["w1"].astype(MXU_DTYPE)
    pp["w2"] = p["w2"].astype(MXU_DTYPE)
    return pp


# ----------------------------------------------------------------------------- layer forward
def basic_layer_forward(x, blocks, *, input_resolution, window_size, num_heads):
    H, W = input_resolution
    ws = window_size
    B, L, C = x.shape
    N = ws * ws
    nW = (H // ws) * (W // ws)
    head_dim = C // num_heads

    max_rows, vmem_limit = _chip_limits()
    wtile = _pick_window_tile(nW, N, B * nW, max_rows=max_rows)
    n_wt = nW // wtile

    depth = len(blocks)
    shifts = [0 if i % 2 == 0 else ws // 2 for i in range(depth)]

    rel_idx = relative_position_index(ws).reshape(-1)               # numpy, trace-time
    win2img = {s: _win_to_img_map(H, W, ws, s) for s in set(shifts)}
    img2win = {s: np.argsort(m).astype(np.int32) for s, m in win2img.items()}
    masks = {s: (None if s == 0 else jnp.asarray(compute_attn_mask(H, W, ws, s)))
             for s in set(shifts)}

    # Fused kernel computes: h = x + proj(attn(norm1(x)));  out = h + MLP(norm2(h)).
    # shift + window_partition is a bijective token permutation, so residuals in window
    # layout followed by the inverse permutation are identical to the PyTorch ordering.
    tokens = x[:, win2img[shifts[0]], :]                            # ONE gather to partition

    for i, p in enumerate(blocks):
        # cube.runtime.function.anchor('transformer block start') is a profiling no-op.
        s = shifts[i]
        pp = _prep_block_params(p, C, head_dim)
        rel_bias = jnp.transpose(p["rel_table"][rel_idx].reshape(N, N, num_heads),
                                 (2, 0, 1))                         # (heads, N, N)
        out = swin_block_call(tokens.reshape(B * nW * N, C), pp, rel_bias, masks[s],
                              wtile=wtile, n_wt=n_wt, num_heads=num_heads,
                              head_dim=head_dim, win_n=N, vmem_limit=vmem_limit)
        tokens = out.reshape(B, nW * N, C)
        if i + 1 < depth and shifts[i + 1] != s:
            # fused window_reverse(s) . un-roll(s) . roll(s_next) . window_partition(s_next)
            perm = img2win[s][win2img[shifts[i + 1]]]
            tokens = tokens[:, perm, :]

    # fused window_reverse(last shift) . un-roll: one gather back to row-major tokens.
    tokens = tokens[:, img2win[shifts[-1]], :]
    # downsample is None in this configuration (BasicLayer default) -> no PatchMerging.
    return tokens.reshape(B, L, C)


# ----------------------------------------------------------------------------- params
def init_block_params(key, dim, num_heads, window_size, mlp_ratio):
    # Weights are stored (in_features, out_features); torch.nn.Linear stores (out, in),
    # so any checkpoint-loading path must transpose.
    hidden = int(dim * mlp_ratio)
    ks = jax.random.split(key, 5)
    std = 0.02
    return dict(
        g1=jnp.ones((1, dim), jnp.float32),
        b1=jnp.zeros((1, dim), jnp.float32),
        wqkv=std * jax.random.normal(ks[0], (dim, 3 * dim), jnp.float32),
        bqkv=jnp.zeros((1, 3 * dim), jnp.float32),
        rel_table=std * jax.random.normal(ks[1], ((2 * window_size - 1) ** 2, num_heads),
                                          jnp.float32),
        wproj=std * jax.random.normal(ks[2], (dim, dim), jnp.float32),
        bproj=jnp.zeros((1, dim), jnp.float32),
        g2=jnp.ones((1, dim), jnp.float32),
        b2=jnp.zeros((1, dim), jnp.float32),
        w1=std * jax.random.normal(ks[3], (dim, hidden), jnp.float32),
        bfc1=jnp.zeros((1, hidden), jnp.float32),
        w2=std * jax.random.normal(ks[4], (hidden, dim), jnp.float32),
        bfc2=jnp.zeros((1, dim), jnp.float32),
    )


if __name__ == "__main__":
    B = 2
    dim = 32
    input_resolution = (8, 8)
    depth = 2
    num_heads = 2
    window_size = 4
    mlp_ratio = 4.0

    H, W = input_resolution
    key = jax.random.PRNGKey(0)
    kx, kp = jax.random.split(key)
    x = jax.random.normal(kx, (B, H * W, dim), jnp.float32)

    block_keys = jax.random.split(kp, depth)
    blocks = [init_block_params(block_keys[i], dim, num_heads, window_size, mlp_ratio)
              for i in range(depth)]

    fwd = jax.jit(functools.partial(basic_layer_forward,
                                    input_resolution=input_resolution,
                                    window_size=window_size,
                                    num_heads=num_heads))
    out = fwd(x, blocks)
    jax.block_until_ready(out)
    assert out.shape == (B, H * W, dim) and out.dtype == jnp.float32
    print("KERNEL_OK")
</pallas_src>

<mosaic_0001>
module attributes {stable_mosaic.version = 11 : i64} {
  func.func @_swin_block_kernel(%arg0: i32, %arg1: memref<32x32xf32, #tpu.memory_space<vmem>>, %arg2: memref<1x32xf32, #tpu.memory_space<vmem>>, %arg3: memref<1x32xf32, #tpu.memory_space<vmem>>, %arg4: memref<32x96xbf16, #tpu.memory_space<vmem>>, %arg5: memref<1x96xf32, #tpu.memory_space<vmem>>, %arg6: memref<2x16x16xf32, #tpu.memory_space<vmem>>, %arg7: memref<32x32xbf16, #tpu.memory_space<vmem>>, %arg8: memref<1x32xf32, #tpu.memory_space<vmem>>, %arg9: memref<1x32xf32, #tpu.memory_space<vmem>>, %arg10: memref<1x32xf32, #tpu.memory_space<vmem>>, %arg11: memref<32x128xbf16, #tpu.memory_space<vmem>>, %arg12: memref<1x128xf32, #tpu.memory_space<vmem>>, %arg13: memref<128x32xbf16, #tpu.memory_space<vmem>>, %arg14: memref<1x32xf32, #tpu.memory_space<vmem>>, %arg15: memref<32x32xf32, #tpu.memory_space<vmem>>) attributes {dimension_semantics = [#tpu.dimension_semantics<parallel>], iteration_bounds = array<i64: 4>, scalar_prefetch = 0 : i64, scratch_operands = 0 : i64, tpu.core_type = #tpu.core_type<tc>, window_params = [{transform_indices = @transform_0, window_bounds = array<i64: 32, 32>}, {pipeline_mode = #tpu.pipeline_mode<synchronous>, transform_indices = @transform_1, window_bounds = array<i64: 1, 32>}, {pipeline_mode = #tpu.pipeline_mode<synchronous>, transform_indices = @transform_2, window_bounds = array<i64: 1, 32>}, {pipeline_mode = #tpu.pipeline_mode<synchronous>, transform_indices = @transform_3, window_bounds = array<i64: 32, 96>}, {pipeline_mode = #tpu.pipeline_mode<synchronous>, transform_indices = @transform_4, window_bounds = array<i64: 1, 96>}, {pipeline_mode = #tpu.pipeline_mode<synchronous>, transform_indices = @transform_5, window_bounds = array<i64: 2, 16, 16>}, {pipeline_mode = #tpu.pipeline_mode<synchronous>, transform_indices = @transform_6, window_bounds = array<i64: 32, 32>}, {pipeline_mode = #tpu.pipeline_mode<synchronous>, transform_indices = @transform_7, window_bounds = array<i64: 1, 32>}, {pipeline_mode = #tpu.pipeline_mode<synchronous>, transform_indices = @transform_8, window_bounds = array<i64: 1, 32>}, {pipeline_mode = #tpu.pipeline_mode<synchronous>, transform_indices = @transform_9, window_bounds = array<i64: 1, 32>}, {pipeline_mode = #tpu.pipeline_mode<synchronous>, transform_indices = @transform_10, window_bounds = array<i64: 32, 128>}, {pipeline_mode = #tpu.pipeline_mode<synchronous>, transform_indices = @transform_11, window_bounds = array<i64: 1, 128>}, {pipeline_mode = #tpu.pipeline_mode<synchronous>, transform_indices = @transform_12, window_bounds = array<i64: 128, 32>}, {pipeline_mode = #tpu.pipeline_mode<synchronous>, transform_indices = @transform_13, window_bounds = array<i64: 1, 32>}, {transform_indices = @transform_14, window_bounds = array<i64: 32, 32>}]} {
    %c0 = arith.constant 0 : index
    %c0_0 = arith.constant 0 : index
    %0 = vector.load %arg1[%c0, %c0_0] : memref<32x32xf32, #tpu.memory_space<vmem>>, vector<32x32xf32>
    %cst = arith.constant dense<0.000000e+00> : vector<32xf32>
    %1 = vector.multi_reduction <add>, %0, %cst [1] : vector<32x32xf32> to vector<32xf32>
    %2 = vector.shape_cast %1 : vector<32xf32> to vector<32x1xf32>
    %cst_1 = arith.constant 3.200000e+01 : f32
    %3 = vector.broadcast %cst_1 : f32 to vector<32x1xf32>
    %4 = arith.divf %2, %3 : vector<32x1xf32>
    %5 = vector.broadcast %4 : vector<32x1xf32> to vector<32x32xf32>
    %6 = arith.subf %0, %5 : vector<32x32xf32>
    %7 = arith.mulf %6, %6 : vector<32x32xf32>
    %cst_2 = arith.constant dense<0.000000e+00> : vector<32xf32>
    %8 = vector.multi_reduction <add>, %7, %cst_2 [1] : vector<32x32xf32> to vector<32xf32>
    %9 = vector.shape_cast %8 : vector<32xf32> to vector<32x1xf32>
    %cst_3 = arith.constant 3.200000e+01 : f32
    %10 = vector.broadcast %cst_3 : f32 to vector<32x1xf32>
    %11 = arith.divf %9, %10 : vector<32x1xf32>
    %12 = vector.broadcast %4 : vector<32x1xf32> to vector<32x32xf32>
    %13 = arith.subf %0, %12 : vector<32x32xf32>
    %cst_4 = arith.constant 9.99999974E-6 : f32
    %14 = vector.broadcast %cst_4 : f32 to vector<32x1xf32>
    %15 = arith.addf %11, %14 : vector<32x1xf32>
    %16 = math.rsqrt %15 : vector<32x1xf32>
    %17 = vector.broadcast %16 : vector<32x1xf32> to vector<32x32xf32>
    %18 = arith.mulf %13, %17 : vector<32x32xf32>
    %c0_5 = arith.constant 0 : index
    %c0_6 = arith.constant 0 : index
    %19 = vector.load %arg2[%c0_5, %c0_6] : memref<1x32xf32, #tpu.memory_space<vmem>>, vector<1x32xf32>
    %20 = vector.broadcast %19 : vector<1x32xf32> to vector<32x32xf32>
    %21 = arith.mulf %18, %20 : vector<32x32xf32>
    %c0_7 = arith.constant 0 : index
    %c0_8 = arith.constant 0 : index
    %22 = vector.load %arg3[%c0_7, %c0_8] : memref<1x32xf32, #tpu.memory_space<vmem>>, vector<1x32xf32>
    %23 = vector.broadcast %22 : vector<1x32xf32> to vector<32x32xf32>
    %24 = arith.addf %21, %23 : vector<32x32xf32>
    %25 = arith.truncf %24 : vector<32x32xf32> to vector<32x32xbf16>
    %c0_9 = arith.constant 0 : index
    %c0_10 = arith.constant 0 : index
    %26 = vector.load %arg4[%c0_9, %c0_10] : memref<32x96xbf16, #tpu.memory_space<vmem>>, vector<32x96xbf16>
    %cst_11 = arith.constant dense<0.000000e+00> : vector<32x96xf32>
    %27 = tpu.matmul %25, %26, %cst_11 {dimension_numbers = #tpu.dot_dimension_numbers<[1], [0], [0], [1], [0, 0, 1, 1], [], []>} : vector<32x32xbf16>, vector<32x96xbf16>, vector<32x96xf32> -> vector<32x96xf32>
    %c0_12 = arith.constant 0 : index
    %c0_13 = arith.constant 0 : index
    %28 = vector.load %arg5[%c0_12, %c0_13] : memref<1x96xf32, #tpu.memory_space<vmem>>, vector<1x96xf32>
    %29 = vector.broadcast %28 : vector<1x96xf32> to vector<32x96xf32>
    %30 = arith.addf %27, %29 : vector<32x96xf32>
    %31 = vector.extract_strided_slice %30 {offsets = [0, 0], sizes = [32, 16], strides = [1, 1]} : vector<32x96xf32> to vector<32x16xf32>
    %32 = vector.shape_cast %31 : vector<32x16xf32> to vector<2x16x16xf32>
    %33 = arith.truncf %32 : vector<2x16x16xf32> to vector<2x16x16xbf16>
    %34 = vector.extract_strided_slice %30 {offsets = [0, 32], sizes = [32, 16], strides = [1, 1]} : vector<32x96xf32> to vector<32x16xf32>
    %35 = vector.shape_cast %34 : vector<32x16xf32> to vector<2x16x16xf32>
    %36 = arith.truncf %35 : vector<2x16x16xf32> to vector<2x16x16xbf16>
    %37 = vector.extract_strided_slice %30 {offsets = [0, 64], sizes = [32, 16], strides = [1, 1]} : vector<32x96xf32> to vector<32x16xf32>
    %38 = vector.shape_cast %37 : vector<32x16xf32> to vector<2x16x16xf32>
    %39 = arith.truncf %38 : vector<2x16x16xf32> to vector<2x16x16xbf16>
    %cst_14 = arith.constant dense<0.000000e+00> : vector<2x16x16xf32>
    %40 = tpu.matmul %33, %36, %cst_14 {dimension_numbers = #tpu.dot_dimension_numbers<[2], [2], [1], [1], [0, 0, 0, 1, 1, 1], [0], [0]>} : vector<2x16x16xbf16>, vector<2x16x16xbf16>, vector<2x16x16xf32> -> vector<2x16x16xf32>
    %c0_15 = arith.constant 0 : index
    %c0_16 = arith.constant 0 : index
    %c0_17 = arith.constant 0 : index
    %41 = vector.load %arg6[%c0_15, %c0_16, %c0_17] : memref<2x16x16xf32, #tpu.memory_space<vmem>>, vector<1x16x16xf32>
    %42 = vector.shape_cast %41 : vector<1x16x16xf32> to vector<16x16xf32>
    %43 = vector.shape_cast %42 : vector<16x16xf32> to vector<1x16x16xf32>
    %44 = vector.broadcast %43 : vector<1x16x16xf32> to vector<2x16x16xf32>
    %45 = arith.addf %40, %44 : vector<2x16x16xf32>
    %cst_18 = arith.constant dense<0xFF800000> : vector<2x16xf32>
    %46 = vector.multi_reduction <maximumf>, %45, %cst_18 [2] : vector<2x16x16xf32> to vector<2x16xf32>
    %47 = vector.shape_cast %46 : vector<2x16xf32> to vector<2x16x1xf32>
    %48 = vector.broadcast %47 : vector<2x16x1xf32> to vector<2x16x16xf32>
    %49 = arith.subf %45, %48 : vector<2x16x16xf32>
    %50 = math.exp %49 : vector<2x16x16xf32>
    %cst_19 = arith.constant dense<0.000000e+00> : vector<2x16xf32>
    %51 = vector.multi_reduction <add>, %50, %cst_19 [2] : vector<2x16x16xf32> to vector<2x16xf32>
    %52 = vector.shape_cast %51 : vector<2x16xf32> to vector<2x16x1xf32>
    %53 = tpu.reciprocal %52 {approx = true} : vector<2x16x1xf32> -> vector<2x16x1xf32>
    %54 = vector.broadcast %53 : vector<2x16x1xf32> to vector<2x16x16xf32>
    %55 = arith.mulf %50, %54 : vector<2x16x16xf32>
    %56 = arith.truncf %55 : vector<2x16x16xf32> to vector<2x16x16xbf16>
    %cst_20 = arith.constant dense<0.000000e+00> : vector<2x16x16xf32>
    %57 = tpu.matmul %56, %39, %cst_20 {dimension_numbers = #tpu.dot_dimension_numbers<[2], [1], [1], [2], [0, 0, 0, 1, 1, 2], [0], [0]>} : vector<2x16x16xbf16>, vector<2x16x16xbf16>, vector<2x16x16xf32> -> vector<2x16x16xf32>
    %58 = vector.shape_cast %57 : vector<2x16x16xf32> to vector<32x16xf32>
    %59 = vector.extract_strided_slice %30 {offsets = [0, 16], sizes = [32, 16], strides = [1, 1]} : vector<32x96xf32> to vector<32x16xf32>
    %60 = vector.shape_cast %59 : vector<32x16xf32> to vector<2x16x16xf32>
    %61 = arith.truncf %60 : vector<2x16x16xf32> to vector<2x16x16xbf16>
    %62 = vector.extract_strided_slice %30 {offsets = [0, 48], sizes = [32, 16], strides = [1, 1]} : vector<32x96xf32> to vector<32x16xf32>
    %63 = vector.shape_cast %62 : vector<32x16xf32> to vector<2x16x16xf32>
    %64 = arith.truncf %63 : vector<2x16x16xf32> to vector<2x16x16xbf16>
    %65 = vector.extract_strided_slice %30 {offsets = [0, 80], sizes = [32, 16], strides = [1, 1]} : vector<32x96xf32> to vector<32x16xf32>
    %66 = vector.shape_cast %65 : vector<32x16xf32> to vector<2x16x16xf32>
    %67 = arith.truncf %66 : vector<2x16x16xf32> to vector<2x16x16xbf16>
    %cst_21 = arith.constant dense<0.000000e+00> : vector<2x16x16xf32>
    %68 = tpu.matmul %61, %64, %cst_21 {dimension_numbers = #tpu.dot_dimension_numbers<[2], [2], [1], [1], [0, 0, 0, 1, 1, 1], [0], [0]>} : vector<2x16x16xbf16>, vector<2x16x16xbf16>, vector<2x16x16xf32> -> vector<2x16x16xf32>
    %c1 = arith.constant 1 : index
    %c0_22 = arith.constant 0 : index
    %c0_23 = arith.constant 0 : index
    %69 = vector.load %arg6[%c1, %c0_22, %c0_23] : memref<2x16x16xf32, #tpu.memory_space<vmem>>, vector<1x16x16xf32>
    %70 = vector.shape_cast %69 : vector<1x16x16xf32> to vector<16x16xf32>
    %71 = vector.shape_cast %70 : vector<16x16xf32> to vector<1x16x16xf32>
    %72 = vector.broadcast %71 : vector<1x16x16xf32> to vector<2x16x16xf32>
    %73 = arith.addf %68, %72 : vector<2x16x16xf32>
    %cst_24 = arith.constant dense<0xFF800000> : vector<2x16xf32>
    %74 = vector.multi_reduction <maximumf>, %73, %cst_24 [2] : vector<2x16x16xf32> to vector<2x16xf32>
    %75 = vector.shape_cast %74 : vector<2x16xf32> to vector<2x16x1xf32>
    %76 = vector.broadcast %75 : vector<2x16x1xf32> to vector<2x16x16xf32>
    %77 = arith.subf %73, %76 : vector<2x16x16xf32>
    %78 = math.exp %77 : vector<2x16x16xf32>
    %cst_25 = arith.constant dense<0.000000e+00> : vector<2x16xf32>
    %79 = vector.multi_reduction <add>, %78, %cst_25 [2] : vector<2x16x16xf32> to vector<2x16xf32>
    %80 = vector.shape_cast %79 : vector<2x16xf32> to vector<2x16x1xf32>
    %81 = tpu.reciprocal %80 {approx = true} : vector<2x16x1xf32> -> vector<2x16x1xf32>
    %82 = vector.broadcast %81 : vector<2x16x1xf32> to vector<2x16x16xf32>
    %83 = arith.mulf %78, %82 : vector<2x16x16xf32>
    %84 = arith.truncf %83 : vector<2x16x16xf32> to vector<2x16x16xbf16>
    %cst_26 = arith.constant dense<0.000000e+00> : vector<2x16x16xf32>
    %85 = tpu.matmul %84, %67, %cst_26 {dimension_numbers = #tpu.dot_dimension_numbers<[2], [1], [1], [2], [0, 0, 0, 1, 1, 2], [0], [0]>} : vector<2x16x16xbf16>, vector<2x16x16xbf16>, vector<2x16x16xf32> -> vector<2x16x16xf32>
    %86 = vector.shape_cast %85 : vector<2x16x16xf32> to vector<32x16xf32>
    %87 = tpu.concatenate %58, %86 in 1 : vector<32x16xf32>, vector<32x16xf32> -> vector<32x32xf32>
    %88 = arith.truncf %87 : vector<32x32xf32> to vector<32x32xbf16>
    %c0_27 = arith.constant 0 : index
    %c0_28 = arith.constant 0 : index
    %89 = vector.load %arg7[%c0_27, %c0_28] : memref<32x32xbf16, #tpu.memory_space<vmem>>, vector<32x32xbf16>
    %cst_29 = arith.constant dense<0.000000e+00> : vector<32x32xf32>
    %90 = tpu.matmul %88, %89, %cst_29 {dimension_numbers = #tpu.dot_dimension_numbers<[1], [0], [0], [1], [0, 0, 1, 1], [], []>} : vector<32x32xbf16>, vector<32x32xbf16>, vector<32x32xf32> -> vector<32x32xf32>
    %91 = arith.addf %0, %90 : vector<32x32xf32>
    %c0_30 = arith.constant 0 : index
    %c0_31 = arith.constant 0 : index
    %92 = vector.load %arg8[%c0_30, %c0_31] : memref<1x32xf32, #tpu.memory_space<vmem>>, vector<1x32xf32>
    %93 = vector.broadcast %92 : vector<1x32xf32> to vector<32x32xf32>
    %94 = arith.addf %91, %93 : vector<32x32xf32>
    %cst_32 = arith.constant dense<0.000000e+00> : vector<32xf32>
    %95 = vector.multi_reduction <add>, %94, %cst_32 [1] : vector<32x32xf32> to vector<32xf32>
    %96 = vector.shape_cast %95 : vector<32xf32> to vector<32x1xf32>
    %cst_33 = arith.constant 3.200000e+01 : f32
    %97 = vector.broadcast %cst_33 : f32 to vector<32x1xf32>
    %98 = arith.divf %96, %97 : vector<32x1xf32>
    %99 = vector.broadcast %98 : vector<32x1xf32> to vector<32x32xf32>
    %100 = arith.subf %94, %99 : vector<32x32xf32>
    %101 = arith.mulf %100, %100 : vector<32x32xf32>
    %cst_34 = arith.constant dense<0.000000e+00> : vector<32xf32>
    %102 = vector.multi_reduction <add>, %101, %cst_34 [1] : vector<32x32xf32> to vector<32xf32>
    %103 = vector.shape_cast %102 : vector<32xf32> to vector<32x1xf32>
    %cst_35 = arith.constant 3.200000e+01 : f32
    %104 = vector.broadcast %cst_35 : f32 to vector<32x1xf32>
    %105 = arith.divf %103, %104 : vector<32x1xf32>
    %106 = vector.broadcast %98 : vector<32x1xf32> to vector<32x32xf32>
    %107 = arith.subf %94, %106 : vector<32x32xf32>
    %cst_36 = arith.constant 9.99999974E-6 : f32
    %108 = vector.broadcast %cst_36 : f32 to vector<32x1xf32>
    %109 = arith.addf %105, %108 : vector<32x1xf32>
    %110 = math.rsqrt %109 : vector<32x1xf32>
    %111 = vector.broadcast %110 : vector<32x1xf32> to vector<32x32xf32>
    %112 = arith.mulf %107, %111 : vector<32x32xf32>
    %c0_37 = arith.constant 0 : index
    %c0_38 = arith.constant 0 : index
    %113 = vector.load %arg9[%c0_37, %c0_38] : memref<1x32xf32, #tpu.memory_space<vmem>>, vector<1x32xf32>
    %114 = vector.broadcast %113 : vector<1x32xf32> to vector<32x32xf32>
    %115 = arith.mulf %112, %114 : vector<32x32xf32>
    %c0_39 = arith.constant 0 : index
    %c0_40 = arith.constant 0 : index
    %116 = vector.load %arg10[%c0_39, %c0_40] : memref<1x32xf32, #tpu.memory_space<vmem>>, vector<1x32xf32>
    %117 = vector.broadcast %116 : vector<1x32xf32> to vector<32x32xf32>
    %118 = arith.addf %115, %117 : vector<32x32xf32>
    %119 = arith.truncf %118 : vector<32x32xf32> to vector<32x32xbf16>
    %c0_41 = arith.constant 0 : index
    %c0_42 = arith.constant 0 : index
    %120 = vector.load %arg11[%c0_41, %c0_42] : memref<32x128xbf16, #tpu.memory_space<vmem>>, vector<32x128xbf16>
    %cst_43 = arith.constant dense<0.000000e+00> : vector<32x128xf32>
    %121 = tpu.matmul %119, %120, %cst_43 {dimension_numbers = #tpu.dot_dimension_numbers<[1], [0], [0], [1], [0, 0, 1, 1], [], []>} : vector<32x32xbf16>, vector<32x128xbf16>, vector<32x128xf32> -> vector<32x128xf32>
    %c0_44 = arith.constant 0 : index
    %c0_45 = arith.constant 0 : index
    %122 = vector.load %arg12[%c0_44, %c0_45] : memref<1x128xf32, #tpu.memory_space<vmem>>, vector<1x128xf32>
    %123 = vector.broadcast %122 : vector<1x128xf32> to vector<32x128xf32>
    %124 = arith.addf %121, %123 : vector<32x128xf32>
    %cst_46 = arith.constant 5.000000e-01 : f32
    %125 = vector.broadcast %cst_46 : f32 to vector<32x128xf32>
    %126 = arith.mulf %125, %124 : vector<32x128xf32>
    %cst_47 = arith.constant 0.707106769 : f32
    %127 = vector.broadcast %cst_47 : f32 to vector<32x128xf32>
    %128 = arith.mulf %124, %127 : vector<32x128xf32>
    %cst_48 = arith.constant 0.000000e+00 : f32
    %129 = vector.broadcast %cst_48 : f32 to vector<32x128xf32>
    %130 = arith.cmpf oge, %128, %129 : vector<32x128xf32>
    %cst_49 = arith.constant 1.000000e+00 : f32
    %cst_50 = arith.constant -1.000000e+00 : f32
    %131 = vector.broadcast %cst_49 : f32 to vector<32x128xf32>
    %132 = vector.broadcast %cst_50 : f32 to vector<32x128xf32>
    %133 = arith.select %130, %131, %132 : vector<32x128xi1>, vector<32x128xf32>
    %134 = math.absf %128 : vector<32x128xf32>
    %cst_51 = arith.constant 0.327591091 : f32
    %135 = vector.broadcast %cst_51 : f32 to vector<32x128xf32>
    %136 = arith.mulf %135, %134 : vector<32x128xf32>
    %cst_52 = arith.constant 1.000000e+00 : f32
    %137 = vector.broadcast %cst_52 : f32 to vector<32x128xf32>
    %138 = arith.addf %137, %136 : vector<32x128xf32>
    %cst_53 = arith.constant 1.000000e+00 : f32
    %139 = vector.broadcast %cst_53 : f32 to vector<32x128xf32>
    %140 = arith.divf %139, %138 : vector<32x128xf32>
    %cst_54 = arith.constant 1.06140542 : f32
    %141 = vector.broadcast %cst_54 : f32 to vector<32x128xf32>
    %142 = arith.mulf %141, %140 : vector<32x128xf32>
    %cst_55 = arith.constant -1.45315206 : f32
    %143 = vector.broadcast %cst_55 : f32 to vector<32x128xf32>
    %144 = arith.addf %142, %143 : vector<32x128xf32>
    %145 = arith.mulf %144, %140 : vector<32x128xf32>
    %cst_56 = arith.constant 1.42141378 : f32
    %146 = vector.broadcast %cst_56 : f32 to vector<32x128xf32>
    %147 = arith.addf %145, %146 : vector<32x128xf32>
    %148 = arith.mulf %147, %140 : vector<32x128xf32>
    %cst_57 = arith.constant -0.284496725 : f32
    %149 = vector.broadcast %cst_57 : f32 to vector<32x128xf32>
    %150 = arith.addf %148, %149 : vector<32x128xf32>
    %151 = arith.mulf %150, %140 : vector<32x128xf32>
    %cst_58 = arith.constant 0.254829586 : f32
    %152 = vector.broadcast %cst_58 : f32 to vector<32x128xf32>
    %153 = arith.addf %151, %152 : vector<32x128xf32>
    %154 = arith.mulf %153, %140 : vector<32x128xf32>
    %cst_59 = arith.constant 0.000000e+00 : f32
    %155 = vector.broadcast %cst_59 : f32 to vector<32x128xf32>
    %156 = arith.subf %155, %134 : vector<32x128xf32>
    %157 = arith.mulf %156, %134 : vector<32x128xf32>
    %158 = math.exp %157 : vector<32x128xf32>
    %159 = arith.mulf %154, %158 : vector<32x128xf32>
    %cst_60 = arith.constant 1.000000e+00 : f32
    %160 = vector.broadcast %cst_60 : f32 to vector<32x128xf32>
    %161 = arith.subf %160, %159 : vector<32x128xf32>
    %162 = arith.mulf %133, %161 : vector<32x128xf32>
    %cst_61 = arith.constant 1.000000e+00 : f32
    %163 = vector.broadcast %cst_61 : f32 to vector<32x128xf32>
    %164 = arith.addf %163, %162 : vector<32x128xf32>
    %165 = arith.mulf %126, %164 : vector<32x128xf32>
    %166 = arith.truncf %165 : vector<32x128xf32> to vector<32x128xbf16>
    %c0_62 = arith.constant 0 : index
    %c0_63 = arith.constant 0 : index
    %167 = vector.load %arg13[%c0_62, %c0_63] : memref<128x32xbf16, #tpu.memory_space<vmem>>, vector<128x32xbf16>
    %cst_64 = arith.constant dense<0.000000e+00> : vector<32x32xf32>
    %168 = tpu.matmul %166, %167, %cst_64 {dimension_numbers = #tpu.dot_dimension_numbers<[1], [0], [0], [1], [0, 0, 1, 1], [], []>} : vector<32x128xbf16>, vector<128x32xbf16>, vector<32x32xf32> -> vector<32x32xf32>
    %c0_65 = arith.constant 0 : index
    %c0_66 = arith.constant 0 : index
    %169 = vector.load %arg14[%c0_65, %c0_66] : memref<1x32xf32, #tpu.memory_space<vmem>>, vector<1x32xf32>
    %170 = vector.broadcast %169 : vector<1x32xf32> to vector<32x32xf32>
    %171 = arith.addf %168, %170 : vector<32x32xf32>
    %172 = arith.addf %94, %171 : vector<32x32xf32>
    %c0_67 = arith.constant 0 : index
    %c0_68 = arith.constant 0 : index
    %173 = vector.load %arg15[%c0_67, %c0_68] : memref<32x32xf32, #tpu.memory_space<vmem>>, vector<32x32xf32>
    tpu.vector_store %arg15[%c0_67, %c0_68], %172 {strides = array<i32>} : memref<32x32xf32, #tpu.memory_space<vmem>>, vector<32x32xf32>,
    return
  }
  func.func @transform_0(%arg0: i32) -> (i32, i32) {
    %c0_i32 = arith.constant 0 : i32
    %c0_i32_0 = arith.constant 0 : i32
    return %arg0, %c0_i32 : i32, i32
  }
  func.func @transform_1(%arg0: i32) -> (i32, i32) {
    %c0_i32 = arith.constant 0 : i32
    %c0_i32_0 = arith.constant 0 : i32
    %c0_i32_1 = arith.constant 0 : i32
    return %c0_i32, %c0_i32_0 : i32, i32
  }
  func.func @transform_2(%arg0: i32) -> (i32, i32) {
    %c0_i32 = arith.constant 0 : i32
    %c0_i32_0 = arith.constant 0 : i32
    %c0_i32_1 = arith.constant 0 : i32
    return %c0_i32, %c0_i32_0 : i32, i32
  }
  func.func @transform_3(%arg0: i32) -> (i32, i32) {
    %c0_i32 = arith.constant 0 : i32
    %c0_i32_0 = arith.constant 0 : i32
    %c0_i32_1 = arith.constant 0 : i32
    return %c0_i32, %c0_i32_0 : i32, i32
  }
  func.func @transform_4(%arg0: i32) -> (i32, i32) {
    %c0_i32 = arith.constant 0 : i32
    %c0_i32_0 = arith.constant 0 : i32
    %c0_i32_1 = arith.constant 0 : i32
    return %c0_i32, %c0_i32_0 : i32, i32
  }
  func.func @transform_5(%arg0: i32) -> (i32, i32, i32) {
    %c0_i32 = arith.constant 0 : i32
    %c0_i32_0 = arith.constant 0 : i32
    %c0_i32_1 = arith.constant 0 : i32
    %c0_i32_2 = arith.constant 0 : i32
    return %c0_i32, %c0_i32_0, %c0_i32_1 : i32, i32, i32
  }
  func.func @transform_6(%arg0: i32) -> (i32, i32) {
    %c0_i32 = arith.constant 0 : i32
    %c0_i32_0 = arith.constant 0 : i32
    %c0_i32_1 = arith.constant 0 : i32
    return %c0_i32, %c0_i32_0 : i32, i32
  }
  func.func @transform_7(%arg0: i32) -> (i32, i32) {
    %c0_i32 = arith.constant 0 : i32
    %c0_i32_0 = arith.constant 0 : i32
    %c0_i32_1 = arith.constant 0 : i32
    return %c0_i32, %c0_i32_0 : i32, i32
  }
  func.func @transform_8(%arg0: i32) -> (i32, i32) {
    %c0_i32 = arith.constant 0 : i32
    %c0_i32_0 = arith.constant 0 : i32
    %c0_i32_1 = arith.constant 0 : i32
    return %c0_i32, %c0_i32_0 : i32, i32
  }
  func.func @transform_9(%arg0: i32) -> (i32, i32) {
    %c0_i32 = arith.constant 0 : i32
    %c0_i32_0 = arith.constant 0 : i32
    %c0_i32_1 = arith.constant 0 : i32
    return %c0_i32, %c0_i32_0 : i32, i32
  }
  func.func @transform_10(%arg0: i32) -> (i32, i32) {
    %c0_i32 = arith.constant 0 : i32
    %c0_i32_0 = arith.constant 0 : i32
    %c0_i32_1 = arith.constant 0 : i32
    return %c0_i32, %c0_i32_0 : i32, i32
  }
  func.func @transform_11(%arg0: i32) -> (i32, i32) {
    %c0_i32 = arith.constant 0 : i32
    %c0_i32_0 = arith.constant 0 : i32
    %c0_i32_1 = arith.constant 0 : i32
    return %c0_i32, %c0_i32_0 : i32, i32
  }
  func.func @transform_12(%arg0: i32) -> (i32, i32) {
    %c0_i32 = arith.constant 0 : i32
    %c0_i32_0 = arith.constant 0 : i32
    %c0_i32_1 = arith.constant 0 : i32
    return %c0_i32, %c0_i32_0 : i32, i32
  }
  func.func @transform_13(%arg0: i32) -> (i32, i32) {
    %c0_i32 = arith.constant 0 : i32
    %c0_i32_0 = arith.constant 0 : i32
    %c0_i32_1 = arith.constant 0 : i32
    return %c0_i32, %c0_i32_0 : i32, i32
  }
  func.func @transform_14(%arg0: i32) -> (i32, i32) {
    %c0_i32 = arith.constant 0 : i32
    %c0_i32_0 = arith.constant 0 : i32
    return %arg0, %c0_i32 : i32, i32
  }
}

module attributes {stable_mosaic.version = 11 : i64} {
  func.func @_swin_block_kernel(%arg0: i32, %arg1: memref<32x32xf32, #tpu.memory_space<vmem>>, %arg2: memref<1x32xf32, #tpu.memory_space<vmem>>, %arg3: memref<1x32xf32, #tpu.memory_space<vmem>>, %arg4: memref<32x96xbf16, #tpu.memory_space<vmem>>, %arg5: memref<1x96xf32, #tpu.memory_space<vmem>>, %arg6: memref<2x16x16xf32, #tpu.memory_space<vmem>>, %arg7: memref<2x16x16xf32, #tpu.memory_space<vmem>>, %arg8: memref<32x32xbf16, #tpu.memory_space<vmem>>, %arg9: memref<1x32xf32, #tpu.memory_space<vmem>>, %arg10: memref<1x32xf32, #tpu.memory_space<vmem>>, %arg11: memref<1x32xf32, #tpu.memory_space<vmem>>, %arg12: memref<32x128xbf16, #tpu.memory_space<vmem>>, %arg13: memref<1x128xf32, #tpu.memory_space<vmem>>, %arg14: memref<128x32xbf16, #tpu.memory_space<vmem>>, %arg15: memref<1x32xf32, #tpu.memory_space<vmem>>, %arg16: memref<32x32xf32, #tpu.memory_space<vmem>>) attributes {dimension_semantics = [#tpu.dimension_semantics<parallel>], iteration_bounds = array<i64: 4>, scalar_prefetch = 0 : i64, scratch_operands = 0 : i64, tpu.core_type = #tpu.core_type<tc>, window_params = [{transform_indices = @transform_0, window_bounds = array<i64: 32, 32>}, {pipeline_mode = #tpu.pipeline_mode<synchronous>, transform_indices = @transform_1, window_bounds = array<i64: 1, 32>}, {pipeline_mode = #tpu.pipeline_mode<synchronous>, transform_indices = @transform_2, window_bounds = array<i64: 1, 32>}, {pipeline_mode = #tpu.pipeline_mode<synchronous>, transform_indices = @transform_3, window_bounds = array<i64: 32, 96>}, {pipeline_mode = #tpu.pipeline_mode<synchronous>, transform_indices = @transform_4, window_bounds = array<i64: 1, 96>}, {pipeline_mode = #tpu.pipeline_mode<synchronous>, transform_indices = @transform_5, window_bounds = array<i64: 2, 16, 16>}, {transform_indices = @transform_6, window_bounds = array<i64: 2, 16, 16>}, {pipeline_mode = #tpu.pipeline_mode<synchronous>, transform_indices = @transform_7, window_bounds = array<i64: 32, 32>}, {pipeline_mode = #tpu.pipeline_mode<synchronous>, transform_indices = @transform_8, window_bounds = array<i64: 1, 32>}, {pipeline_mode = #tpu.pipeline_mode<synchronous>, transform_indices = @transform_9, window_bounds = array<i64: 1, 32>}, {pipeline_mode = #tpu.pipeline_mode<synchronous>, transform_indices = @transform_10, window_bounds = array<i64: 1, 32>}, {pipeline_mode = #tpu.pipeline_mode<synchronous>, transform_indices = @transform_11, window_bounds = array<i64: 32, 128>}, {pipeline_mode = #tpu.pipeline_mode<synchronous>, transform_indices = @transform_12, window_bounds = array<i64: 1, 128>}, {pipeline_mode = #tpu.pipeline_mode<synchronous>, transform_indices = @transform_13, window_bounds = array<i64: 128, 32>}, {pipeline_mode = #tpu.pipeline_mode<synchronous>, transform_indices = @transform_14, window_bounds = array<i64: 1, 32>}, {transform_indices = @transform_15, window_bounds = array<i64: 32, 32>}]} {
    %c0 = arith.constant 0 : index
    %c0_0 = arith.constant 0 : index
    %0 = vector.load %arg1[%c0, %c0_0] : memref<32x32xf32, #tpu.memory_space<vmem>>, vector<32x32xf32>
    %cst = arith.constant dense<0.000000e+00> : vector<32xf32>
    %1 = vector.multi_reduction <add>, %0, %cst [1] : vector<32x32xf32> to vector<32xf32>
    %2 = vector.shape_cast %1 : vector<32xf32> to vector<32x1xf32>
    %cst_1 = arith.constant 3.200000e+01 : f32
    %3 = vector.broadcast %cst_1 : f32 to vector<32x1xf32>
    %4 = arith.divf %2, %3 : vector<32x1xf32>
    %5 = vector.broadcast %4 : vector<32x1xf32> to vector<32x32xf32>
    %6 = arith.subf %0, %5 : vector<32x32xf32>
    %7 = arith.mulf %6, %6 : vector<32x32xf32>
    %cst_2 = arith.constant dense<0.000000e+00> : vector<32xf32>
    %8 = vector.multi_reduction <add>, %7, %cst_2 [1] : vector<32x32xf32> to vector<32xf32>
    %9 = vector.shape_cast %8 : vector<32xf32> to vector<32x1xf32>
    %cst_3 = arith.constant 3.200000e+01 : f32
    %10 = vector.broadcast %cst_3 : f32 to vector<32x1xf32>
    %11 = arith.divf %9, %10 : vector<32x1xf32>
    %12 = vector.broadcast %4 : vector<32x1xf32> to vector<32x32xf32>
    %13 = arith.subf %0, %12 : vector<32x32xf32>
    %cst_4 = arith.constant 9.99999974E-6 : f32
    %14 = vector.broadcast %cst_4 : f32 to vector<32x1xf32>
    %15 = arith.addf %11, %14 : vector<32x1xf32>
    %16 = math.rsqrt %15 : vector<32x1xf32>
    %17 = vector.broadcast %16 : vector<32x1xf32> to vector<32x32xf32>
    %18 = arith.mulf %13, %17 : vector<32x32xf32>
    %c0_5 = arith.constant 0 : index
    %c0_6 = arith.constant 0 : index
    %19 = vector.load %arg2[%c0_5, %c0_6] : memref<1x32xf32, #tpu.memory_space<vmem>>, vector<1x32xf32>
    %20 = vector.broadcast %19 : vector<1x32xf32> to vector<32x32xf32>
    %21 = arith.mulf %18, %20 : vector<32x32xf32>
    %c0_7 = arith.constant 0 : index
    %c0_8 = arith.constant 0 : index
    %22 = vector.load %arg3[%c0_7, %c0_8] : memref<1x32xf32, #tpu.memory_space<vmem>>, vector<1x32xf32>
    %23 = vector.broadcast %22 : vector<1x32xf32> to vector<32x32xf32>
    %24 = arith.addf %21, %23 : vector<32x32xf32>
    %25 = arith.truncf %24 : vector<32x32xf32> to vector<32x32xbf16>
    %c0_9 = arith.constant 0 : index
    %c0_10 = arith.constant 0 : index
    %26 = vector.load %arg4[%c0_9, %c0_10] : memref<32x96xbf16, #tpu.memory_space<vmem>>, vector<32x96xbf16>
    %cst_11 = arith.constant dense<0.000000e+00> : vector<32x96xf32>
    %27 = tpu.matmul %25, %26, %cst_11 {dimension_numbers = #tpu.dot_dimension_numbers<[1], [0], [0], [1], [0, 0, 1, 1], [], []>} : vector<32x32xbf16>, vector<32x96xbf16>, vector<32x96xf32> -> vector<32x96xf32>
    %c0_12 = arith.constant 0 : index
    %c0_13 = arith.constant 0 : index
    %28 = vector.load %arg5[%c0_12, %c0_13] : memref<1x96xf32, #tpu.memory_space<vmem>>, vector<1x96xf32>
    %29 = vector.broadcast %28 : vector<1x96xf32> to vector<32x96xf32>
    %30 = arith.addf %27, %29 : vector<32x96xf32>
    %c0_14 = arith.constant 0 : index
    %c0_15 = arith.constant 0 : index
    %c0_16 = arith.constant 0 : index
    %31 = vector.load %arg7[%c0_14, %c0_15, %c0_16] : memref<2x16x16xf32, #tpu.memory_space<vmem>>, vector<2x16x16xf32>
    %32 = vector.extract_strided_slice %30 {offsets = [0, 0], sizes = [32, 16], strides = [1, 1]} : vector<32x96xf32> to vector<32x16xf32>
    %33 = vector.shape_cast %32 : vector<32x16xf32> to vector<2x16x16xf32>
    %34 = arith.truncf %33 : vector<2x16x16xf32> to vector<2x16x16xbf16>
    %35 = vector.extract_strided_slice %30 {offsets = [0, 32], sizes = [32, 16], strides = [1, 1]} : vector<32x96xf32> to vector<32x16xf32>
    %36 = vector.shape_cast %35 : vector<32x16xf32> to vector<2x16x16xf32>
    %37 = arith.truncf %36 : vector<2x16x16xf32> to vector<2x16x16xbf16>
    %38 = vector.extract_strided_slice %30 {offsets = [0, 64], sizes = [32, 16], strides = [1, 1]} : vector<32x96xf32> to vector<32x16xf32>
    %39 = vector.shape_cast %38 : vector<32x16xf32> to vector<2x16x16xf32>
    %40 = arith.truncf %39 : vector<2x16x16xf32> to vector<2x16x16xbf16>
    %cst_17 = arith.constant dense<0.000000e+00> : vector<2x16x16xf32>
    %41 = tpu.matmul %34, %37, %cst_17 {dimension_numbers = #tpu.dot_dimension_numbers<[2], [2], [1], [1], [0, 0, 0, 1, 1, 1], [0], [0]>} : vector<2x16x16xbf16>, vector<2x16x16xbf16>, vector<2x16x16xf32> -> vector<2x16x16xf32>
    %c0_18 = arith.constant 0 : index
    %c0_19 = arith.constant 0 : index
    %c0_20 = arith.constant 0 : index
    %42 = vector.load %arg6[%c0_18, %c0_19, %c0_20] : memref<2x16x16xf32, #tpu.memory_space<vmem>>, vector<1x16x16xf32>
    %43 = vector.shape_cast %42 : vector<1x16x16xf32> to vector<16x16xf32>
    %44 = vector.shape_cast %43 : vector<16x16xf32> to vector<1x16x16xf32>
    %45 = vector.broadcast %44 : vector<1x16x16xf32> to vector<2x16x16xf32>
    %46 = arith.addf %41, %45 : vector<2x16x16xf32>
    %47 = arith.addf %46, %31 : vector<2x16x16xf32>
    %cst_21 = arith.constant dense<0xFF800000> : vector<2x16xf32>
    %48 = vector.multi_reduction <maximumf>, %47, %cst_21 [2] : vector<2x16x16xf32> to vector<2x16xf32>
    %49 = vector.shape_cast %48 : vector<2x16xf32> to vector<2x16x1xf32>
    %50 = vector.broadcast %49 : vector<2x16x1xf32> to vector<2x16x16xf32>
    %51 = arith.subf %47, %50 : vector<2x16x16xf32>
    %52 = math.exp %51 : vector<2x16x16xf32>
    %cst_22 = arith.constant dense<0.000000e+00> : vector<2x16xf32>
    %53 = vector.multi_reduction <add>, %52, %cst_22 [2] : vector<2x16x16xf32> to vector<2x16xf32>
    %54 = vector.shape_cast %53 : vector<2x16xf32> to vector<2x16x1xf32>
    %55 = tpu.reciprocal %54 {approx = true} : vector<2x16x1xf32> -> vector<2x16x1xf32>
    %56 = vector.broadcast %55 : vector<2x16x1xf32> to vector<2x16x16xf32>
    %57 = arith.mulf %52, %56 : vector<2x16x16xf32>
    %58 = arith.truncf %57 : vector<2x16x16xf32> to vector<2x16x16xbf16>
    %cst_23 = arith.constant dense<0.000000e+00> : vector<2x16x16xf32>
    %59 = tpu.matmul %58, %40, %cst_23 {dimension_numbers = #tpu.dot_dimension_numbers<[2], [1], [1], [2], [0, 0, 0, 1, 1, 2], [0], [0]>} : vector<2x16x16xbf16>, vector<2x16x16xbf16>, vector<2x16x16xf32> -> vector<2x16x16xf32>
    %60 = vector.shape_cast %59 : vector<2x16x16xf32> to vector<32x16xf32>
    %61 = vector.extract_strided_slice %30 {offsets = [0, 16], sizes = [32, 16], strides = [1, 1]} : vector<32x96xf32> to vector<32x16xf32>
    %62 = vector.shape_cast %61 : vector<32x16xf32> to vector<2x16x16xf32>
    %63 = arith.truncf %62 : vector<2x16x16xf32> to vector<2x16x16xbf16>
    %64 = vector.extract_strided_slice %30 {offsets = [0, 48], sizes = [32, 16], strides = [1, 1]} : vector<32x96xf32> to vector<32x16xf32>
    %65 = vector.shape_cast %64 : vector<32x16xf32> to vector<2x16x16xf32>
    %66 = arith.truncf %65 : vector<2x16x16xf32> to vector<2x16x16xbf16>
    %67 = vector.extract_strided_slice %30 {offsets = [0, 80], sizes = [32, 16], strides = [1, 1]} : vector<32x96xf32> to vector<32x16xf32>
    %68 = vector.shape_cast %67 : vector<32x16xf32> to vector<2x16x16xf32>
    %69 = arith.truncf %68 : vector<2x16x16xf32> to vector<2x16x16xbf16>
    %cst_24 = arith.constant dense<0.000000e+00> : vector<2x16x16xf32>
    %70 = tpu.matmul %63, %66, %cst_24 {dimension_numbers = #tpu.dot_dimension_numbers<[2], [2], [1], [1], [0, 0, 0, 1, 1, 1], [0], [0]>} : vector<2x16x16xbf16>, vector<2x16x16xbf16>, vector<2x16x16xf32> -> vector<2x16x16xf32>
    %c1 = arith.constant 1 : index
    %c0_25 = arith.constant 0 : index
    %c0_26 = arith.constant 0 : index
    %71 = vector.load %arg6[%c1, %c0_25, %c0_26] : memref<2x16x16xf32, #tpu.memory_space<vmem>>, vector<1x16x16xf32>
    %72 = vector.shape_cast %71 : vector<1x16x16xf32> to vector<16x16xf32>
    %73 = vector.shape_cast %72 : vector<16x16xf32> to vector<1x16x16xf32>
    %74 = vector.broadcast %73 : vector<1x16x16xf32> to vector<2x16x16xf32>
    %75 = arith.addf %70, %74 : vector<2x16x16xf32>
    %76 = arith.addf %75, %31 : vector<2x16x16xf32>
    %cst_27 = arith.constant dense<0xFF800000> : vector<2x16xf32>
    %77 = vector.multi_reduction <maximumf>, %76, %cst_27 [2] : vector<2x16x16xf32> to vector<2x16xf32>
    %78 = vector.shape_cast %77 : vector<2x16xf32> to vector<2x16x1xf32>
    %79 = vector.broadcast %78 : vector<2x16x1xf32> to vector<2x16x16xf32>
    %80 = arith.subf %76, %79 : vector<2x16x16xf32>
    %81 = math.exp %80 : vector<2x16x16xf32>
    %cst_28 = arith.constant dense<0.000000e+00> : vector<2x16xf32>
    %82 = vector.multi_reduction <add>, %81, %cst_28 [2] : vector<2x16x16xf32> to vector<2x16xf32>
    %83 = vector.shape_cast %82 : vector<2x16xf32> to vector<2x16x1xf32>
    %84 = tpu.reciprocal %83 {approx = true} : vector<2x16x1xf32> -> vector<2x16x1xf32>
    %85 = vector.broadcast %84 : vector<2x16x1xf32> to vector<2x16x16xf32>
    %86 = arith.mulf %81, %85 : vector<2x16x16xf32>
    %87 = arith.truncf %86 : vector<2x16x16xf32> to vector<2x16x16xbf16>
    %cst_29 = arith.constant dense<0.000000e+00> : vector<2x16x16xf32>
    %88 = tpu.matmul %87, %69, %cst_29 {dimension_numbers = #tpu.dot_dimension_numbers<[2], [1], [1], [2], [0, 0, 0, 1, 1, 2], [0], [0]>} : vector<2x16x16xbf16>, vector<2x16x16xbf16>, vector<2x16x16xf32> -> vector<2x16x16xf32>
    %89 = vector.shape_cast %88 : vector<2x16x16xf32> to vector<32x16xf32>
    %90 = tpu.concatenate %60, %89 in 1 : vector<32x16xf32>, vector<32x16xf32> -> vector<32x32xf32>
    %91 = arith.truncf %90 : vector<32x32xf32> to vector<32x32xbf16>
    %c0_30 = arith.constant 0 : index
    %c0_31 = arith.constant 0 : index
    %92 = vector.load %arg8[%c0_30, %c0_31] : memref<32x32xbf16, #tpu.memory_space<vmem>>, vector<32x32xbf16>
    %cst_32 = arith.constant dense<0.000000e+00> : vector<32x32xf32>
    %93 = tpu.matmul %91, %92, %cst_32 {dimension_numbers = #tpu.dot_dimension_numbers<[1], [0], [0], [1], [0, 0, 1, 1], [], []>} : vector<32x32xbf16>, vector<32x32xbf16>, vector<32x32xf32> -> vector<32x32xf32>
    %94 = arith.addf %0, %93 : vector<32x32xf32>
    %c0_33 = arith.constant 0 : index
    %c0_34 = arith.constant 0 : index
    %95 = vector.load %arg9[%c0_33, %c0_34] : memref<1x32xf32, #tpu.memory_space<vmem>>, vector<1x32xf32>
    %96 = vector.broadcast %95 : vector<1x32xf32> to vector<32x32xf32>
    %97 = arith.addf %94, %96 : vector<32x32xf32>
    %cst_35 = arith.constant dense<0.000000e+00> : vector<32xf32>
    %98 = vector.multi_reduction <add>, %97, %cst_35 [1] : vector<32x32xf32> to vector<32xf32>
    %99 = vector.shape_cast %98 : vector<32xf32> to vector<32x1xf32>
    %cst_36 = arith.constant 3.200000e+01 : f32
    %100 = vector.broadcast %cst_36 : f32 to vector<32x1xf32>
    %101 = arith.divf %99, %100 : vector<32x1xf32>
    %102 = vector.broadcast %101 : vector<32x1xf32> to vector<32x32xf32>
    %103 = arith.subf %97, %102 : vector<32x32xf32>
    %104 = arith.mulf %103, %103 : vector<32x32xf32>
    %cst_37 = arith.constant dense<0.000000e+00> : vector<32xf32>
    %105 = vector.multi_reduction <add>, %104, %cst_37 [1] : vector<32x32xf32> to vector<32xf32>
    %106 = vector.shape_cast %105 : vector<32xf32> to vector<32x1xf32>
    %cst_38 = arith.constant 3.200000e+01 : f32
    %107 = vector.broadcast %cst_38 : f32 to vector<32x1xf32>
    %108 = arith.divf %106, %107 : vector<32x1xf32>
    %109 = vector.broadcast %101 : vector<32x1xf32> to vector<32x32xf32>
    %110 = arith.subf %97, %109 : vector<32x32xf32>
    %cst_39 = arith.constant 9.99999974E-6 : f32
    %111 = vector.broadcast %cst_39 : f32 to vector<32x1xf32>
    %112 = arith.addf %108, %111 : vector<32x1xf32>
    %113 = math.rsqrt %112 : vector<32x1xf32>
    %114 = vector.broadcast %113 : vector<32x1xf32> to vector<32x32xf32>
    %115 = arith.mulf %110, %114 : vector<32x32xf32>
    %c0_40 = arith.constant 0 : index
    %c0_41 = arith.constant 0 : index
    %116 = vector.load %arg10[%c0_40, %c0_41] : memref<1x32xf32, #tpu.memory_space<vmem>>, vector<1x32xf32>
    %117 = vector.broadcast %116 : vector<1x32xf32> to vector<32x32xf32>
    %118 = arith.mulf %115, %117 : vector<32x32xf32>
    %c0_42 = arith.constant 0 : index
    %c0_43 = arith.constant 0 : index
    %119 = vector.load %arg11[%c0_42, %c0_43] : memref<1x32xf32, #tpu.memory_space<vmem>>, vector<1x32xf32>
    %120 = vector.broadcast %119 : vector<1x32xf32> to vector<32x32xf32>
    %121 = arith.addf %118, %120 : vector<32x32xf32>
    %122 = arith.truncf %121 : vector<32x32xf32> to vector<32x32xbf16>
    %c0_44 = arith.constant 0 : index
    %c0_45 = arith.constant 0 : index
    %123 = vector.load %arg12[%c0_44, %c0_45] : memref<32x128xbf16, #tpu.memory_space<vmem>>, vector<32x128xbf16>
    %cst_46 = arith.constant dense<0.000000e+00> : vector<32x128xf32>
    %124 = tpu.matmul %122, %123, %cst_46 {dimension_numbers = #tpu.dot_dimension_numbers<[1], [0], [0], [1], [0, 0, 1, 1], [], []>} : vector<32x32xbf16>, vector<32x128xbf16>, vector<32x128xf32> -> vector<32x128xf32>
    %c0_47 = arith.constant 0 : index
    %c0_48 = arith.constant 0 : index
    %125 = vector.load %arg13[%c0_47, %c0_48] : memref<1x128xf32, #tpu.memory_space<vmem>>, vector<1x128xf32>
    %126 = vector.broadcast %125 : vector<1x128xf32> to vector<32x128xf32>
    %127 = arith.addf %124, %126 : vector<32x128xf32>
    %cst_49 = arith.constant 5.000000e-01 : f32
    %128 = vector.broadcast %cst_49 : f32 to vector<32x128xf32>
    %129 = arith.mulf %128, %127 : vector<32x128xf32>
    %cst_50 = arith.constant 0.707106769 : f32
    %130 = vector.broadcast %cst_50 : f32 to vector<32x128xf32>
    %131 = arith.mulf %127, %130 : vector<32x128xf32>
    %cst_51 = arith.constant 0.000000e+00 : f32
    %132 = vector.broadcast %cst_51 : f32 to vector<32x128xf32>
    %133 = arith.cmpf oge, %131, %132 : vector<32x128xf32>
    %cst_52 = arith.constant 1.000000e+00 : f32
    %cst_53 = arith.constant -1.000000e+00 : f32
    %134 = vector.broadcast %cst_52 : f32 to vector<32x128xf32>
    %135 = vector.broadcast %cst_53 : f32 to vector<32x128xf32>
    %136 = arith.select %133, %134, %135 : vector<32x128xi1>, vector<32x128xf32>
    %137 = math.absf %131 : vector<32x128xf32>
    %cst_54 = arith.constant 0.327591091 : f32
    %138 = vector.broadcast %cst_54 : f32 to vector<32x128xf32>
    %139 = arith.mulf %138, %137 : vector<32x128xf32>
    %cst_55 = arith.constant 1.000000e+00 : f32
    %140 = vector.broadcast %cst_55 : f32 to vector<32x128xf32>
    %141 = arith.addf %140, %139 : vector<32x128xf32>
    %cst_56 = arith.constant 1.000000e+00 : f32
    %142 = vector.broadcast %cst_56 : f32 to vector<32x128xf32>
    %143 = arith.divf %142, %141 : vector<32x128xf32>
    %cst_57 = arith.constant 1.06140542 : f32
    %144 = vector.broadcast %cst_57 : f32 to vector<32x128xf32>
    %145 = arith.mulf %144, %143 : vector<32x128xf32>
    %cst_58 = arith.constant -1.45315206 : f32
    %146 = vector.broadcast %cst_58 : f32 to vector<32x128xf32>
    %147 = arith.addf %145, %146 : vector<32x128xf32>
    %148 = arith.mulf %147, %143 : vector<32x128xf32>
    %cst_59 = arith.constant 1.42141378 : f32
    %149 = vector.broadcast %cst_59 : f32 to vector<32x128xf32>
    %150 = arith.addf %148, %149 : vector<32x128xf32>
    %151 = arith.mulf %150, %143 : vector<32x128xf32>
    %cst_60 = arith.constant -0.284496725 : f32
    %152 = vector.broadcast %cst_60 : f32 to vector<32x128xf32>
    %153 = arith.addf %151, %152 : vector<32x128xf32>
    %154 = arith.mulf %153, %143 : vector<32x128xf32>
    %cst_61 = arith.constant 0.254829586 : f32
    %155 = vector.broadcast %cst_61 : f32 to vector<32x128xf32>
    %156 = arith.addf %154, %155 : vector<32x128xf32>
    %157 = arith.mulf %156, %143 : vector<32x128xf32>
    %cst_62 = arith.constant 0.000000e+00 : f32
    %158 = vector.broadcast %cst_62 : f32 to vector<32x128xf32>
    %159 = arith.subf %158, %137 : vector<32x128xf32>
    %160 = arith.mulf %159, %137 : vector<32x128xf32>
    %161 = math.exp %160 : vector<32x128xf32>
    %162 = arith.mulf %157, %161 : vector<32x128xf32>
    %cst_63 = arith.constant 1.000000e+00 : f32
    %163 = vector.broadcast %cst_63 : f32 to vector<32x128xf32>
    %164 = arith.subf %163, %162 : vector<32x128xf32>
    %165 = arith.mulf %136, %164 : vector<32x128xf32>
    %cst_64 = arith.constant 1.000000e+00 : f32
    %166 = vector.broadcast %cst_64 : f32 to vector<32x128xf32>
    %167 = arith.addf %166, %165 : vector<32x128xf32>
    %168 = arith.mulf %129, %167 : vector<32x128xf32>
    %169 = arith.truncf %168 : vector<32x128xf32> to vector<32x128xbf16>
    %c0_65 = arith.constant 0 : index
    %c0_66 = arith.constant 0 : index
    %170 = vector.load %arg14[%c0_65, %c0_66] : memref<128x32xbf16, #tpu.memory_space<vmem>>, vector<128x32xbf16>
    %cst_67 = arith.constant dense<0.000000e+00> : vector<32x32xf32>
    %171 = tpu.matmul %169, %170, %cst_67 {dimension_numbers = #tpu.dot_dimension_numbers<[1], [0], [0], [1], [0, 0, 1, 1], [], []>} : vector<32x128xbf16>, vector<128x32xbf16>, vector<32x32xf32> -> vector<32x32xf32>
    %c0_68 = arith.constant 0 : index
    %c0_69 = arith.constant 0 : index
    %172 = vector.load %arg15[%c0_68, %c0_69] : memref<1x32xf32, #tpu.memory_space<vmem>>, vector<1x32xf32>
    %173 = vector.broadcast %172 : vector<1x32xf32> to vector<32x32xf32>
    %174 = arith.addf %171, %173 : vector<32x32xf32>
    %175 = arith.addf %97, %174 : vector<32x32xf32>
    %c0_70 = arith.constant 0 : index
    %c0_71 = arith.constant 0 : index
    %176 = vector.load %arg16[%c0_70, %c0_71] : memref<32x32xf32, #tpu.memory_space<vmem>>, vector<32x32xf32>
    tpu.vector_store %arg16[%c0_70, %c0_71], %175 {strides = array<i32>} : memref<32x32xf32, #tpu.memory_space<vmem>>, vector<32x32xf32>,
    return
  }
  func.func @transform_0(%arg0: i32) -> (i32, i32) {
    %c0_i32 = arith.constant 0 : i32
    %c0_i32_0 = arith.constant 0 : i32
    return %arg0, %c0_i32 : i32, i32
  }
  func.func @transform_1(%arg0: i32) -> (i32, i32) {
    %c0_i32 = arith.constant 0 : i32
    %c0_i32_0 = arith.constant 0 : i32
    %c0_i32_1 = arith.constant 0 : i32
    return %c0_i32, %c0_i32_0 : i32, i32
  }
  func.func @transform_2(%arg0: i32) -> (i32, i32) {
    %c0_i32 = arith.constant 0 : i32
    %c0_i32_0 = arith.constant 0 : i32
    %c0_i32_1 = arith.constant 0 : i32
    return %c0_i32, %c0_i32_0 : i32, i32
  }
  func.func @transform_3(%arg0: i32) -> (i32, i32) {
    %c0_i32 = arith.constant 0 : i32
    %c0_i32_0 = arith.constant 0 : i32
    %c0_i32_1 = arith.constant 0 : i32
    return %c0_i32, %c0_i32_0 : i32, i32
  }
  func.func @transform_4(%arg0: i32) -> (i32, i32) {
    %c0_i32 = arith.constant 0 : i32
    %c0_i32_0 = arith.constant 0 : i32
    %c0_i32_1 = arith.constant 0 : i32
    return %c0_i32, %c0_i32_0 : i32, i32
  }
  func.func @transform_5(%arg0: i32) -> (i32, i32, i32) {
    %c0_i32 = arith.constant 0 : i32
    %c0_i32_0 = arith.constant 0 : i32
    %c0_i32_1 = arith.constant 0 : i32
    %c0_i32_2 = arith.constant 0 : i32
    return %c0_i32, %c0_i32_0, %c0_i32_1 : i32, i32, i32
  }
  func.func @transform_6(%arg0: i32) -> (i32, i32, i32) {
    %c2_i32 = arith.constant 2 : i32
    %c0_i32 = arith.constant 0 : i32
    %0 = arith.cmpi eq, %c2_i32, %c0_i32 : i32
    %c1_i32 = arith.constant 1 : i32
    %1 = arith.select %0, %c1_i32, %c2_i32 : i32
    %2 = arith.remsi %arg0, %1 : i32
    %c0_i32_0 = arith.constant 0 : i32
    %3 = arith.cmpi ne, %2, %c0_i32_0 : i32
    %c0_i32_1 = arith.constant 0 : i32
    %4 = arith.cmpi slt, %2, %c0_i32_1 : i32
    %c0_i32_2 = arith.constant 0 : i32
    %5 = arith.cmpi slt, %1, %c0_i32_2 : i32
    %6 = arith.xori %4, %5 : i1
    %7 = arith.andi %6, %3 : i1
    %8 = arith.addi %2, %1 : i32
    %9 = arith.select %7, %8, %2 : i32
    %c0_i32_3 = arith.constant 0 : i32
    %c0_i32_4 = arith.constant 0 : i32
    %c0_i32_5 = arith.constant 0 : i32
    return %9, %c0_i32_3, %c0_i32_4 : i32, i32, i32
  }
  func.func @transform_7(%arg0: i32) -> (i32, i32) {
    %c0_i32 = arith.constant 0 : i32
    %c0_i32_0 = arith.constant 0 : i32
    %c0_i32_1 = arith.constant 0 : i32
    return %c0_i32, %c0_i32_0 : i32, i32
  }
  func.func @transform_8(%arg0: i32) -> (i32, i32) {
    %c0_i32 = arith.constant 0 : i32
    %c0_i32_0 = arith.constant 0 : i32
    %c0_i32_1 = arith.constant 0 : i32
    return %c0_i32, %c0_i32_0 : i32, i32
  }
  func.func @transform_9(%arg0: i32) -> (i32, i32) {
    %c0_i32 = arith.constant 0 : i32
    %c0_i32_0 = arith.constant 0 : i32
    %c0_i32_1 = arith.constant 0 : i32
    return %c0_i32, %c0_i32_0 : i32, i32
  }
  func.func @transform_10(%arg0: i32) -> (i32, i32) {
    %c0_i32 = arith.constant 0 : i32
    %c0_i32_0 = arith.constant 0 : i32
    %c0_i32_1 = arith.constant 0 : i32
    return %c0_i32, %c0_i32_0 : i32, i32
  }
  func.func @transform_11(%arg0: i32) -> (i32, i32) {
    %c0_i32 = arith.constant 0 : i32
    %c0_i32_0 = arith.constant 0 : i32
    %c0_i32_1 = arith.constant 0 : i32
    return %c0_i32, %c0_i32_0 : i32, i32
  }
  func.func @transform_12(%arg0: i32) -> (i32, i32) {
    %c0_i32 = arith.constant 0 : i32
    %c0_i32_0 = arith.constant 0 : i32
    %c0_i32_1 = arith.constant 0 : i32
    return %c0_i32, %c0_i32_0 : i32, i32
  }
  func.func @transform_13(%arg0: i32) -> (i32, i32) {
    %c0_i32 = arith.constant 0 : i32
    %c0_i32_0 = arith.constant 0 : i32
    %c0_i32_1 = arith.constant 0 : i32
    return %c0_i32, %c0_i32_0 : i32, i32
  }
  func.func @transform_14(%arg0: i32) -> (i32, i32) {
    %c0_i32 = arith.constant 0 : i32
    %c0_i32_0 = arith.constant 0 : i32
    %c0_i32_1 = arith.constant 0 : i32
    return %c0_i32, %c0_i32_0 : i32, i32
  }
  func.func @transform_15(%arg0: i32) -> (i32, i32) {
    %c0_i32 = arith.constant 0 : i32
    %c0_i32_0 = arith.constant 0 : i32
    return %arg0, %c0_i32 : i32, i32
  }
}

</mosaic_0001>

<bundles_post_ra>
// kernel: basic_layer_forward.2
= control target key start
LH: loop header
LB: loop body
LE: loop exit
PB: predicated region body
PF: predicated region fallthrough
CT: control target
= control target key end

     0   :  { %s1770_s29 = smov 0   ;;  %s2092_s0 = inlined_call_operand.vmem [shape: f32[128,32], index: 0, kind: input, shape index: {}]   ;;  %s2093_s1 = inlined_call_operand.vmem [shape: f32[1,32], index: 1, kind: input, shape index: {}]   ;;  %s2094_s2 = inlined_call_operand.vmem [shape: f32[1,32], index: 2, kind: input, shape index: {}]   ;;  %s2095_s3 = inlined_call_operand.vmem [shape: bf16[32,96], index: 3, kind: input, shape index: {}]   ;;  %s2096_s4 = inlined_call_operand.vmem [shape: f32[1,96], index: 4, kind: input, shape index: {}]   ;;  %s2097_s5 = inlined_call_operand.vmem [shape: f32[2,16,16], index: 5, kind: input, shape index: {}]   ;;  %s2098_s6 = inlined_call_operand.vmem [shape: bf16[32,32], index: 6, kind: input, shape index: {}]   ;;  %s2099_s7 = inlined_call_operand.vmem [shape: f32[1,32], index: 7, kind: input, shape index: {}]   ;;  %s2100_s8 = inlined_call_operand.vmem [shape: f32[1,32], index: 8, kind: input, shape index: {}]   ;;  %s2101_s9 = inlined_call_operand.vmem [shape: f32[1,32], index: 9, kind: input, shape index: {}]   ;;  %s2102_s10 = inlined_call_operand.vmem [shape: bf16[32,128], index: 10, kind: input, shape index: {}]   ;;  %s2103_s11 = inlined_call_operand.vmem [shape: f32[1,128], index: 11, kind: input, shape index: {}]   ;;  %s2104_s12 = inlined_call_operand.vmem [shape: bf16[128,32], index: 12, kind: input, shape index: {}]   ;;  %s2105_s13 = inlined_call_operand.vmem [shape: f32[1,32], index: 13, kind: input, shape index: {}]   ;;  %s2106_s14 = inlined_call_operand.vmem [shape: f32[128,32], index: 14, kind: output, shape index: {}]  }
   0x1 LB: > { %s1482_s30 = sadd.s32 4294967295, %s1685_s29   ;;  %p1486_p0 = scmp.ge.s32.totalorder %s1685_s29, 1  ;;  %s1685_s29 = sphi %s1770_s29, %s24_s29  }
   0x2   : > { %p413_p1 = scmp.lt.s32.totalorder %s1685_s29, 5 }
   0x4   : > { %p414_p2 = pnand %p1486_p0, %p413_p1 }
   0x5   : > { %s1487_s15 = sshll.u32 (!%p414_p2), %s1482_s30, 2  ;;  %s1688_s17 = smov (!%p414_p2), 80  }
   0x6   : > { %417 = sbr.rel (%p414_p2) target bundleno = 1999 (0x7cf), region = 76  ;;  %p460_p3 = scmp.lt.s32.totalorder (!%p414_p2), %s1487_s15, 15 }
   0x7   : > { %s1689_s18 = smov (!%p414_p2), 96   ;;  %s1691_s28 = smov (!%p414_p2), 64  }
   0x8   : > { %s1692_s30 = smov (!%p414_p2), 48  }
   0xb   : > { %s2108_s15 = smov (!%p460_p3, %s1487_s15), 15  ;;  %vm476_vm0 = vcmask 261120   ;;  %v1687_v8 = vmov 32.0   ;;  %v1566_v35 = vld [vmem:[%s2095_s3 + $0x8] sm:$0xff]  ;;  %v1565_v39 = vld [vmem:[%s2095_s3] sm:$0xff]  ;;  %vm648_vm14 = vcmask 130048  }
   0xc   : > { %s1488_s16 = sshll.u32 %s2108_s15, 3  ;;  %1613 = vrcp.f32 %v1687_v8  ;;  %622 = vmatpush.bf16.msra.mxu0 %v1566_v35 }
   0xd   : > { %s463_s19 = scalar_lea.vmem %s2092_s0, %s1488_s16 }
   0xe   : > { %v1786_v0 = vld [vmem:[%s463_s19 + $0x10] sm:$0xff]  ;;  %v1788_v1 = vld [vmem:[%s463_s19] sm:$0xff]  ;;  %v1794_v4 = vld [vmem:[%s463_s19 + $0x18] sm:$0xff] }
   0xf   : > { %v483_v2 = vsel %vm476_vm0, %v1786_v0, 0.0  ;;  %v477_v3 = vsel %vm476_vm0, %v1788_v1, 0.0  ;;  %v1796_v5 = vld [vmem:[%s463_s19 + $0x8] sm:$0xff]  ;;  %v486_v6 = vsel %vm476_vm0, %v1794_v4, 0.0  ;;  %s1690_s19 = smov 112  }
  0x10   : > { %484 = vadd.xlane.f32.xlu1 %v483_v2  ;;  %478 = vadd.xlane.f32.xlu0 %v477_v3  ;;  %v480_v7 = vsel %vm476_vm0, %v1796_v5, 0.0 }
  0x11   : > { %623 = vmatpush.bf16.msra.mxu0 %v1565_v39 }
  0x12   : > { %v1614_v9 = vpop.eup %1613 }
  0x13   : > { %v490_v10 = vmul.f32 32.0, %v1614_v9  ;;  %vm494_vm1 = vweird.f32 %v1614_v9 }
  0x15   : > { %v491_v11 = vsub.f32 1.0, %v490_v10 }
  0x17   : > { %v492_v12 = vmul.f32 %v1614_v9, %v491_v11 }
  0x18   : > { %487 = vadd.xlane.f32.xlu1 %v486_v6  ;;  %481 = vadd.xlane.f32.xlu0 %v480_v7 }
  0x19   : > { %v493_v13 = vadd.f32 %v1614_v9, %v492_v12 }
  0x1b   : > { %v1802_v14 = vsel %vm494_vm1, %v1614_v9, %v493_v13  ;;  %v1605_v9 = vld [vmem:[%s2093_s1] ss:$0 sm:$0xff] }
  0x83   : > { %v485_v15 = vpop.xlane.xlu1 %484  ;;  %v479_v16 = vpop.xlane.xlu0 %478 }
  0x84   : > { %v498_v17 = vmul.f32 %v1802_v14, %v485_v15  ;;  %v496_v18 = vmul.f32 %v1802_v14, %v479_v16 }
  0x86   : > { %v1807_v19 = vsub.f32 %v1786_v0, %v498_v17  ;;  %v500_v20 = vsub.f32 %v1788_v1, %v496_v18  ;;  %v1606_v17 = vld [vmem:[%s2094_s2] ss:$0 sm:$0xff] }
  0x88   : > { %v506_v21 = vmul.f32 %v1807_v19, %v1807_v19  ;;  %v504_v22 = vmul.f32 %v500_v20, %v500_v20 }
  0x8a   : > { %v514_v23 = vsel %vm476_vm0, %v506_v21, 0.0  ;;  %v508_v24 = vsel %vm476_vm0, %v504_v22, 0.0 }
  0x8b   : > { %v488_v25 = vpop.xlane.xlu1 %487  ;;  %515 = vadd.xlane.f32.xlu0 %v514_v23  ;;  %509 = vadd.xlane.f32.xlu2 %v508_v24  ;;  %v482_v26 = vpop.xlane.xlu0 %481 }
  0x8c   : > { %v499_v27 = vmul.f32 %v1802_v14, %v488_v25  ;;  %v497_v28 = vmul.f32 %v1802_v14, %v482_v26 }
  0x8e   : > { %v1817_v29 = vsub.f32 %v1794_v4, %v499_v27  ;;  %v501_v30 = vsub.f32 %v1796_v5, %v497_v28 }
  0x90   : > { %v507_v31 = vmul.f32 %v1817_v29, %v1817_v29  ;;  %v505_v32 = vmul.f32 %v501_v30, %v501_v30 }
  0x92   : > { %v517_v33 = vsel %vm476_vm0, %v507_v31, 0.0  ;;  %v511_v34 = vsel %vm476_vm0, %v505_v32, 0.0 }
  0x93   : > { %518 = vadd.xlane.f32.xlu1 %v517_v33  ;;  %512 = vadd.xlane.f32.xlu2 %v511_v34 }
  0xfe   : > { %v510_v36 = vpop.xlane.xlu2 %509  ;;  %v516_v38 = vpop.xlane.xlu0 %515 }
  0xff   : > { %v520_v37 = vmul.f32 %v510_v36, %v1802_v14  ;;  %v522_v41 = vmul.f32 %v516_v38, %v1802_v14 }
 0x101   : > { %v524_v40 = vadd.f32 1e-05, %v520_v37  ;;  %v526_v42 = vadd.f32 1e-05, %v522_v41  ;;  %v1607_v37 = vld [vmem:[%s2096_s4] ss:$0 sm:$0xff] }
 0x103   : > { %1615 = vrsqrt.f32 %v524_v40  ;;  %vm534_vm3 = vweird.f32 %v524_v40  ;;  %vm554_vm10 = vweird.f32 %v526_v42 }
 0x104   : > { %1617 = vrsqrt.f32 %v526_v42 }
 0x106   : > { %v519_v43 = vpop.xlane.xlu1 %518  ;;  %v513_v44 = vpop.xlane.xlu2 %512 }
 0x107   : > { %v523_v45 = vmul.f32 %v519_v43, %v1802_v14  ;;  %v521_v46 = vmul.f32 %v513_v44, %v1802_v14 }
 0x109   : > { %v1616_v47 = vpop.eup %1615  ;;  %v527_v48 = vadd.f32 1e-05, %v523_v45  ;;  %v525_v49 = vadd.f32 1e-05, %v521_v46 }
 0x10a   : > { %v529_v50 = vmul.f32 %v1616_v47, %v524_v40  ;;  %v1618_v53 = vpop.eup %1617  ;;  %vm535_vm2 = vweird.f32 %v1616_v47 }
 0x10b   : > { %1619 = vrsqrt.f32 %v527_v48  ;;  %v549_v59 = vmul.f32 %v1618_v53, %v526_v42  ;;  %vm536_vm4 = vmor %vm534_vm3, %vm535_vm2  ;;  %vm544_vm6 = vweird.f32 %v525_v49  ;;  %vm564_vm8 = vweird.f32 %v527_v48 }
 0x10c   : > { %v530_v51 = vmul.f32 %v1616_v47, %v529_v50  ;;  %1621 = vrsqrt.f32 %v525_v49  ;;  %vm555_vm11 = vweird.f32 %v1618_v53 }
 0x10d   : > { %v550_v2 = vmul.f32 %v1618_v53, %v549_v59  ;;  %vm556_vm13 = vmor %vm554_vm10, %vm555_vm11 }
 0x10e   : > { %v531_v52 = vmul.f32 0.5, %v530_v51 }
 0x10f   : > { %v551_v10 = vmul.f32 0.5, %v550_v2 }
 0x110   : > { %v532_v54 = vsub.f32 1.5, %v531_v52 }
 0x111   : > { %v1620_v55 = vpop.eup %1619  ;;  %v552_v18 = vsub.f32 1.5, %v551_v10  ;;  %v640_v10 = vld [vmem:[%s2097_s5 + $0x8] sm:$0xff] }
 0x112   : > { %v1622_v56 = vpop.eup %1621  ;;  %v559_v57 = vmul.f32 %v1620_v55, %v527_v48  ;;  %v533_v58 = vmul.f32 %v1616_v47, %v532_v54  ;;  %vm565_vm9 = vweird.f32 %v1620_v55 }
 0x113   : > { %v539_v60 = vmul.f32 %v1622_v56, %v525_v49  ;;  %vm545_vm5 = vweird.f32 %v1622_v56  ;;  %vm566_vm12 = vmor %vm564_vm8, %vm565_vm9  ;;  %v553_v24 = vmul.f32 %v1618_v53, %v552_v18 }
 0x114   : > { %v560_v61 = vmul.f32 %v1620_v55, %v559_v57  ;;  %v537_v63 = vsel %vm536_vm4, %v1616_v47, %v533_v58  ;;  %vm546_vm7 = vmor %vm544_vm6, %vm545_vm5 }
 0x115   : > { %v540_v62 = vmul.f32 %v1622_v56, %v539_v60  ;;  %v568_v8 = vmul.f32 %v537_v63, %v500_v20  ;;  %v557_v27 = vsel %vm556_vm13, %v1618_v53, %v553_v24  ;;  %v639_v63 = vld [vmem:[%s2097_s5] sm:$0xff] }
 0x116   : > { %v561_v6 = vmul.f32 0.5, %v560_v61 }
 0x117   : > { %v541_v3 = vmul.f32 0.5, %v540_v62  ;;  %v576_v16 = vmul.f32 %v1605_v9, %v568_v8 }
 0x118   : > { %v562_v12 = vsub.f32 1.5, %v561_v6 }
 0x119   : > { %v542_v7 = vsub.f32 1.5, %v541_v3  ;;  %v584_v22 = vadd.f32 %v1606_v17, %v576_v16  ;;  %v1505_v16 = vld [vmem:[%s2097_s5 + $0x10] sm:$0xff] }
 0x11a   : > { %v563_v21 = vmul.f32 %v1620_v55, %v562_v12 }
 0x11b   : > { %v543_v11 = vmul.f32 %v1622_v56, %v542_v7 }
 0x11c   : > { %v567_v26 = vsel %vm566_vm12, %v1620_v55, %v563_v21  ;;  %v1506_v21 = vld [vmem:[%s2097_s5 + $0x18] sm:$0xff] }
 0x11d   : > { %v547_v13 = vsel %vm546_vm7, %v1622_v56, %v543_v11  ;;  %v571_v28 = vmul.f32 %v567_v26, %v1817_v29 }
 0x11e   : > { %v569_v15 = vmul.f32 %v547_v13, %v501_v30  ;;  %v570_v30 = vmul.f32 %v557_v27, %v1807_v19 }
 0x11f   : > { %v579_v31 = vmul.f32 %v1605_v9, %v571_v28 }
 0x120   : > { %v577_v20 = vmul.f32 %v1605_v9, %v569_v15  ;;  %v578_v32 = vmul.f32 %v1605_v9, %v570_v30 }
 0x121   : > { %v587_v33 = vadd.f32 %v1606_v17, %v579_v31 }
 0x122   : > { %v585_v23 = vadd.f32 %v1606_v17, %v577_v20  ;;  %v586_v34 = vadd.f32 %v1606_v17, %v578_v32 }
 0x124   : > { %v588_v25 = vpack.c.bf16 %v585_v23, %v584_v22  ;;  %v589_v35 = vpack.c.bf16 %v587_v33, %v586_v34 }
 0x126   : > { %1499 = vmatmul.msk.bf16.vlgmr.msra.gmra.mxu0 %vm476_vm0, %v588_v25 }
 0x136   : > { %1500 = vmatmul.msk.bf16.gmra.mxu0 %vm476_vm0, %v589_v35 }
 0x1a3   : > { %v625_v36 = vpop.f32.mrf.mxu0 }
 0x1a4   : > { %v626_v38 = vadd.f32 %v1607_v37, %v625_v36 }
 0x1a6   : > { %v635_v40 = vpack.c.bf16 %v626_v38, %v626_v38 }
 0x1a8   : > { %v643_v29 = vunpack.c.l.b16 %v635_v40 }
 0x1ab   : > { %v627_v39 = vpop.f32.mrf.mxu0 }
 0x1ac   : > { %v628_v41 = vadd.f32 %v1607_v37, %v627_v39 }
 0x1ae   : > { %v636_v42 = vpack.c.bf16 %v628_v41, %v628_v41 }
 0x1b0   : > { %v644_v43 = vunpack.c.l.b16 %v636_v42 }
 0x1b2   : > { %v1847_v19 = vpack.c.b16 %v644_v43, %v643_v29 }
 0x1b3   : > { %v630_v44 = vpop.f32.mrf.mxu0 }
 0x1b4   : > { %799 = vrot.lane.b32.xlu1 %v1847_v19, %s1688_s17  ;;  %646 = vrot.lane.b32.xlu0 %v1847_v19, %s1689_s18  ;;  %v631_v45 = vadd.f32 %v1607_v37, %v630_v44 }
 0x1b6   : > { %v637_v47 = vpack.c.bf16 %v631_v45, %v631_v45 }
 0x1b8   : > { %v671_v50 = vunpack.c.l.b16 %v637_v47 }
 0x1bb   : > { %v632_v46 = vpop.f32.mrf.mxu0 }
 0x1bc   : > { %v633_v48 = vadd.f32 %v1607_v37, %v632_v46 }
 0x1be   : > { %v638_v49 = vpack.c.bf16 %v633_v48, %v633_v48 }
 0x1c0   : > { %v672_v51 = vunpack.c.l.b16 %v638_v49 }
 0x1c2   : > { %v1851_v52 = vpack.c.b16 %v672_v51, %v671_v50 }
 0x1c4   : > { %823 = vrot.lane.b32.xlu0 %v1851_v52, %s1688_s17  ;;  %674 = vrot.lane.b32.xlu2 %v1851_v52, %s1689_s18 }
 0x1cc   : > { %797 = vrot.lane.b32.xlu2 %v1847_v19, %s1690_s19 }
 0x1d4   : > { %821 = vrot.lane.b32.xlu2 %v1851_v52, %s1690_s19  ;;  %s1693_s19 = smov 16  }
 0x21e   : > { %v675_v53 = vpop.permute.xlu2 %674 }
 0x21f   : > { %v680_v54 = vsel %vm648_vm14, %v675_v53, 0 }
 0x220   : > { %689 = vmatpush.bf16.xpose.msra.mxu2 %v680_v54 }
 0x226   : > { %v800_v55 = vpop.permute.xlu1 %799  ;;  %v647_v56 = vpop.permute.xlu0 %646 }
 0x227   : > { %1502 = vmatmul.msk.bf16.vlgmr.msra.gmra.mxu2 %vm648_vm14, %v1851_v52  ;;  %v805_v57 = vsel %vm648_vm14, %v800_v55, 0  ;;  %v653_v58 = vsel %vm648_vm14, %v647_v56, 0  ;;  %v798_v59 = vpop.permute.xlu2 %797 }
 0x228   : > { %662 = vmatpush.bf16.xpose.msra.mxu1 %v653_v58 }
 0x22f   : > { %1501 = vmatmul.msk.bf16.vlgmr.msra.gmra.mxu1 %vm648_vm14, %v1847_v19  ;;  %v822_v62 = vpop.permute.xlu2 %821 }
 0x230   : > { %814 = vmatpush.bf16.xpose.msrb.mxu1 %v805_v57 }
 0x236   : > { %v824_v60 = vpop.permute.xlu0 %823 }
 0x237   : > { %v829_v61 = vsel %vm648_vm14, %v824_v60, 0 }
 0x238   : > { %838 = vmatpush.bf16.xpose.msrb.mxu2 %v829_v61 }
 0x23f   : > { %1508 = vmatmul.msk.bf16.vlgmr.msrb.gmra.mxu2 %vm648_vm14, %v822_v62  ;;  %1507 = vmatmul.msk.bf16.vlgmr.msrb.gmra.mxu1 %vm648_vm14, %v798_v59 }
 0x2aa   : > { %v691_v2 = vpop.f32.mrf.mxu2 }
 0x2ab   : > { %v692_v3 = vadd.f32 %v691_v2, %v639_v63 }
 0x2ac   : > { %v664_v6 = vpop.f32.mrf.mxu1 }
 0x2ad   : > { %v702_v7 = vsel %vm648_vm14, %v692_v3, -inf  ;;  %v665_v8 = vadd.f32 %v664_v6, %v639_v63 }
 0x2ae   : > { %703 = vmax.xlane.f32.xlu1 %v702_v7 }
 0x2af   : > { %v696_v9 = vsel %vm648_vm14, %v665_v8, -inf }
 0x2b0   : > { %697 = vmax.xlane.f32.xlu0 %v696_v9 }
 0x2b2   : > { %v693_v11 = vpop.f32.mrf.mxu2 }
 0x2b3   : > { %v694_v12 = vadd.f32 %v693_v11, %v640_v10 }
 0x2b4   : > { %v666_v13 = vpop.f32.mrf.mxu1 }
 0x2b5   : > { %v705_v15 = vsel %vm648_vm14, %v694_v12, -inf  ;;  %v667_v22 = vadd.f32 %v666_v13, %v640_v10 }
 0x2b7   : > { %v699_v26 = vsel %vm648_vm14, %v667_v22, -inf }
 0x2b8   : > { %706 = vmax.xlane.f32.xlu0 %v705_v15 }
 0x2bc   : > { %v816_v17 = vpop.f32.mrf.mxu1 }
 0x2bd   : > { %v817_v18 = vadd.f32 %v1505_v16, %v816_v17 }
 0x2bf   : > { %v845_v20 = vsel %vm648_vm14, %v817_v18, -inf }
 0x2c0   : > { %846 = vmax.xlane.f32.xlu2 %v845_v20 }
 0x2c2   : > { %v840_v27 = vpop.f32.mrf.mxu2 }
 0x2c3   : > { %v841_v28 = vadd.f32 %v1505_v16, %v840_v27 }
 0x2c4   : > { %v818_v23 = vpop.f32.mrf.mxu1 }
 0x2c5   : > { %v819_v24 = vadd.f32 %v1506_v21, %v818_v23  ;;  %v851_v30 = vsel %vm648_vm14, %v841_v28, -inf }
 0x2c7   : > { %v848_v25 = vsel %vm648_vm14, %v819_v24, -inf }
 0x2c8   : > { %849 = vmax.xlane.f32.xlu1 %v848_v25  ;;  %700 = vmax.xlane.f32.xlu2 %v699_v26 }
 0x2ca   : > { %v842_v31 = vpop.f32.mrf.mxu2 }
 0x2cb   : > { %v843_v32 = vadd.f32 %v1506_v21, %v842_v31 }
 0x2cc   : > { %774 = vrot.lane.b32.xlu0 %v1851_v52, %s1691_s28 }
 0x2cd   : > { %v854_v33 = vsel %vm648_vm14, %v843_v32, -inf }
 0x2d0   : > { %852 = vmax.xlane.f32.xlu1 %v851_v30 }
 0x2f6   : > { %855 = vmax.xlane.f32.xlu0 %v854_v33 }
 0x30a   : > { %749 = vrot.lane.b32.xlu0 %v1847_v19, %s1691_s28  ;;  %s469_s28 = scalar_lea.vmem %s2106_s14, %s1488_s16 }
 0x321   : > { %v704_v39 = vpop.xlane.xlu1 %703 }
 0x322   : > { %v710_v42 = vsub.f32 %v692_v3, %v704_v39 }
 0x323   : > { %v698_v34 = vpop.xlane.xlu0 %697 }
 0x324   : > { %v708_v35 = vsub.f32 %v665_v8, %v698_v34  ;;  %v716_v44 = vmul.f32 1.442695, %v710_v42 }
 0x326   : > { %v712_v36 = vmul.f32 1.442695, %v708_v35 }
 0x328   : > { %1623 = vpow2.f32 %v712_v36 }
 0x32b   : > { %v707_v29 = vpop.xlane.xlu0 %706 }
 0x32c   : > { %v711_v48 = vsub.f32 %v694_v12, %v707_v29 }
 0x32e   : > { %v1889_v37 = vpop.eup %1623  ;;  %v718_v53 = vmul.f32 1.442695, %v711_v48 }
 0x32f   : > { %v720_v38 = vsel %vm648_vm14, %v1889_v37, 0.0 }
 0x330   : > { %721 = vadd.xlane.f32.xlu2 %v720_v38 }
 0x333   : > { %v847_v40 = vpop.xlane.xlu2 %846 }
 0x334   : > { %v857_v41 = vsub.f32 %v817_v18, %v847_v40 }
 0x336   : > { %v861_v43 = vmul.f32 1.442695, %v857_v41 }
 0x338   : > { %1625 = vpow2.f32 %v861_v43 }
 0x339   : > { %1627 = vpow2.f32 %v716_v44 }
 0x33b   : > { %v850_v45 = vpop.xlane.xlu1 %849  ;;  %v701_v54 = vpop.xlane.xlu2 %700 }
 0x33c   : > { %v858_v46 = vsub.f32 %v819_v24, %v850_v45  ;;  %v709_v57 = vsub.f32 %v667_v22, %v701_v54 }
 0x33e   : > { %v1893_v47 = vpop.eup %1625  ;;  %v863_v49 = vmul.f32 1.442695, %v858_v46  ;;  %v775_v50 = vpop.permute.xlu0 %774  ;;  %v714_v60 = vmul.f32 1.442695, %v709_v57 }
 0x33f   : > { %787 = vmatpush.bf16.msra.mxu3 %v775_v50  ;;  %v869_v51 = vsel %vm648_vm14, %v1893_v47, 0.0  ;;  %v1628_v55 = vpop.eup %1627 }
 0x340   : > { %1629 = vpow2.f32 %v863_v49  ;;  %870 = vadd.xlane.f32.xlu2 %v869_v51  ;;  %v726_v59 = vsel %vm648_vm14, %v1628_v55, 0.0 }
 0x341   : > { %1631 = vpow2.f32 %v718_v53 }
 0x342   : > { %1633 = vpow2.f32 %v714_v60 }
 0x343   : > { %v853_v61 = vpop.xlane.xlu1 %852 }
 0x344   : > { %v859_v63 = vsub.f32 %v841_v28, %v853_v61 }
 0x346   : > { %v1897_v56 = vpop.eup %1629  ;;  %v865_v3 = vmul.f32 1.442695, %v859_v63 }
 0x347   : > { %v872_v58 = vsel %vm648_vm14, %v1897_v56, 0.0  ;;  %v1632_v62 = vpop.eup %1631 }
 0x348   : > { %873 = vadd.xlane.f32.xlu1 %v872_v58  ;;  %727 = vadd.xlane.f32.xlu2 %v726_v59  ;;  %v729_v2 = vsel %vm648_vm14, %v1632_v62, 0.0  ;;  %v1634_v6 = vpop.eup %1633  ;;  %1635 = vpow2.f32 %v865_v3  ;;  %v1568_v3 = vld [vmem:[%s2098_s6 + $0x8] sm:$0xff] }
 0x349   : > { %v723_v7 = vsel %vm648_vm14, %v1634_v6, 0.0  ;;  %993 = vmatpush.bf16.msra.mxu1 %v1568_v3  ;;  %v1569_v3 = vld [vmem:[%s2102_s10] sm:$0xff] }
 0x34e   : > { %v1904_v8 = vpop.eup %1635 }
 0x34f   : > { %v875_v9 = vsel %vm648_vm14, %v1904_v8, 0.0 }
 0x350   : > { %730 = vadd.xlane.f32.xlu1 %v729_v2 }
 0x358   : > { %724 = vadd.xlane.f32.xlu1 %v723_v7 }
 0x360   : > { %898 = vrot.lane.b32.xlu2 %v1847_v19, %s1692_s30  ;;  %876 = vadd.xlane.f32.xlu1 %v875_v9 }
 0x369   : > { %v856_v10 = vpop.xlane.xlu0 %855 }
 0x36a   : > { %v860_v11 = vsub.f32 %v843_v32, %v856_v10 }
 0x36c   : > { %v867_v12 = vmul.f32 1.442695, %v860_v11 }
 0x36e   : > { %1637 = vpow2.f32 %v867_v12 }
 0x374   : > { %v1638_v13 = vpop.eup %1637 }
 0x375   : > { %v878_v15 = vsel %vm648_vm14, %v1638_v13, 0.0 }
 0x376   : > { %879 = vadd.xlane.f32.xlu0 %v878_v15  ;;  %v1567_v15 = vld [vmem:[%s2098_s6] sm:$0xff] }
 0x377   : > { %994 = vmatpush.bf16.msra.mxu1 %v1567_v15 }
 0x379   : > { %923 = vrot.lane.b32.xlu1 %v1851_v52, %s1692_s30 }
 0x37c   : > { %v750_v16 = vpop.permute.xlu0 %749 }
 0x37d   : > { %762 = vmatpush.bf16.msrb.mxu0 %v750_v16 }
 0x3a3   : > { %v722_v17 = vpop.xlane.xlu2 %721 }
 0x3b3   : > { %v871_v18 = vpop.xlane.xlu2 %870 }
 0x3bb   : > { %v874_v20 = vpop.xlane.xlu1 %873  ;;  %v728_v21 = vpop.xlane.xlu2 %727 }
 0x3bc   : > { %1639 = vrcp.f32 %v728_v21 }
 0x3c2   : > { %v1640_v23 = vpop.eup %1639 }
 0x3c3   : > { %v899_v22 = vpop.permute.xlu2 %898  ;;  %v731_v19 = vpop.xlane.xlu1 %730  ;;  %v738_v24 = vmul.f32 %v1640_v23, %v1628_v55 }
 0x3c4   : > { %1641 = vrcp.f32 %v731_v19  ;;  %911 = vmatpush.bf16.msrb.mxu3 %v899_v22 }
 0x3c5   : > { %1643 = vrcp.f32 %v722_v17  ;;  %v742_v28 = vpack.c.bf16 %v738_v24, %v738_v24 }
 0x3c6   : > { %1645 = vrcp.f32 %v874_v20 }
 0x3c7   : > { %v771_v32 = vunpack.c.l.b16 %v742_v28  ;;  %v1608_v28 = vld [vmem:[%s2099_s7] ss:$0 sm:$0xff] }
 0x3ca   : > { %v1642_v25 = vpop.eup %1641 }
 0x3cb   : > { %v725_v26 = vpop.xlane.xlu1 %724  ;;  %v739_v27 = vmul.f32 %v1642_v25, %v1632_v62  ;;  %v1644_v52 = vpop.eup %1643 }
 0x3cc   : > { %1647 = vrcp.f32 %v725_v26  ;;  %v736_v31 = vmul.f32 %v1644_v52, %v1889_v37  ;;  %v1646_v34 = vpop.eup %1645 }
 0x3cd   : > { %v743_v30 = vpack.c.bf16 %v739_v27, %v739_v27  ;;  %1649 = vrcp.f32 %v871_v18  ;;  %v886_v41 = vmul.f32 %v1646_v34, %v1897_v56 }
 0x3ce   : > { %v740_v38 = vpack.c.bf16 %v736_v31, %v736_v31 }
 0x3cf   : > { %v772_v33 = vunpack.c.l.b16 %v743_v30  ;;  %v890_v45 = vpack.c.bf16 %v886_v41, %v886_v41 }
 0x3d0   : > { %v746_v29 = vunpack.c.l.b16 %v740_v38 }
 0x3d1   : > { %v773_v35 = vpack.c.b16 %v772_v33, %v771_v32  ;;  %v896_v48 = vunpack.c.l.b16 %v890_v45 }
 0x3d2   : > { %v1648_v36 = vpop.eup %1647 }
 0x3d3   : > { %v737_v39 = vmul.f32 %v1648_v36, %v1634_v6  ;;  %1504 = vmatmul.msk.bf16.vlgmr.msra.gmra.mxu3 %vm648_vm14, %v773_v35  ;;  %v1650_v40 = vpop.eup %1649  ;;  %v877_v50 = vpop.xlane.xlu1 %876 }
 0x3d4   : > { %v885_v43 = vmul.f32 %v1650_v40, %v1893_v47  ;;  %1651 = vrcp.f32 %v877_v50 }
 0x3d5   : > { %v741_v42 = vpack.c.bf16 %v737_v39, %v737_v39 }
 0x3d6   : > { %v889_v37 = vpack.c.bf16 %v885_v43, %v885_v43 }
 0x3d7   : > { %v747_v44 = vunpack.c.l.b16 %v741_v42 }
 0x3d8   : > { %v895_v49 = vunpack.c.l.b16 %v889_v37 }
 0x3d9   : > { %v748_v46 = vpack.c.b16 %v747_v44, %v746_v29 }
 0x3da   : > { %v897_v51 = vpack.c.b16 %v896_v48, %v895_v49  ;;  %v1652_v54 = vpop.eup %1651 }
 0x3db   : > { %1503 = vmatmul.msk.bf16.vlgmr.msrb.gmra.mxu0 %vm648_vm14, %v748_v46  ;;  %v887_v47 = vmul.f32 %v1652_v54, %v1904_v8 }
 0x3dd   : > { %v891_v57 = vpack.c.bf16 %v887_v47, %v887_v47 }
 0x3df   : > { %v920_v60 = vunpack.c.l.b16 %v891_v57 }
 0x3e3   : > { %1509 = vmatmul.msk.bf16.vlgmr.msrb.gmra.mxu3 %vm648_vm14, %v897_v51 }
 0x3e9   : > { %v880_v53 = vpop.xlane.xlu0 %879 }
 0x3ea   : > { %1653 = vrcp.f32 %v880_v53 }
 0x3eb   : > { %v924_v55 = vpop.permute.xlu1 %923 }
 0x3ec   : > { %936 = vmatpush.bf16.msra.mxu0 %v924_v55 }
 0x3f0   : > { %v1654_v56 = vpop.eup %1653 }
 0x3f1   : > { %v888_v58 = vmul.f32 %v1654_v56, %v1638_v13 }
 0x3f3   : > { %v892_v59 = vpack.c.bf16 %v888_v58, %v888_v58 }
 0x3f5   : > { %v921_v61 = vunpack.c.l.b16 %v892_v59 }
 0x3f7   : > { %v922_v62 = vpack.c.b16 %v921_v61, %v920_v60  ;;  %v1570_v61 = vld [vmem:[%s2102_s10 + $0x8] sm:$0xff] }
 0x3f8   : > { %1156 = vmatpush.bf16.msra.mxu2 %v1570_v61  ;;  %v1611_v61 = vld [vmem:[%s2103_s11] ss:$0 sm:$0xff] }
 0x3f9   : > { %1510 = vmatmul.msk.bf16.vlgmr.msra.gmra.mxu0 %vm648_vm14, %v922_v62 }
 0x3fc   : > { %1157 = vmatpush.bf16.msra.mxu2 %v1569_v3 }
 0x456   : > { %v789_v63 = vpop.f32.mrf.mxu3 }
 0x458   : > { %v764_v6 = vpop.f32.mrf.mxu0 }
 0x45e   : > { %v791_v2 = vpop.f32.mrf.mxu3 }
 0x460   : > { %v766_v9 = vpop.f32.mrf.mxu0 }
 0x466   : > { %v913_v7 = vpop.f32.mrf.mxu3 }
 0x46e   : > { %v915_v8 = vpop.f32.mrf.mxu3 }
 0x46f   : > { %v1595_v10 = vpack.i.bf16 %v915_v8, %v913_v7 }
 0x471   : > { %1596 = vrot.lane.b32.xlu2 %v1595_v10, %s1693_s19 }
 0x476   : > { %v938_v11 = vpop.f32.mrf.mxu0 }
 0x47e   : > { %v940_v12 = vpop.f32.mrf.mxu0 }
 0x47f   : > { %v1600_v13 = vpack.i.bf16 %v940_v12, %v938_v11 }
 0x481   : > { %1601 = vrot.lane.b32.xlu2 %v1600_v13, %s1693_s19 }
 0x4cb   : > { %v1597_v16 = vpop.permute.xlu2 %1596 }
 0x4cc   : > { %v1599_v17 = vunpack.i.h.bf16 %v1597_v16  ;;  %v1598_v18 = vunpack.i.l.bf16 %v1597_v16 }
 0x4ce   : > { %v959_v20 = vsel %vm648_vm14, %v764_v6, %v1598_v18  ;;  %v960_v21 = vsel %vm648_vm14, %v766_v9, %v1599_v17 }
 0x4cf   : > { %v963_v22 = vpack.c.bf16 %v960_v21, %v959_v20 }
 0x4d1   : > { %1519 = vmatmul.msk.bf16.vlgmr.msra.gmra.mxu1 %vm476_vm0, %v963_v22 }
 0x4db   : > { %v1602_v19 = vpop.permute.xlu2 %1601 }
 0x4dc   : > { %v1604_v23 = vunpack.i.h.bf16 %v1602_v19  ;;  %v1603_v24 = vunpack.i.l.bf16 %v1602_v19 }
 0x4de   : > { %v961_v25 = vsel %vm648_vm14, %v789_v63, %v1603_v24  ;;  %v962_v26 = vsel %vm648_vm14, %v791_v2, %v1604_v23 }
 0x4df   : > { %v964_v27 = vpack.c.bf16 %v962_v26, %v961_v25 }
 0x4e1   : > { %1520 = vmatmul.msk.bf16.gmra.mxu1 %vm476_vm0, %v964_v27 }
 0x54e   : > { %v996_v52 = vpop.f32.mrf.mxu1 }
 0x54f   : > { %v1006_v30 = vadd.f32 %v996_v52, %v1788_v1 }
 0x551   : > { %v1935_v31 = vadd.f32 %v1608_v28, %v1006_v30 }
 0x553   : > { %v1018_v32 = vsel %vm476_vm0, %v1935_v31, 0.0 }
 0x554   : > { %1019 = vadd.xlane.f32.xlu1 %v1018_v32 }
 0x556   : > { %v998_v33 = vpop.f32.mrf.mxu1 }
 0x557   : > { %v1007_v34 = vadd.f32 %v998_v33, %v1796_v5 }
 0x559   : > { %v1940_v35 = vadd.f32 %v1608_v28, %v1007_v34 }
 0x55b   : > { %v1021_v36 = vsel %vm476_vm0, %v1940_v35, 0.0 }
 0x55c   : > { %1022 = vadd.xlane.f32.xlu2 %v1021_v36 }
 0x55e   : > { %v1001_v38 = vpop.f32.mrf.mxu1 }
 0x55f   : > { %v1008_v39 = vadd.f32 %v1001_v38, %v1786_v0 }
 0x561   : > { %v1945_v40 = vadd.f32 %v1608_v28, %v1008_v39 }
 0x563   : > { %v1024_v1 = vsel %vm476_vm0, %v1945_v40, 0.0 }
 0x564   : > { %1025 = vadd.xlane.f32.xlu0 %v1024_v1 }
 0x566   : > { %v1003_v41 = vpop.f32.mrf.mxu1 }
 0x567   : > { %v1009_v42 = vadd.f32 %v1003_v41, %v1794_v4 }
 0x569   : > { %v1950_v29 = vadd.f32 %v1608_v28, %v1009_v42  ;;  %v1609_v28 = vld [vmem:[%s2100_s8] ss:$0 sm:$0xff] }
 0x56b   : > { %v1027_v5 = vsel %vm476_vm0, %v1950_v29, 0.0 }
 0x56c   : > { %1028 = vadd.xlane.f32.xlu0 %v1027_v5 }
 0x5c7   : > { %v1020_v43 = vpop.xlane.xlu1 %1019 }
 0x5c8   : > { %v1030_v44 = vmul.f32 %v1020_v43, %v1802_v14 }
 0x5ca   : > { %v1034_v0 = vsub.f32 %v1935_v31, %v1030_v44 }
 0x5cc   : > { %v1038_v45 = vmul.f32 %v1034_v0, %v1034_v0 }
 0x5ce   : > { %v1042_v46 = vsel %vm476_vm0, %v1038_v45, 0.0 }
 0x5cf   : > { %v1023_v37 = vpop.xlane.xlu2 %1022  ;;  %1043 = vadd.xlane.f32.xlu0 %v1042_v46 }
 0x5d0   : > { %v1031_v48 = vmul.f32 %v1023_v37, %v1802_v14 }
 0x5d2   : > { %v1959_v4 = vsub.f32 %v1940_v35, %v1031_v48 }
 0x5d4   : > { %v1039_v49 = vmul.f32 %v1959_v4, %v1959_v4 }
 0x5d6   : > { %v1045_v50 = vsel %vm476_vm0, %v1039_v49, 0.0 }
 0x5d7   : > { %v1026_v51 = vpop.xlane.xlu0 %1025  ;;  %1046 = vadd.xlane.f32.xlu0 %v1045_v50 }
 0x5d8   : > { %v1032_v53 = vmul.f32 %v1026_v51, %v1802_v14 }
 0x5da   : > { %v1966_v54 = vsub.f32 %v1945_v40, %v1032_v53 }
 0x5dc   : > { %v1040_v55 = vmul.f32 %v1966_v54, %v1966_v54 }
 0x5de   : > { %v1048_v47 = vsel %vm476_vm0, %v1040_v55, 0.0 }
 0x5df   : > { %1049 = vadd.xlane.f32.xlu1 %v1048_v47  ;;  %v1029_v56 = vpop.xlane.xlu0 %1028 }
 0x5e0   : > { %v1033_v57 = vmul.f32 %v1029_v56, %v1802_v14 }
 0x5e2   : > { %v1973_v58 = vsub.f32 %v1950_v29, %v1033_v57 }
 0x5e4   : > { %v1041_v59 = vmul.f32 %v1973_v58, %v1973_v58 }
 0x5e6   : > { %v1051_v60 = vsel %vm476_vm0, %v1041_v59, 0.0 }
 0x5e7   : > { %1052 = vadd.xlane.f32.xlu2 %v1051_v60 }
 0x642   : > { %v1044_v62 = vpop.xlane.xlu0 %1043 }
 0x643   : > { %v1054_v63 = vmul.f32 %v1044_v62, %v1802_v14 }
 0x645   : > { %v1058_v2 = vadd.f32 1e-05, %v1054_v63 }
 0x647   : > { %1655 = vrsqrt.f32 %v1058_v2  ;;  %vm1068_vm1 = vweird.f32 %v1058_v2 }
 0x64a   : > { %v1047_v6 = vpop.xlane.xlu0 %1046 }
 0x64b   : > { %v1055_v7 = vmul.f32 %v1047_v6, %v1802_v14  ;;  %v1577_v6 = vld [vmem:[%s2104_s12 + $0x30] sm:$0xff] }
 0x64d   : > { %v1656_v9 = vpop.eup %1655  ;;  %v1059_v8 = vadd.f32 1e-05, %v1055_v7 }
 0x64e   : > { %v1063_v10 = vmul.f32 %v1656_v9, %v1058_v2  ;;  %vm1069_vm15 = vweird.f32 %v1656_v9 }
 0x64f   : > { %1657 = vrsqrt.f32 %v1059_v8  ;;  %vm1070_vm2 = vmor %vm1068_vm1, %vm1069_vm15  ;;  %vm1078_vm4 = vweird.f32 %v1059_v8 }
 0x650   : > { %v1064_v11 = vmul.f32 %v1656_v9, %v1063_v10  ;;  %v1576_v10 = vld [vmem:[%s2104_s12 + $0x28] sm:$0xff] }
 0x652   : > { %v1065_v12 = vmul.f32 0.5, %v1064_v11  ;;  %v1050_v13 = vpop.xlane.xlu1 %1049 }
 0x653   : > { %v1056_v15 = vmul.f32 %v1050_v13, %v1802_v14  ;;  %v1575_v13 = vld [vmem:[%s2104_s12 + $0x20] sm:$0xff] }
 0x654   : > { %v1066_v16 = vsub.f32 1.5, %v1065_v12 }
 0x655   : > { %v1658_v17 = vpop.eup %1657  ;;  %v1060_v18 = vadd.f32 1e-05, %v1056_v15 }
 0x656   : > { %v1067_v20 = vmul.f32 %v1656_v9, %v1066_v16  ;;  %v1073_v21 = vmul.f32 %v1658_v17, %v1059_v8  ;;  %vm1079_vm3 = vweird.f32 %v1658_v17 }
 0x657   : > { %1659 = vrsqrt.f32 %v1060_v18  ;;  %vm1080_vm5 = vmor %vm1078_vm4, %vm1079_vm3  ;;  %vm1088_vm7 = vweird.f32 %v1060_v18 }
 0x658   : > { %v1074_v22 = vmul.f32 %v1658_v17, %v1073_v21  ;;  %v1071_v19 = vsel %vm1070_vm2, %v1656_v9, %v1067_v20 }
 0x659   : > { %v1102_v52 = vmul.f32 %v1071_v19, %v1034_v0  ;;  %v1574_v19 = vld [vmem:[%s2104_s12 + $0x18] sm:$0xff] }
 0x65a   : > { %v1075_v23 = vmul.f32 0.5, %v1074_v22  ;;  %v1053_v24 = vpop.xlane.xlu2 %1052 }
 0x65b   : > { %v1057_v25 = vmul.f32 %v1053_v24, %v1802_v14  ;;  %v1610_v14 = vld [vmem:[%s2101_s9] ss:$0 sm:$0xff]  ;;  %v1110_v38 = vmul.f32 %v1609_v28, %v1102_v52  ;;  %v1573_v52 = vld [vmem:[%s2104_s12 + $0x10] sm:$0xff] }
 0x65c   : > { %v1076_v26 = vsub.f32 1.5, %v1075_v23 }
 0x65d   : > { %v1660_v27 = vpop.eup %1659  ;;  %v1061_v30 = vadd.f32 1e-05, %v1057_v25  ;;  %v1118_v43 = vadd.f32 %v1610_v14, %v1110_v38 }
 0x65e   : > { %v1077_v32 = vmul.f32 %v1658_v17, %v1076_v26  ;;  %v1083_v33 = vmul.f32 %v1660_v27, %v1060_v18  ;;  %vm1089_vm6 = vweird.f32 %v1660_v27 }
 0x65f   : > { %1661 = vrsqrt.f32 %v1061_v30  ;;  %vm1090_vm8 = vmor %vm1088_vm7, %vm1089_vm6  ;;  %vm1098_vm10 = vweird.f32 %v1061_v30 }
 0x660   : > { %v1081_v34 = vsel %vm1080_vm5, %v1658_v17, %v1077_v32  ;;  %v1084_v36 = vmul.f32 %v1660_v27, %v1083_v33 }
 0x661   : > { %v1103_v39 = vmul.f32 %v1081_v34, %v1959_v4 }
 0x662   : > { %v1085_v1 = vmul.f32 0.5, %v1084_v36 }
 0x663   : > { %v1111_v41 = vmul.f32 %v1609_v28, %v1103_v39 }
 0x664   : > { %v1086_v42 = vsub.f32 1.5, %v1085_v1 }
 0x665   : > { %v1662_v5 = vpop.eup %1661  ;;  %v1119_v44 = vadd.f32 %v1610_v14, %v1111_v41  ;;  %v1572_v41 = vld [vmem:[%s2104_s12 + $0x8] sm:$0xff] }
 0x666   : > { %v1087_v0 = vmul.f32 %v1660_v27, %v1086_v42  ;;  %v1093_v45 = vmul.f32 %v1662_v5, %v1061_v30  ;;  %vm1099_vm9 = vweird.f32 %v1662_v5 }
 0x667   : > { %v1122_v46 = vpack.c.bf16 %v1119_v44, %v1118_v43  ;;  %vm1100_vm11 = vmor %vm1098_vm10, %vm1099_vm9 }
 0x668   : > { %v1094_v37 = vmul.f32 %v1662_v5, %v1093_v45  ;;  %v1091_v48 = vsel %vm1090_vm8, %v1660_v27, %v1087_v0 }
 0x669   : > { %1529 = vmatmul.msk.bf16.vlgmr.msra.gmra.mxu2 %vm476_vm0, %v1122_v46  ;;  %v1104_v4 = vmul.f32 %v1091_v48, %v1966_v54 }
 0x66a   : > { %v1095_v49 = vmul.f32 0.5, %v1094_v37 }
 0x66b   : > { %v1112_v47 = vmul.f32 %v1609_v28, %v1104_v4 }
 0x66c   : > { %v1096_v50 = vsub.f32 1.5, %v1095_v49  ;;  %v1571_v49 = vld [vmem:[%s2104_s12] sm:$0xff] }
 0x66d   : > { %v1120_v57 = vadd.f32 %v1610_v14, %v1112_v47 }
 0x66e   : > { %v1097_v51 = vmul.f32 %v1662_v5, %v1096_v50 }
 0x670   : > { %v1101_v53 = vsel %vm1100_vm11, %v1662_v5, %v1097_v51 }
 0x671   : > { %v1105_v55 = vmul.f32 %v1101_v53, %v1973_v58  ;;  %v1578_v58 = vld [vmem:[%s2104_s12 + $0x38] sm:$0xff] }
 0x672   : > { %1399 = vmatpush.bf16.msra.mxu3 %v1578_v58 }
 0x673   : > { %v1113_v56 = vmul.f32 %v1609_v28, %v1105_v55 }
 0x675   : > { %v1121_v59 = vadd.f32 %v1610_v14, %v1113_v56 }
 0x676   : > { %1400 = vmatpush.bf16.msra.mxu3 %v1577_v6 }
 0x677   : > { %v1123_v60 = vpack.c.bf16 %v1121_v59, %v1120_v57 }
 0x679   : > { %1530 = vmatmul.msk.bf16.gmra.mxu2 %vm476_vm0, %v1123_v60 }
 0x67a   : > { %1401 = vmatpush.bf16.msra.mxu3 %v1576_v10 }
 0x67e   : > { %1402 = vmatpush.bf16.msra.mxu3 %v1575_v13 }
 0x682   : > { %1403 = vmatpush.bf16.msra.mxu3 %v1574_v19 }
 0x686   : > { %1404 = vmatpush.bf16.msra.mxu3 %v1573_v52 }
 0x68a   : > { %1405 = vmatpush.bf16.msra.mxu3 %v1572_v41 }
 0x68e   : > { %1406 = vmatpush.bf16.msra.mxu3 %v1571_v49 }
 0x6ec   : > { %v1159_v62 = vpop.f32.mrf.mxu2 }
 0x6ed   : > { %v2002_v63 = vadd.f32 %v1611_v61, %v1159_v62 }
 0x6ef   : > { %v2005_v54 = vmul.f32 0.70710677, %v2002_v63 }
 0x6f1   : > { %v1185_v2 = vand.u32 2147483647, %v2005_v54  ;;  %vm1177_vm11 = vcmp.ge.f32.partialorder %v2005_v54, 0.0 }
 0x6f3   : > { %v1189_v3 = vmul.f32 0.3275911, %v1185_v2  ;;  %v1293_v5 = vsub.f32 0.0, %v1185_v2 }
 0x6f4   : > { %v1161_v7 = vpop.f32.mrf.mxu2 }
 0x6f5   : > { %v1193_v9 = vadd.f32 1.0, %v1189_v3  ;;  %v2014_v8 = vadd.f32 %v1611_v61, %v1161_v7  ;;  %v1297_v4 = vmul.f32 %v1293_v5, %v1185_v2 }
 0x6f7   : > { %1663 = vrcp.f32 %v1193_v9  ;;  %v2020_v11 = vmul.f32 0.70710677, %v2014_v8  ;;  %v1208_v24 = vand.u32 2147483648, %v1193_v9  ;;  %v1206_v27 = vand.u32 2147483647, %v1193_v9 }
 0x6f8   : > { %vm1202_vm13 = vweird.f32 %v1193_v9  ;;  %v1301_v58 = vmul.f32 1.442695, %v1297_v4 }
 0x6f9   : > { %v2023_v12 = vand.u32 2147483647, %v2020_v11  ;;  %v1209_v33 = vor.u32 1.1754944e-38, %v1208_v24  ;;  %vm1207_vm15 = vcmp.eq.f32.partialorder %v1206_v27, 8.507059e+37 }
 0x6fb   : > { %v1190_v15 = vmul.f32 0.3275911, %v2023_v12  ;;  %v1294_v60 = vsub.f32 0.0, %v2023_v12 }
 0x6fc   : > { %v1164_v16 = vpop.f32.mrf.mxu2 }
 0x6fd   : > { %v1664_v17 = vpop.eup %1663  ;;  %v2029_v18 = vadd.f32 %v1611_v61, %v1164_v16  ;;  %v1194_v21 = vadd.f32 1.0, %v1190_v15  ;;  %v1298_v16 = vmul.f32 %v1294_v60, %v2023_v12 }
 0x6fe   : > { %v1198_v20 = vmul.f32 %v1664_v17, %v1193_v9  ;;  %vm1203_vm12 = vweird.f32 %v1664_v17 }
 0x6ff   : > { %v2032_v22 = vmul.f32 0.70710677, %v2029_v18  ;;  %1665 = vrcp.f32 %v1194_v21  ;;  %vm1204_vm14 = vmor %vm1202_vm13, %vm1203_vm12  ;;  %v1223_v45 = vand.u32 2147483648, %v1194_v21  ;;  %v1221_v37 = vand.u32 2147483647, %v1194_v21 }
 0x700   : > { %v1199_v23 = vsub.f32 1.0, %v1198_v20  ;;  %vm1217_vm2 = vweird.f32 %v1194_v21 }
 0x701   : > { %v2038_v25 = vand.u32 2147483647, %v2032_v22  ;;  %v1224_v56 = vor.u32 1.1754944e-38, %v1223_v45  ;;  %vm1222_vm4 = vcmp.eq.f32.partialorder %v1221_v37, 8.507059e+37 }
 0x702   : > { %v1200_v26 = vmul.f32 %v1664_v17, %v1199_v23 }
 0x703   : > { %v1191_v28 = vmul.f32 0.3275911, %v2038_v25  ;;  %v1295_v12 = vsub.f32 0.0, %v2038_v25 }
 0x704   : > { %v1201_v30 = vadd.f32 %v1664_v17, %v1200_v26  ;;  %v1166_v32 = vpop.f32.mrf.mxu2 }
 0x705   : > { %v1195_v34 = vadd.f32 1.0, %v1191_v28  ;;  %v2044_v36 = vadd.f32 %v1611_v61, %v1166_v32  ;;  %v1666_v14 = vpop.eup %1665  ;;  %v1303_v28 = vmul.f32 1.442695, %v1298_v16  ;;  %v1299_v37 = vmul.f32 %v1295_v12, %v2038_v25 }
 0x706   : > { %v1205_v38 = vsel %vm1204_vm14, %v1664_v17, %v1201_v30  ;;  %v1213_v1 = vmul.f32 %v1666_v14, %v1194_v21  ;;  %vm1218_vm1 = vweird.f32 %v1666_v14  ;;  %vm1178_vm14 = vcmp.ge.f32.partialorder %v2020_v11, 0.0 }
 0x707   : > { %v1210_v39 = vsel %vm1207_vm15, %v1209_v33, %v1205_v38  ;;  %1667 = vrcp.f32 %v1195_v34  ;;  %v2050_v44 = vmul.f32 0.70710677, %v2044_v36  ;;  %vm1219_vm3 = vmor %vm1217_vm2, %vm1218_vm1  ;;  %v1238_v7 = vand.u32 2147483648, %v1195_v34 }
 0x708   : > { %v1257_v42 = vmul.f32 1.0614054, %v1210_v39  ;;  %v1214_v43 = vsub.f32 1.0, %v1213_v1  ;;  %v1236_v13 = vand.u32 2147483647, %v1195_v34  ;;  %vm1232_vm6 = vweird.f32 %v1195_v34 }
 0x709   : > { %v2053_v48 = vand.u32 2147483647, %v2050_v44  ;;  %v1239_v19 = vor.u32 1.1754944e-38, %v1238_v7  ;;  %vm1179_vm15 = vcmp.ge.f32.partialorder %v2032_v22, 0.0  ;;  %vm1180_vm1 = vcmp.ge.f32.partialorder %v2050_v44, 0.0 }
 0x70a   : > { %v1261_v0 = vadd.f32 -1.4531521, %v1257_v42  ;;  %v1215_v46 = vmul.f32 %v1666_v14, %v1214_v43  ;;  %vm1237_vm8 = vcmp.eq.f32.partialorder %v1236_v13, 8.507059e+37  ;;  %v1612_v44 = vld [vmem:[%s2105_s13] ss:$0 sm:$0xff] }
 0x70b   : > { %v1192_v55 = vmul.f32 0.3275911, %v2053_v48 }
 0x70c   : > { %v1265_v50 = vmul.f32 %v1261_v0, %v1210_v39  ;;  %v1216_v53 = vadd.f32 %v1666_v14, %v1215_v46 }
 0x70d   : > { %v1668_v51 = vpop.eup %1667  ;;  %v1196_v61 = vadd.f32 1.0, %v1192_v55 }
 0x70e   : > { %v1269_v47 = vadd.f32 1.4214138, %v1265_v50  ;;  %v1228_v57 = vmul.f32 %v1668_v51, %v1195_v34  ;;  %v1220_v59 = vsel %vm1219_vm3, %v1666_v14, %v1216_v53  ;;  %vm1233_vm5 = vweird.f32 %v1668_v51 }
 0x70f   : > { %v1225_v3 = vsel %vm1222_vm4, %v1224_v56, %v1220_v59  ;;  %1669 = vrcp.f32 %v1196_v61  ;;  %vm1234_vm7 = vmor %vm1232_vm6, %vm1233_vm5  ;;  %v1253_v5 = vand.u32 2147483648, %v1196_v61  ;;  %v1251_v0 = vand.u32 2147483647, %v1196_v61 }
 0x710   : > { %v1273_v62 = vmul.f32 %v1269_v47, %v1210_v39  ;;  %v1229_v6 = vsub.f32 1.0, %v1228_v57  ;;  %v1258_v2 = vmul.f32 1.0614054, %v1225_v3  ;;  %1671 = vpow2.f32 %v1301_v58 }
 0x711   : > { %1673 = vpow2.f32 %v1303_v28  ;;  %vm1247_vm10 = vweird.f32 %v1196_v61  ;;  %vm1252_vm13 = vcmp.eq.f32.partialorder %v1251_v0, 8.507059e+37  ;;  %v1305_v57 = vmul.f32 1.442695, %v1299_v37 }
 0x712   : > { %v1277_v9 = vadd.f32 -0.28449672, %v1273_v62  ;;  %v1230_v10 = vmul.f32 %v1668_v51, %v1229_v6  ;;  %v1262_v15 = vadd.f32 -1.4531521, %v1258_v2  ;;  %v1296_v59 = vsub.f32 0.0, %v2053_v48 }
 0x713   : > { %v1694_v62 = vmov -1.0   ;;  %1675 = vpow2.f32 %v1305_v57  ;;  %v1171_v0 = vmul.f32 0.5, %v2029_v18 }
 0x714   : > { %v1281_v17 = vmul.f32 %v1277_v9, %v1210_v39  ;;  %v1231_v20 = vadd.f32 %v1668_v51, %v1230_v10  ;;  %v1266_v21 = vmul.f32 %v1262_v15, %v1225_v3  ;;  %v1181_v25 = vsel %vm1177_vm11, 1.0, %v1694_v62 }
 0x715   : > { %v1670_v26 = vpop.eup %1669  ;;  %v1300_v10 = vmul.f32 %v1296_v59, %v2053_v48  ;;  %v1182_v13 = vsel %vm1178_vm14, 1.0, %v1694_v62 }
 0x716   : > { %v1285_v23 = vadd.f32 0.2548296, %v1281_v17  ;;  %v1235_v24 = vsel %vm1234_vm7, %v1668_v51, %v1231_v20  ;;  %v1270_v27 = vadd.f32 1.4214138, %v1266_v21  ;;  %v1243_v32 = vmul.f32 %v1670_v26, %v1196_v61  ;;  %v1672_v38 = vpop.eup %1671 }
 0x717   : > { %v1240_v52 = vsel %vm1237_vm8, %v1239_v19, %v1235_v24  ;;  %vm1248_vm9 = vweird.f32 %v1670_v26  ;;  %v1254_v51 = vor.u32 1.1754944e-38, %v1253_v5  ;;  %v1674_v47 = vpop.eup %1673  ;;  %v1169_v19 = vmul.f32 0.5, %v2002_v63 }
 0x718   : > { %v1289_v30 = vmul.f32 %v1285_v23, %v1210_v39  ;;  %v1259_v33 = vmul.f32 1.0614054, %v1240_v52  ;;  %v1274_v14 = vmul.f32 %v1270_v27, %v1225_v3  ;;  %v1244_v1 = vsub.f32 1.0, %v1243_v32  ;;  %vm1249_vm12 = vmor %vm1247_vm10, %vm1248_vm9 }
 0x719   : > { %v1170_v23 = vmul.f32 0.5, %v2014_v8  ;;  %v1307_v11 = vmul.f32 1.442695, %v1300_v10  ;;  %v1676_v27 = vpop.eup %1675 }
 0x71a   : > { %v1263_v34 = vadd.f32 -1.4531521, %v1259_v33  ;;  %v1309_v41 = vmul.f32 %v1672_v38, %v1289_v30  ;;  %v1278_v42 = vadd.f32 -0.28449672, %v1274_v14  ;;  %v1245_v43 = vmul.f32 %v1670_v26, %v1244_v1 }
 0x71b   : > { %1677 = vpow2.f32 %v1307_v11  ;;  %v1183_v1 = vsel %vm1179_vm15, 1.0, %v1694_v62 }
 0x71c   : > { %v1267_v45 = vmul.f32 %v1263_v34, %v1240_v52  ;;  %v1282_v46 = vmul.f32 %v1278_v42, %v1225_v3  ;;  %v1246_v39 = vadd.f32 %v1670_v26, %v1245_v43  ;;  %v1313_v50 = vsub.f32 1.0, %v1309_v41 }
 0x71d   : > { %v1184_v42 = vsel %vm1180_vm1, 1.0, %v1694_v62 }
 0x71e   : > { %v1271_v49 = vadd.f32 1.4214138, %v1267_v45  ;;  %v1286_v4 = vadd.f32 0.2548296, %v1282_v46  ;;  %v1250_v53 = vsel %vm1249_vm12, %v1670_v26, %v1246_v39  ;;  %v1317_v6 = vmul.f32 %v1313_v50, %v1181_v25 }
 0x71f   : > { %v1255_v60 = vsel %vm1252_vm13, %v1254_v51, %v1250_v53  ;;  %v1172_v45 = vmul.f32 0.5, %v2044_v36 }
 0x720   : > { %v1275_v55 = vmul.f32 %v1271_v49, %v1240_v52  ;;  %v1290_v56 = vmul.f32 %v1286_v4, %v1225_v3  ;;  %v1260_v61 = vmul.f32 1.0614054, %v1255_v60  ;;  %v1321_v16 = vadd.f32 1.0, %v1317_v6 }
 0x721   : > { %v1678_v63 = vpop.eup %1677 }
 0x722   : > { %v1279_v58 = vadd.f32 -0.28449672, %v1275_v55  ;;  %v1310_v54 = vmul.f32 %v1674_v47, %v1290_v56  ;;  %v1264_v2 = vadd.f32 -1.4531521, %v1260_v61  ;;  %v1325_v28 = vmul.f32 %v1321_v16, %v1169_v19 }
 0x724   : > { %v1283_v7 = vmul.f32 %v1279_v58, %v1240_v52  ;;  %v1314_v9 = vsub.f32 1.0, %v1310_v54  ;;  %v1268_v3 = vmul.f32 %v1264_v2, %v1255_v60 }
 0x726   : > { %v1287_v15 = vadd.f32 0.2548296, %v1283_v7  ;;  %v1318_v17 = vmul.f32 %v1314_v9, %v1182_v13  ;;  %v1272_v20 = vadd.f32 1.4214138, %v1268_v3 }
 0x728   : > { %v1291_v21 = vmul.f32 %v1287_v15, %v1240_v52  ;;  %v1322_v24 = vadd.f32 1.0, %v1318_v17  ;;  %v1276_v26 = vmul.f32 %v1272_v20, %v1255_v60 }
 0x72a   : > { %v1326_v30 = vmul.f32 %v1322_v24, %v1170_v23  ;;  %v1280_v32 = vadd.f32 -0.28449672, %v1276_v26  ;;  %v1311_v33 = vmul.f32 %v1676_v27, %v1291_v21 }
 0x72c   : > { %v1329_v48 = vpack.c.bf16 %v1326_v30, %v1325_v28  ;;  %v1284_v14 = vmul.f32 %v1280_v32, %v1255_v60  ;;  %v1315_v52 = vsub.f32 1.0, %v1311_v33 }
 0x72e   : > { %1407 = vmatmul.bf16.vlgmr.msra.gmra.mxu3 %v1329_v48  ;;  %v1288_v12 = vadd.f32 0.2548296, %v1284_v14  ;;  %v1319_v34 = vmul.f32 %v1315_v52, %v1183_v1 }
 0x730   : > { %v1292_v38 = vmul.f32 %v1288_v12, %v1255_v60  ;;  %v1323_v43 = vadd.f32 1.0, %v1319_v34 }
 0x732   : > { %v1312_v8 = vmul.f32 %v1678_v63, %v1292_v38  ;;  %v1327_v22 = vmul.f32 %v1323_v43, %v1171_v0 }
 0x734   : > { %v1316_v41 = vsub.f32 1.0, %v1312_v8 }
 0x736   : > { %v1320_v5 = vmul.f32 %v1316_v41, %v1184_v42 }
 0x738   : > { %v1324_v46 = vadd.f32 1.0, %v1320_v5 }
 0x73a   : > { %v1328_v37 = vmul.f32 %v1324_v46, %v1172_v45 }
 0x73c   : > { %v1330_v39 = vpack.c.bf16 %v1328_v37, %v1327_v22 }
 0x73e   : > { %1412 = vmatmul.bf16.gmra.mxu3 %v1330_v39 }
 0x7b1   : > { %v1408_v49 = vpop.f32.mrf.mxu3 }
 0x7b2   : > { %v1409_v50 = vadd.f32 %v1612_v44, %v1408_v49 }
 0x7b4   : > { %v1418_v18 = vadd.f32 %v1409_v50, %v1935_v31 }
 0x7b6   : > { %1422 = vst.msk [vmem:[%s469_s28] sm:$0xff] %vm476_vm0, %v1418_v18 }
 0x7b9   : > { %v1410_v36 = vpop.f32.mrf.mxu3 }
 0x7ba   : > { %v1411_v4 = vadd.f32 %v1612_v44, %v1410_v36 }
 0x7bc   : > { %v1419_v51 = vadd.f32 %v1411_v4, %v1940_v35 }
 0x7be   : > { %1423 = vst.msk [vmem:[%s469_s28 + $0x8] sm:$0xff] %vm476_vm0, %v1419_v51 }
 0x7c1   : > { %v1413_v53 = vpop.f32.mrf.mxu3 }
 0x7c2   : > { %v1414_v55 = vadd.f32 %v1612_v44, %v1413_v53 }
 0x7c4   : > { %v1420_v47 = vadd.f32 %v1414_v55, %v1945_v40 }
 0x7c6   : > { %1424 = vst.msk [vmem:[%s469_s28 + $0x10] sm:$0xff] %vm476_vm0, %v1420_v47 }
 0x7c9   : > { %v1415_v56 = vpop.f32.mrf.mxu3 }
 0x7ca   : > { %v1416_v57 = vadd.f32 %v1612_v44, %v1415_v56 }
 0x7cc   : > { %v1421_v59 = vadd.f32 %v1416_v57, %v1950_v29 }
 0x7ce   : > { %1425 = vst.msk [vmem:[%s469_s28 + $0x18] sm:$0xff] %vm476_vm0, %v1421_v59 }
 0x7cf PF: > { %s24_s29 = sadd.s32 1, %s1685_s29  }
 0x7d0   : > { %p21_p4 = scmp.ge.s32.totalorder %s24_s29, 6  }
 0x7d2   :  { %23 = sbr.rel (!%p21_p4) target bundleno = 1 (0x1), region = 107 }

// kernel: basic_layer_forward.3
= control target key start
LH: loop header
LB: loop body
LE: loop exit
PB: predicated region body
PF: predicated region fallthrough
CT: control target
= control target key end

     0   :  { %s1948_s18 = smov 0   ;;  %s2285_s0 = inlined_call_operand.vmem [shape: f32[128,32], index: 0, kind: input, shape index: {}]   ;;  %s2286_s1 = inlined_call_operand.vmem [shape: f32[1,32], index: 1, kind: input, shape index: {}]   ;;  %s2287_s2 = inlined_call_operand.vmem [shape: f32[1,32], index: 2, kind: input, shape index: {}]   ;;  %s2288_s3 = inlined_call_operand.vmem [shape: bf16[32,96], index: 3, kind: input, shape index: {}]   ;;  %s2289_s4 = inlined_call_operand.vmem [shape: f32[1,96], index: 4, kind: input, shape index: {}]   ;;  %s2290_s5 = inlined_call_operand.vmem [shape: f32[2,16,16], index: 5, kind: input, shape index: {}]   ;;  %s2291_s6 = inlined_call_operand.vmem [shape: f32[4,16,16], index: 6, kind: input, shape index: {}]   ;;  %s2292_s7 = inlined_call_operand.vmem [shape: bf16[32,32], index: 7, kind: input, shape index: {}]   ;;  %s2293_s8 = inlined_call_operand.vmem [shape: f32[1,32], index: 8, kind: input, shape index: {}]   ;;  %s2294_s9 = inlined_call_operand.vmem [shape: f32[1,32], index: 9, kind: input, shape index: {}]   ;;  %s2295_s10 = inlined_call_operand.vmem [shape: f32[1,32], index: 10, kind: input, shape index: {}]   ;;  %s2296_s11 = inlined_call_operand.vmem [shape: bf16[32,128], index: 11, kind: input, shape index: {}]   ;;  %s2297_s12 = inlined_call_operand.vmem [shape: f32[1,128], index: 12, kind: input, shape index: {}]   ;;  %s2298_s13 = inlined_call_operand.vmem [shape: bf16[128,32], index: 13, kind: input, shape index: {}]   ;;  %s2299_s14 = inlined_call_operand.vmem [shape: f32[1,32], index: 14, kind: input, shape index: {}]   ;;  %s2300_s15 = inlined_call_operand.vmem [shape: f32[128,32], index: 15, kind: output, shape index: {}]  }
   0x1 LB: > { %s1954_s19 = sadd.s32 4294967295, %s1858_s18   ;;  %p1652_p0 = scmp.ge.s32.totalorder %s1858_s18, 1  ;;  %s1858_s18 = sphi %s1948_s18, %s25_s18  }
   0x2   : > { %p498_p1 = scmp.lt.s32.totalorder %s1858_s18, 5 }
   0x4   : > { %p499_p2 = pnand %p1652_p0, %p498_p1 }
   0x5   : > { %s1653_s20 = sshll.u32 (!%p499_p2), %s1954_s19, 2  ;;  %s1862_s25 = smov (!%p499_p2), 96  }
   0x6   : > { %502 = sbr.rel (%p499_p2) target bundleno = 2001 (0x7d1), region = 80  ;;  %p565_p3 = scmp.lt.s32.totalorder (!%p499_p2), %s1653_s20, 15 }
   0x7   : > { %s1863_s26 = smov (!%p499_p2), 112   ;;  %s571_s27 = ssub.s32 (!%p499_p2), 0, %s1954_s19 }
   0x8   : > { %s1655_s28 = smin.u32 (!%p499_p2), %s1954_s19, %s571_s27  ;;  %p570_p4 = scmp.lt.s32.totalorder (!%p499_p2), %s1954_s19, 0 }
   0x9   : > { %s573_s29 = sand.u32 (!%p499_p2), 1, %s1655_s28  }
   0xa   : > { %s574_s30 = ssub.s32 (!%p499_p2), 0, %s573_s29 }
   0xb   : > { %s2304_s20 = smov (!%p565_p3, %s1653_s20), 15  ;;  %vm612_vm0 = vcmask 261120   ;;  %v1860_v8 = vmov 32.0   ;;  %v1739_v35 = vld [vmem:[%s2288_s3 + $0x8] sm:$0xff]  ;;  %v1738_v39 = vld [vmem:[%s2288_s3] sm:$0xff]  ;;  %vm788_vm14 = vcmask 130048   ;;  %s2306_s30 = smov (!%p570_p4, %s574_s30), %s573_s29 }
   0xc   : > { %s2301_s21 = sshll.u32 %s2304_s20, 3  ;;  %1786 = vrcp.f32 %v1860_v8  ;;  %758 = vmatpush.bf16.msra.mxu0 %v1739_v35  ;;  %p1657_p5 = scmp.lt.s32.totalorder %s2306_s30, 0 }
   0xd   : > { %s568_s24 = scalar_lea.vmem %s2285_s0, %s2301_s21  ;;  %s580_s16 = sadd.s32 2, %s2306_s30 }
   0xe   : > { %v1967_v0 = vld [vmem:[%s568_s24 + $0x10] sm:$0xff]  ;;  %v1969_v1 = vld [vmem:[%s568_s24] sm:$0xff]  ;;  %v1975_v4 = vld [vmem:[%s568_s24 + $0x18] sm:$0xff]  ;;  %s2308_s16 = smov (!%p1657_p5, %s580_s16), %s2306_s30  ;;  %s2302_s29 = sshll.u32 %s2304_s20, 3 }
   0xf   : > { %v619_v2 = vsel %vm612_vm0, %v1967_v0, 0.0  ;;  %v613_v3 = vsel %vm612_vm0, %v1969_v1, 0.0  ;;  %v1977_v5 = vld [vmem:[%s568_s24 + $0x8] sm:$0xff]  ;;  %v622_v6 = vsel %vm612_vm0, %v1975_v4, 0.0  ;;  %s1861_s24 = smov 80   ;;  %s1658_s17 = sshll.u32 %s2308_s16, 1 }
  0x10   : > { %620 = vadd.xlane.f32.xlu1 %v619_v2  ;;  %614 = vadd.xlane.f32.xlu0 %v613_v3  ;;  %v616_v7 = vsel %vm612_vm0, %v1977_v5, 0.0  ;;  %p583_p6 = scmp.lt.s32.totalorder %s1658_s17, 3  ;;  %s1864_s16 = smov 64  }
  0x11   : > { %759 = vmatpush.bf16.msra.mxu0 %v1738_v39 }
  0x12   : > { %v1787_v9 = vpop.eup %1786  ;;  %s2310_s17 = smov (!%p583_p6, %s1658_s17), 3 }
  0x13   : > { %v626_v10 = vmul.f32 32.0, %v1787_v9  ;;  %vm630_vm1 = vweird.f32 %v1787_v9  ;;  %s1737_s22 = sshll.u32 %s2310_s17, 4  ;;  %s1865_s17 = smov 48  }
  0x15   : > { %v627_v11 = vsub.f32 1.0, %v626_v10 }
  0x17   : > { %v628_v12 = vmul.f32 %v1787_v9, %v627_v11 }
  0x18   : > { %623 = vadd.xlane.f32.xlu1 %v622_v6  ;;  %617 = vadd.xlane.f32.xlu0 %v616_v7 }
  0x19   : > { %v629_v13 = vadd.f32 %v1787_v9, %v628_v12 }
  0x1b   : > { %v1983_v14 = vsel %vm630_vm1, %v1787_v9, %v629_v13  ;;  %v1778_v9 = vld [vmem:[%s2286_s1] ss:$0 sm:$0xff] }
  0x83   : > { %v621_v15 = vpop.xlane.xlu1 %620  ;;  %v615_v16 = vpop.xlane.xlu0 %614 }
  0x84   : > { %v634_v17 = vmul.f32 %v1983_v14, %v621_v15  ;;  %v632_v18 = vmul.f32 %v1983_v14, %v615_v16 }
  0x86   : > { %v1988_v19 = vsub.f32 %v1967_v0, %v634_v17  ;;  %v636_v20 = vsub.f32 %v1969_v1, %v632_v18  ;;  %v1779_v17 = vld [vmem:[%s2287_s2] ss:$0 sm:$0xff] }
  0x88   : > { %v642_v21 = vmul.f32 %v1988_v19, %v1988_v19  ;;  %v640_v22 = vmul.f32 %v636_v20, %v636_v20 }
  0x8a   : > { %v650_v23 = vsel %vm612_vm0, %v642_v21, 0.0  ;;  %v644_v24 = vsel %vm612_vm0, %v640_v22, 0.0 }
  0x8b   : > { %v624_v25 = vpop.xlane.xlu1 %623  ;;  %651 = vadd.xlane.f32.xlu0 %v650_v23  ;;  %645 = vadd.xlane.f32.xlu2 %v644_v24  ;;  %v618_v26 = vpop.xlane.xlu0 %617 }
  0x8c   : > { %v635_v27 = vmul.f32 %v1983_v14, %v624_v25  ;;  %v633_v28 = vmul.f32 %v1983_v14, %v618_v26 }
  0x8e   : > { %v1998_v29 = vsub.f32 %v1975_v4, %v635_v27  ;;  %v637_v30 = vsub.f32 %v1977_v5, %v633_v28 }
  0x90   : > { %v643_v31 = vmul.f32 %v1998_v29, %v1998_v29  ;;  %v641_v32 = vmul.f32 %v637_v30, %v637_v30 }
  0x92   : > { %v653_v33 = vsel %vm612_vm0, %v643_v31, 0.0  ;;  %v647_v34 = vsel %vm612_vm0, %v641_v32, 0.0 }
  0x93   : > { %654 = vadd.xlane.f32.xlu1 %v653_v33  ;;  %648 = vadd.xlane.f32.xlu2 %v647_v34 }
  0xfe   : > { %v646_v36 = vpop.xlane.xlu2 %645  ;;  %v652_v38 = vpop.xlane.xlu0 %651 }
  0xff   : > { %v656_v37 = vmul.f32 %v646_v36, %v1983_v14  ;;  %v658_v41 = vmul.f32 %v652_v38, %v1983_v14 }
 0x101   : > { %v660_v40 = vadd.f32 1e-05, %v656_v37  ;;  %v662_v42 = vadd.f32 1e-05, %v658_v41  ;;  %v1780_v37 = vld [vmem:[%s2289_s4] ss:$0 sm:$0xff] }
 0x103   : > { %1788 = vrsqrt.f32 %v660_v40  ;;  %vm670_vm3 = vweird.f32 %v660_v40  ;;  %vm690_vm10 = vweird.f32 %v662_v42 }
 0x104   : > { %1790 = vrsqrt.f32 %v662_v42 }
 0x106   : > { %v655_v43 = vpop.xlane.xlu1 %654  ;;  %v649_v44 = vpop.xlane.xlu2 %648 }
 0x107   : > { %v659_v45 = vmul.f32 %v655_v43, %v1983_v14  ;;  %v657_v46 = vmul.f32 %v649_v44, %v1983_v14 }
 0x109   : > { %v1789_v47 = vpop.eup %1788  ;;  %v663_v48 = vadd.f32 1e-05, %v659_v45  ;;  %v661_v49 = vadd.f32 1e-05, %v657_v46 }
 0x10a   : > { %v665_v50 = vmul.f32 %v1789_v47, %v660_v40  ;;  %v1791_v53 = vpop.eup %1790  ;;  %vm671_vm2 = vweird.f32 %v1789_v47 }
 0x10b   : > { %1792 = vrsqrt.f32 %v663_v48  ;;  %v685_v59 = vmul.f32 %v1791_v53, %v662_v42  ;;  %vm672_vm4 = vmor %vm670_vm3, %vm671_vm2  ;;  %vm680_vm6 = vweird.f32 %v661_v49  ;;  %vm700_vm8 = vweird.f32 %v663_v48 }
 0x10c   : > { %v666_v51 = vmul.f32 %v1789_v47, %v665_v50  ;;  %1794 = vrsqrt.f32 %v661_v49  ;;  %vm691_vm11 = vweird.f32 %v1791_v53 }
 0x10d   : > { %v686_v2 = vmul.f32 %v1791_v53, %v685_v59  ;;  %vm692_vm13 = vmor %vm690_vm10, %vm691_vm11 }
 0x10e   : > { %v667_v52 = vmul.f32 0.5, %v666_v51 }
 0x10f   : > { %v687_v10 = vmul.f32 0.5, %v686_v2 }
 0x110   : > { %v668_v54 = vsub.f32 1.5, %v667_v52 }
 0x111   : > { %v1793_v55 = vpop.eup %1792  ;;  %v688_v18 = vsub.f32 1.5, %v687_v10 }
 0x112   : > { %v1795_v56 = vpop.eup %1794  ;;  %v695_v57 = vmul.f32 %v1793_v55, %v663_v48  ;;  %v669_v58 = vmul.f32 %v1789_v47, %v668_v54  ;;  %vm701_vm9 = vweird.f32 %v1793_v55 }
 0x113   : > { %v675_v60 = vmul.f32 %v1795_v56, %v661_v49  ;;  %vm681_vm5 = vweird.f32 %v1795_v56  ;;  %vm702_vm12 = vmor %vm700_vm8, %vm701_vm9  ;;  %v689_v24 = vmul.f32 %v1791_v53, %v688_v18 }
 0x114   : > { %v696_v61 = vmul.f32 %v1793_v55, %v695_v57  ;;  %v673_v63 = vsel %vm672_vm4, %v1789_v47, %v669_v58  ;;  %vm682_vm7 = vmor %vm680_vm6, %vm681_vm5 }
 0x115   : > { %v676_v62 = vmul.f32 %v1795_v56, %v675_v60  ;;  %v704_v8 = vmul.f32 %v673_v63, %v636_v20  ;;  %v693_v27 = vsel %vm692_vm13, %v1791_v53, %v689_v24  ;;  %v779_v63 = vld [vmem:[%s2290_s5] sm:$0xff] }
 0x116   : > { %v697_v6 = vmul.f32 0.5, %v696_v61 }
 0x117   : > { %v677_v3 = vmul.f32 0.5, %v676_v62  ;;  %v712_v16 = vmul.f32 %v1778_v9, %v704_v8 }
 0x118   : > { %v698_v12 = vsub.f32 1.5, %v697_v6 }
 0x119   : > { %v678_v7 = vsub.f32 1.5, %v677_v3  ;;  %v720_v22 = vadd.f32 %v1779_v17, %v712_v16 }
 0x11a   : > { %v699_v21 = vmul.f32 %v1793_v55, %v698_v12  ;;  %v780_v12 = vld [vmem:[%s2290_s5 + $0x8] sm:$0xff] }
 0x11b   : > { %v679_v11 = vmul.f32 %v1795_v56, %v678_v7 }
 0x11c   : > { %v703_v26 = vsel %vm702_vm12, %v1793_v55, %v699_v21 }
 0x11d   : > { %v683_v13 = vsel %vm682_vm7, %v1795_v56, %v679_v11  ;;  %v707_v28 = vmul.f32 %v703_v26, %v1998_v29 }
 0x11e   : > { %v705_v15 = vmul.f32 %v683_v13, %v637_v30  ;;  %v706_v30 = vmul.f32 %v693_v27, %v1988_v19 }
 0x11f   : > { %v715_v31 = vmul.f32 %v1778_v9, %v707_v28 }
 0x120   : > { %v713_v20 = vmul.f32 %v1778_v9, %v705_v15  ;;  %v714_v32 = vmul.f32 %v1778_v9, %v706_v30  ;;  %v1678_v30 = vld [vmem:[%s2290_s5 + $0x18] sm:$0xff] }
 0x121   : > { %v723_v33 = vadd.f32 %v1779_v17, %v715_v31 }
 0x122   : > { %v721_v23 = vadd.f32 %v1779_v17, %v713_v20  ;;  %v722_v34 = vadd.f32 %v1779_v17, %v714_v32 }
 0x124   : > { %v724_v25 = vpack.c.bf16 %v721_v23, %v720_v22  ;;  %v725_v35 = vpack.c.bf16 %v723_v33, %v722_v34  ;;  %v1677_v23 = vld [vmem:[%s2290_s5 + $0x10] sm:$0xff] }
 0x126   : > { %1671 = vmatmul.msk.bf16.vlgmr.msra.gmra.mxu0 %vm612_vm0, %v724_v25 }
 0x136   : > { %1672 = vmatmul.msk.bf16.gmra.mxu0 %vm612_vm0, %v725_v35 }
 0x1a3   : > { %v761_v36 = vpop.f32.mrf.mxu0 }
 0x1a4   : > { %v762_v38 = vadd.f32 %v1780_v37, %v761_v36 }
 0x1a6   : > { %v775_v40 = vpack.c.bf16 %v762_v38, %v762_v38 }
 0x1a8   : > { %v783_v29 = vunpack.c.l.b16 %v775_v40 }
 0x1ab   : > { %v763_v39 = vpop.f32.mrf.mxu0 }
 0x1ac   : > { %v764_v41 = vadd.f32 %v1780_v37, %v763_v39 }
 0x1ae   : > { %v776_v42 = vpack.c.bf16 %v764_v41, %v764_v41 }
 0x1b0   : > { %v784_v43 = vunpack.c.l.b16 %v776_v42 }
 0x1b2   : > { %v2028_v19 = vpack.c.b16 %v784_v43, %v783_v29 }
 0x1b3   : > { %v766_v44 = vpop.f32.mrf.mxu0 }
 0x1b4   : > { %943 = vrot.lane.b32.xlu1 %v2028_v19, %s1861_s24  ;;  %786 = vrot.lane.b32.xlu0 %v2028_v19, %s1862_s25  ;;  %v767_v45 = vadd.f32 %v1780_v37, %v766_v44 }
 0x1b6   : > { %v777_v47 = vpack.c.bf16 %v767_v45, %v767_v45 }
 0x1b8   : > { %v811_v50 = vunpack.c.l.b16 %v777_v47 }
 0x1bb   : > { %v768_v46 = vpop.f32.mrf.mxu0 }
 0x1bc   : > { %v769_v48 = vadd.f32 %v1780_v37, %v768_v46 }
 0x1be   : > { %v778_v49 = vpack.c.bf16 %v769_v48, %v769_v48 }
 0x1c0   : > { %v812_v51 = vunpack.c.l.b16 %v778_v49 }
 0x1c2   : > { %v2032_v52 = vpack.c.b16 %v812_v51, %v811_v50 }
 0x1c4   : > { %967 = vrot.lane.b32.xlu0 %v2032_v52, %s1861_s24  ;;  %814 = vrot.lane.b32.xlu2 %v2032_v52, %s1862_s25  ;;  %s2054_s25 = scalar_lea.vmem %s2291_s6, %s1737_s22  ;;  %s1866_s24 = smov 16  }
 0x1c5   : > { %v773_v3 = vld [vmem:[%s2054_s25 + $0x10] sm:$0xff]  ;;  %v771_v9 = vld [vmem:[%s2054_s25] sm:$0xff]  ;;  %v774_v18 = vld [vmem:[%s2054_s25 + $0x18] sm:$0xff] }
 0x1c6   : > { %v772_v31 = vld [vmem:[%s2054_s25 + $0x8] sm:$0xff] }
 0x1cc   : > { %941 = vrot.lane.b32.xlu2 %v2028_v19, %s1863_s26 }
 0x1d4   : > { %965 = vrot.lane.b32.xlu2 %v2032_v52, %s1863_s26 }
 0x21e   : > { %v815_v53 = vpop.permute.xlu2 %814 }
 0x21f   : > { %v820_v54 = vsel %vm788_vm14, %v815_v53, 0 }
 0x220   : > { %829 = vmatpush.bf16.xpose.msra.mxu2 %v820_v54 }
 0x226   : > { %v944_v55 = vpop.permute.xlu1 %943  ;;  %v787_v56 = vpop.permute.xlu0 %786 }
 0x227   : > { %1674 = vmatmul.msk.bf16.vlgmr.msra.gmra.mxu2 %vm788_vm14, %v2032_v52  ;;  %v949_v57 = vsel %vm788_vm14, %v944_v55, 0  ;;  %v793_v58 = vsel %vm788_vm14, %v787_v56, 0  ;;  %v942_v59 = vpop.permute.xlu2 %941 }
 0x228   : > { %802 = vmatpush.bf16.xpose.msra.mxu1 %v793_v58 }
 0x22f   : > { %1673 = vmatmul.msk.bf16.vlgmr.msra.gmra.mxu1 %vm788_vm14, %v2028_v19  ;;  %v966_v62 = vpop.permute.xlu2 %965 }
 0x230   : > { %958 = vmatpush.bf16.xpose.msrb.mxu1 %v949_v57 }
 0x236   : > { %v968_v60 = vpop.permute.xlu0 %967 }
 0x237   : > { %v973_v61 = vsel %vm788_vm14, %v968_v60, 0 }
 0x238   : > { %982 = vmatpush.bf16.xpose.msrb.mxu2 %v973_v61 }
 0x23f   : > { %1680 = vmatmul.msk.bf16.vlgmr.msrb.gmra.mxu2 %vm788_vm14, %v966_v62  ;;  %1679 = vmatmul.msk.bf16.vlgmr.msrb.gmra.mxu1 %vm788_vm14, %v942_v59 }
 0x2aa   : > { %v831_v2 = vpop.f32.mrf.mxu2 }
 0x2ab   : > { %v832_v6 = vadd.f32 %v831_v2, %v779_v63 }
 0x2ac   : > { %v804_v7 = vpop.f32.mrf.mxu1 }
 0x2ad   : > { %v838_v8 = vadd.f32 %v832_v6, %v773_v3  ;;  %v805_v10 = vadd.f32 %v804_v7, %v779_v63 }
 0x2af   : > { %v846_v11 = vsel %vm788_vm14, %v838_v8, -inf  ;;  %v836_v13 = vadd.f32 %v805_v10, %v771_v9 }
 0x2b0   : > { %847 = vmax.xlane.f32.xlu1 %v846_v11 }
 0x2b1   : > { %v840_v16 = vsel %vm788_vm14, %v836_v13, -inf }
 0x2b2   : > { %v833_v15 = vpop.f32.mrf.mxu2  ;;  %841 = vmax.xlane.f32.xlu0 %v840_v16 }
 0x2b3   : > { %v834_v17 = vadd.f32 %v833_v15, %v780_v12 }
 0x2b4   : > { %v806_v20 = vpop.f32.mrf.mxu1 }
 0x2b5   : > { %v839_v21 = vadd.f32 %v834_v17, %v774_v18  ;;  %v807_v27 = vadd.f32 %v806_v20, %v780_v12 }
 0x2b7   : > { %v849_v22 = vsel %vm788_vm14, %v839_v21, -inf  ;;  %v837_v34 = vadd.f32 %v807_v27, %v772_v31 }
 0x2b9   : > { %v843_v39 = vsel %vm788_vm14, %v837_v34, -inf }
 0x2ba   : > { %850 = vmax.xlane.f32.xlu0 %v849_v22 }
 0x2bc   : > { %v960_v24 = vpop.f32.mrf.mxu1 }
 0x2bd   : > { %v961_v25 = vadd.f32 %v1677_v23, %v960_v24 }
 0x2bf   : > { %v989_v26 = vadd.f32 %v961_v25, %v771_v9 }
 0x2c1   : > { %v993_v28 = vsel %vm788_vm14, %v989_v26, -inf }
 0x2c2   : > { %994 = vmax.xlane.f32.xlu2 %v993_v28  ;;  %v984_v35 = vpop.f32.mrf.mxu2 }
 0x2c3   : > { %v985_v37 = vadd.f32 %v1677_v23, %v984_v35 }
 0x2c4   : > { %v962_v32 = vpop.f32.mrf.mxu1 }
 0x2c5   : > { %v963_v33 = vadd.f32 %v1678_v30, %v962_v32  ;;  %v991_v40 = vadd.f32 %v985_v37, %v773_v3 }
 0x2c7   : > { %v990_v36 = vadd.f32 %v963_v33, %v772_v31  ;;  %v999_v41 = vsel %vm788_vm14, %v991_v40, -inf }
 0x2c9   : > { %v996_v38 = vsel %vm788_vm14, %v990_v36, -inf }
 0x2ca   : > { %997 = vmax.xlane.f32.xlu1 %v996_v38  ;;  %844 = vmax.xlane.f32.xlu2 %v843_v39  ;;  %v986_v42 = vpop.f32.mrf.mxu2 }
 0x2cb   : > { %v987_v29 = vadd.f32 %v1678_v30, %v986_v42 }
 0x2cd   : > { %v992_v43 = vadd.f32 %v987_v29, %v774_v18 }
 0x2ce   : > { %918 = vrot.lane.b32.xlu0 %v2032_v52, %s1864_s16 }
 0x2cf   : > { %v1002_v44 = vsel %vm788_vm14, %v992_v43, -inf }
 0x2d2   : > { %1000 = vmax.xlane.f32.xlu1 %v999_v41 }
 0x2f8   : > { %1003 = vmax.xlane.f32.xlu0 %v1002_v44 }
 0x30c   : > { %893 = vrot.lane.b32.xlu0 %v2028_v19, %s1864_s16 }
 0x323   : > { %v848_v50 = vpop.xlane.xlu1 %847 }
 0x324   : > { %v854_v54 = vsub.f32 %v838_v8, %v848_v50 }
 0x325   : > { %v842_v45 = vpop.xlane.xlu0 %841 }
 0x326   : > { %v852_v46 = vsub.f32 %v836_v13, %v842_v45  ;;  %v860_v57 = vmul.f32 1.442695, %v854_v54 }
 0x328   : > { %v856_v47 = vmul.f32 1.442695, %v852_v46 }
 0x32a   : > { %1796 = vpow2.f32 %v856_v47 }
 0x32d   : > { %v851_v55 = vpop.xlane.xlu0 %850 }
 0x32e   : > { %v855_v61 = vsub.f32 %v839_v21, %v851_v55 }
 0x330   : > { %v2082_v48 = vpop.eup %1796  ;;  %v862_v3 = vmul.f32 1.442695, %v855_v61 }
 0x331   : > { %v864_v49 = vsel %vm788_vm14, %v2082_v48, 0.0 }
 0x332   : > { %865 = vadd.xlane.f32.xlu2 %v864_v49 }
 0x335   : > { %v995_v51 = vpop.xlane.xlu2 %994 }
 0x336   : > { %v1005_v53 = vsub.f32 %v989_v26, %v995_v51 }
 0x338   : > { %v1009_v56 = vmul.f32 1.442695, %v1005_v53 }
 0x33a   : > { %1798 = vpow2.f32 %v1009_v56 }
 0x33b   : > { %1800 = vpow2.f32 %v860_v57 }
 0x33d   : > { %v998_v58 = vpop.xlane.xlu1 %997  ;;  %v845_v6 = vpop.xlane.xlu2 %844 }
 0x33e   : > { %v1006_v59 = vsub.f32 %v990_v36, %v998_v58  ;;  %v853_v9 = vsub.f32 %v837_v34, %v845_v6 }
 0x340   : > { %v2086_v60 = vpop.eup %1798  ;;  %v1011_v62 = vmul.f32 1.442695, %v1006_v59  ;;  %v919_v63 = vpop.permute.xlu0 %918  ;;  %v858_v12 = vmul.f32 1.442695, %v853_v9 }
 0x341   : > { %931 = vmatpush.bf16.msra.mxu3 %v919_v63  ;;  %v1017_v2 = vsel %vm788_vm14, %v2086_v60, 0.0  ;;  %v1801_v7 = vpop.eup %1800 }
 0x342   : > { %1802 = vpow2.f32 %v1011_v62  ;;  %1018 = vadd.xlane.f32.xlu2 %v1017_v2  ;;  %v870_v11 = vsel %vm788_vm14, %v1801_v7, 0.0 }
 0x343   : > { %1804 = vpow2.f32 %v862_v3 }
 0x344   : > { %1806 = vpow2.f32 %v858_v12 }
 0x345   : > { %v1001_v13 = vpop.xlane.xlu1 %1000 }
 0x346   : > { %v1007_v16 = vsub.f32 %v991_v40, %v1001_v13 }
 0x348   : > { %v2090_v8 = vpop.eup %1802  ;;  %v1013_v18 = vmul.f32 1.442695, %v1007_v16 }
 0x349   : > { %v1020_v10 = vsel %vm788_vm14, %v2090_v8, 0.0  ;;  %v1805_v15 = vpop.eup %1804 }
 0x34a   : > { %1021 = vadd.xlane.f32.xlu1 %v1020_v10  ;;  %871 = vadd.xlane.f32.xlu2 %v870_v11  ;;  %v873_v17 = vsel %vm788_vm14, %v1805_v15, 0.0  ;;  %v1807_v20 = vpop.eup %1806  ;;  %1808 = vpow2.f32 %v1013_v18  ;;  %v1741_v18 = vld [vmem:[%s2292_s7 + $0x8] sm:$0xff] }
 0x34b   : > { %v867_v21 = vsel %vm788_vm14, %v1807_v20, 0.0  ;;  %1141 = vmatpush.bf16.msra.mxu1 %v1741_v18  ;;  %v1742_v18 = vld [vmem:[%s2296_s11] sm:$0xff] }
 0x350   : > { %v2097_v22 = vpop.eup %1808 }
 0x351   : > { %v1023_v23 = vsel %vm788_vm14, %v2097_v22, 0.0 }
 0x352   : > { %874 = vadd.xlane.f32.xlu1 %v873_v17 }
 0x35a   : > { %868 = vadd.xlane.f32.xlu1 %v867_v21 }
 0x362   : > { %1046 = vrot.lane.b32.xlu2 %v2028_v19, %s1865_s17  ;;  %1024 = vadd.xlane.f32.xlu1 %v1023_v23 }
 0x36b   : > { %v1004_v24 = vpop.xlane.xlu0 %1003 }
 0x36c   : > { %v1008_v25 = vsub.f32 %v992_v43, %v1004_v24 }
 0x36e   : > { %v1015_v26 = vmul.f32 1.442695, %v1008_v25 }
 0x370   : > { %1810 = vpow2.f32 %v1015_v26 }
 0x376   : > { %v1811_v27 = vpop.eup %1810 }
 0x377   : > { %v1026_v28 = vsel %vm788_vm14, %v1811_v27, 0.0 }
 0x378   : > { %1027 = vadd.xlane.f32.xlu0 %v1026_v28  ;;  %v1740_v28 = vld [vmem:[%s2292_s7] sm:$0xff] }
 0x379   : > { %1142 = vmatpush.bf16.msra.mxu1 %v1740_v28 }
 0x37b   : > { %1071 = vrot.lane.b32.xlu1 %v2032_v52, %s1865_s17  ;;  %s605_s17 = scalar_lea.vmem %s2300_s15, %s2302_s29 }
 0x37e   : > { %v894_v30 = vpop.permute.xlu0 %893 }
 0x37f   : > { %906 = vmatpush.bf16.msrb.mxu0 %v894_v30 }
 0x3a5   : > { %v866_v31 = vpop.xlane.xlu2 %865 }
 0x3b5   : > { %v1019_v32 = vpop.xlane.xlu2 %1018 }
 0x3bd   : > { %v1022_v33 = vpop.xlane.xlu1 %1021  ;;  %v872_v34 = vpop.xlane.xlu2 %871 }
 0x3be   : > { %1812 = vrcp.f32 %v872_v34 }
 0x3c4   : > { %v1813_v36 = vpop.eup %1812 }
 0x3c5   : > { %v1047_v35 = vpop.permute.xlu2 %1046  ;;  %v875_v19 = vpop.xlane.xlu1 %874  ;;  %v882_v37 = vmul.f32 %v1813_v36, %v1801_v7 }
 0x3c6   : > { %1814 = vrcp.f32 %v875_v19  ;;  %1059 = vmatpush.bf16.msrb.mxu3 %v1047_v35 }
 0x3c7   : > { %1816 = vrcp.f32 %v866_v31  ;;  %v886_v41 = vpack.c.bf16 %v882_v37, %v882_v37 }
 0x3c8   : > { %1818 = vrcp.f32 %v1022_v33 }
 0x3c9   : > { %v915_v43 = vunpack.c.l.b16 %v886_v41  ;;  %v1781_v41 = vld [vmem:[%s2293_s8] ss:$0 sm:$0xff] }
 0x3cc   : > { %v1815_v38 = vpop.eup %1814 }
 0x3cd   : > { %v869_v39 = vpop.xlane.xlu1 %868  ;;  %v883_v40 = vmul.f32 %v1815_v38, %v1805_v15  ;;  %v1817_v52 = vpop.eup %1816 }
 0x3ce   : > { %1820 = vrcp.f32 %v869_v39  ;;  %v880_v29 = vmul.f32 %v1817_v52, %v2082_v48  ;;  %v1819_v45 = vpop.eup %1818 }
 0x3cf   : > { %v887_v42 = vpack.c.bf16 %v883_v40, %v883_v40  ;;  %1822 = vrcp.f32 %v1019_v32  ;;  %v1034_v53 = vmul.f32 %v1819_v45, %v2090_v8 }
 0x3d0   : > { %v884_v49 = vpack.c.bf16 %v880_v29, %v880_v29 }
 0x3d1   : > { %v916_v44 = vunpack.c.l.b16 %v887_v42  ;;  %v1038_v58 = vpack.c.bf16 %v1034_v53, %v1034_v53 }
 0x3d2   : > { %v890_v55 = vunpack.c.l.b16 %v884_v49 }
 0x3d3   : > { %v917_v46 = vpack.c.b16 %v916_v44, %v915_v43  ;;  %v1044_v61 = vunpack.c.l.b16 %v1038_v58 }
 0x3d4   : > { %v1821_v47 = vpop.eup %1820 }
 0x3d5   : > { %v881_v50 = vmul.f32 %v1821_v47, %v1807_v20  ;;  %1676 = vmatmul.msk.bf16.vlgmr.msra.gmra.mxu3 %vm788_vm14, %v917_v46  ;;  %v1823_v51 = vpop.eup %1822  ;;  %v1025_v63 = vpop.xlane.xlu1 %1024 }
 0x3d6   : > { %v1033_v56 = vmul.f32 %v1823_v51, %v2086_v60  ;;  %1824 = vrcp.f32 %v1025_v63 }
 0x3d7   : > { %v885_v54 = vpack.c.bf16 %v881_v50, %v881_v50 }
 0x3d8   : > { %v1037_v48 = vpack.c.bf16 %v1033_v56, %v1033_v56 }
 0x3d9   : > { %v891_v57 = vunpack.c.l.b16 %v885_v54 }
 0x3da   : > { %v1043_v62 = vunpack.c.l.b16 %v1037_v48 }
 0x3db   : > { %v892_v59 = vpack.c.b16 %v891_v57, %v890_v55 }
 0x3dc   : > { %v1045_v2 = vpack.c.b16 %v1044_v61, %v1043_v62  ;;  %v1825_v6 = vpop.eup %1824 }
 0x3dd   : > { %1675 = vmatmul.msk.bf16.vlgmr.msrb.gmra.mxu0 %vm788_vm14, %v892_v59  ;;  %v1035_v60 = vmul.f32 %v1825_v6, %v2097_v22 }
 0x3df   : > { %v1039_v9 = vpack.c.bf16 %v1035_v60, %v1035_v60 }
 0x3e1   : > { %v1068_v12 = vunpack.c.l.b16 %v1039_v9 }
 0x3e5   : > { %1681 = vmatmul.msk.bf16.vlgmr.msrb.gmra.mxu3 %vm788_vm14, %v1045_v2 }
 0x3eb   : > { %v1028_v3 = vpop.xlane.xlu0 %1027 }
 0x3ec   : > { %1826 = vrcp.f32 %v1028_v3 }
 0x3ed   : > { %v1072_v7 = vpop.permute.xlu1 %1071 }
 0x3ee   : > { %1084 = vmatpush.bf16.msra.mxu0 %v1072_v7 }
 0x3f2   : > { %v1827_v8 = vpop.eup %1826 }
 0x3f3   : > { %v1036_v10 = vmul.f32 %v1827_v8, %v1811_v27 }
 0x3f5   : > { %v1040_v11 = vpack.c.bf16 %v1036_v10, %v1036_v10 }
 0x3f7   : > { %v1069_v13 = vunpack.c.l.b16 %v1040_v11 }
 0x3f9   : > { %v1070_v15 = vpack.c.b16 %v1069_v13, %v1068_v12  ;;  %v1743_v13 = vld [vmem:[%s2296_s11 + $0x8] sm:$0xff] }
 0x3fa   : > { %1304 = vmatpush.bf16.msra.mxu2 %v1743_v13  ;;  %v1784_v13 = vld [vmem:[%s2297_s12] ss:$0 sm:$0xff] }
 0x3fb   : > { %1682 = vmatmul.msk.bf16.vlgmr.msra.gmra.mxu0 %vm788_vm14, %v1070_v15 }
 0x3fe   : > { %1305 = vmatpush.bf16.msra.mxu2 %v1742_v18 }
 0x458   : > { %v933_v16 = vpop.f32.mrf.mxu3 }
 0x45a   : > { %v908_v20 = vpop.f32.mrf.mxu0 }
 0x460   : > { %v935_v17 = vpop.f32.mrf.mxu3 }
 0x462   : > { %v910_v23 = vpop.f32.mrf.mxu0 }
 0x468   : > { %v1061_v21 = vpop.f32.mrf.mxu3 }
 0x470   : > { %v1063_v22 = vpop.f32.mrf.mxu3 }
 0x471   : > { %v1768_v24 = vpack.i.bf16 %v1063_v22, %v1061_v21 }
 0x473   : > { %1769 = vrot.lane.b32.xlu2 %v1768_v24, %s1866_s24 }
 0x478   : > { %v1086_v25 = vpop.f32.mrf.mxu0 }
 0x480   : > { %v1088_v26 = vpop.f32.mrf.mxu0 }
 0x481   : > { %v1773_v27 = vpack.i.bf16 %v1088_v26, %v1086_v25 }
 0x483   : > { %1774 = vrot.lane.b32.xlu2 %v1773_v27, %s1866_s24 }
 0x4cd   : > { %v1770_v30 = vpop.permute.xlu2 %1769 }
 0x4ce   : > { %v1772_v31 = vunpack.i.h.bf16 %v1770_v30  ;;  %v1771_v32 = vunpack.i.l.bf16 %v1770_v30 }
 0x4d0   : > { %v1107_v33 = vsel %vm788_vm14, %v908_v20, %v1771_v32  ;;  %v1108_v34 = vsel %vm788_vm14, %v910_v23, %v1772_v31 }
 0x4d1   : > { %v1111_v35 = vpack.c.bf16 %v1108_v34, %v1107_v33 }
 0x4d3   : > { %1691 = vmatmul.msk.bf16.vlgmr.msra.gmra.mxu1 %vm612_vm0, %v1111_v35 }
 0x4dd   : > { %v1775_v19 = vpop.permute.xlu2 %1774 }
 0x4de   : > { %v1777_v36 = vunpack.i.h.bf16 %v1775_v19  ;;  %v1776_v37 = vunpack.i.l.bf16 %v1775_v19 }
 0x4e0   : > { %v1109_v38 = vsel %vm788_vm14, %v933_v16, %v1776_v37  ;;  %v1110_v39 = vsel %vm788_vm14, %v935_v17, %v1777_v36 }
 0x4e1   : > { %v1112_v40 = vpack.c.bf16 %v1110_v39, %v1109_v38 }
 0x4e3   : > { %1692 = vmatmul.msk.bf16.gmra.mxu1 %vm612_vm0, %v1112_v40 }
 0x550   : > { %v1144_v52 = vpop.f32.mrf.mxu1 }
 0x551   : > { %v1154_v42 = vadd.f32 %v1144_v52, %v1969_v1 }
 0x553   : > { %v2128_v29 = vadd.f32 %v1781_v41, %v1154_v42 }
 0x555   : > { %v1166_v43 = vsel %vm612_vm0, %v2128_v29, 0.0 }
 0x556   : > { %1167 = vadd.xlane.f32.xlu1 %v1166_v43 }
 0x558   : > { %v1146_v44 = vpop.f32.mrf.mxu1 }
 0x559   : > { %v1155_v45 = vadd.f32 %v1146_v44, %v1977_v5 }
 0x55b   : > { %v2133_v46 = vadd.f32 %v1781_v41, %v1155_v45 }
 0x55d   : > { %v1169_v47 = vsel %vm612_vm0, %v2133_v46, 0.0 }
 0x55e   : > { %1170 = vadd.xlane.f32.xlu2 %v1169_v47 }
 0x560   : > { %v1149_v49 = vpop.f32.mrf.mxu1 }
 0x561   : > { %v1156_v50 = vadd.f32 %v1149_v49, %v1967_v0 }
 0x563   : > { %v2138_v51 = vadd.f32 %v1781_v41, %v1156_v50 }
 0x565   : > { %v1172_v1 = vsel %vm612_vm0, %v2138_v51, 0.0 }
 0x566   : > { %1173 = vadd.xlane.f32.xlu0 %v1172_v1 }
 0x568   : > { %v1151_v53 = vpop.f32.mrf.mxu1 }
 0x569   : > { %v1157_v54 = vadd.f32 %v1151_v53, %v1975_v4 }
 0x56b   : > { %v2143_v55 = vadd.f32 %v1781_v41, %v1157_v54  ;;  %v1782_v41 = vld [vmem:[%s2294_s9] ss:$0 sm:$0xff] }
 0x56d   : > { %v1175_v5 = vsel %vm612_vm0, %v2143_v55, 0.0 }
 0x56e   : > { %1176 = vadd.xlane.f32.xlu0 %v1175_v5 }
 0x5c9   : > { %v1168_v56 = vpop.xlane.xlu1 %1167 }
 0x5ca   : > { %v1178_v57 = vmul.f32 %v1168_v56, %v1983_v14 }
 0x5cc   : > { %v1182_v0 = vsub.f32 %v2128_v29, %v1178_v57 }
 0x5ce   : > { %v1186_v58 = vmul.f32 %v1182_v0, %v1182_v0 }
 0x5d0   : > { %v1190_v59 = vsel %vm612_vm0, %v1186_v58, 0.0 }
 0x5d1   : > { %v1171_v48 = vpop.xlane.xlu2 %1170  ;;  %1191 = vadd.xlane.f32.xlu0 %v1190_v59 }
 0x5d2   : > { %v1179_v61 = vmul.f32 %v1171_v48, %v1983_v14 }
 0x5d4   : > { %v2152_v4 = vsub.f32 %v2133_v46, %v1179_v61 }
 0x5d6   : > { %v1187_v62 = vmul.f32 %v2152_v4, %v2152_v4 }
 0x5d8   : > { %v1193_v63 = vsel %vm612_vm0, %v1187_v62, 0.0 }
 0x5d9   : > { %v1174_v2 = vpop.xlane.xlu0 %1173  ;;  %1194 = vadd.xlane.f32.xlu0 %v1193_v63 }
 0x5da   : > { %v1180_v3 = vmul.f32 %v1174_v2, %v1983_v14 }
 0x5dc   : > { %v2159_v6 = vsub.f32 %v2138_v51, %v1180_v3 }
 0x5de   : > { %v1188_v7 = vmul.f32 %v2159_v6, %v2159_v6 }
 0x5e0   : > { %v1196_v60 = vsel %vm612_vm0, %v1188_v7, 0.0 }
 0x5e1   : > { %1197 = vadd.xlane.f32.xlu1 %v1196_v60  ;;  %v1177_v8 = vpop.xlane.xlu0 %1176 }
 0x5e2   : > { %v1181_v9 = vmul.f32 %v1177_v8, %v1983_v14 }
 0x5e4   : > { %v2166_v10 = vsub.f32 %v2143_v55, %v1181_v9 }
 0x5e6   : > { %v1189_v11 = vmul.f32 %v2166_v10, %v2166_v10 }
 0x5e8   : > { %v1199_v12 = vsel %vm612_vm0, %v1189_v11, 0.0 }
 0x5e9   : > { %1200 = vadd.xlane.f32.xlu2 %v1199_v12 }
 0x644   : > { %v1192_v15 = vpop.xlane.xlu0 %1191 }
 0x645   : > { %v1202_v16 = vmul.f32 %v1192_v15, %v1983_v14 }
 0x647   : > { %v1206_v17 = vadd.f32 1e-05, %v1202_v16 }
 0x649   : > { %1828 = vrsqrt.f32 %v1206_v17  ;;  %vm1216_vm1 = vweird.f32 %v1206_v17 }
 0x64c   : > { %v1195_v20 = vpop.xlane.xlu0 %1194 }
 0x64d   : > { %v1203_v21 = vmul.f32 %v1195_v20, %v1983_v14  ;;  %v1750_v20 = vld [vmem:[%s2298_s13 + $0x30] sm:$0xff] }
 0x64f   : > { %v1829_v23 = vpop.eup %1828  ;;  %v1207_v22 = vadd.f32 1e-05, %v1203_v21 }
 0x650   : > { %v1211_v24 = vmul.f32 %v1829_v23, %v1206_v17  ;;  %vm1217_vm15 = vweird.f32 %v1829_v23 }
 0x651   : > { %1830 = vrsqrt.f32 %v1207_v22  ;;  %vm1218_vm2 = vmor %vm1216_vm1, %vm1217_vm15  ;;  %vm1226_vm4 = vweird.f32 %v1207_v22 }
 0x652   : > { %v1212_v25 = vmul.f32 %v1829_v23, %v1211_v24  ;;  %v1749_v24 = vld [vmem:[%s2298_s13 + $0x28] sm:$0xff] }
 0x654   : > { %v1213_v26 = vmul.f32 0.5, %v1212_v25  ;;  %v1198_v27 = vpop.xlane.xlu1 %1197 }
 0x655   : > { %v1204_v28 = vmul.f32 %v1198_v27, %v1983_v14  ;;  %v1748_v27 = vld [vmem:[%s2298_s13 + $0x20] sm:$0xff] }
 0x656   : > { %v1214_v30 = vsub.f32 1.5, %v1213_v26 }
 0x657   : > { %v1831_v31 = vpop.eup %1830  ;;  %v1208_v32 = vadd.f32 1e-05, %v1204_v28 }
 0x658   : > { %v1215_v33 = vmul.f32 %v1829_v23, %v1214_v30  ;;  %v1221_v34 = vmul.f32 %v1831_v31, %v1207_v22  ;;  %vm1227_vm3 = vweird.f32 %v1831_v31 }
 0x659   : > { %1832 = vrsqrt.f32 %v1208_v32  ;;  %vm1228_vm5 = vmor %vm1226_vm4, %vm1227_vm3  ;;  %vm1236_vm7 = vweird.f32 %v1208_v32 }
 0x65a   : > { %v1222_v35 = vmul.f32 %v1831_v31, %v1221_v34  ;;  %v1219_v19 = vsel %vm1218_vm2, %v1829_v23, %v1215_v33 }
 0x65b   : > { %v1250_v52 = vmul.f32 %v1219_v19, %v1182_v0  ;;  %v1747_v19 = vld [vmem:[%s2298_s13 + $0x18] sm:$0xff] }
 0x65c   : > { %v1223_v36 = vmul.f32 0.5, %v1222_v35  ;;  %v1201_v37 = vpop.xlane.xlu2 %1200 }
 0x65d   : > { %v1205_v38 = vmul.f32 %v1201_v37, %v1983_v14  ;;  %v1783_v14 = vld [vmem:[%s2295_s10] ss:$0 sm:$0xff]  ;;  %v1258_v49 = vmul.f32 %v1782_v41, %v1250_v52  ;;  %v1746_v52 = vld [vmem:[%s2298_s13 + $0x10] sm:$0xff] }
 0x65e   : > { %v1224_v39 = vsub.f32 1.5, %v1223_v36 }
 0x65f   : > { %v1833_v40 = vpop.eup %1832  ;;  %v1209_v42 = vadd.f32 1e-05, %v1205_v38  ;;  %v1266_v56 = vadd.f32 %v1783_v14, %v1258_v49 }
 0x660   : > { %v1225_v43 = vmul.f32 %v1831_v31, %v1224_v39  ;;  %v1231_v44 = vmul.f32 %v1833_v40, %v1208_v32  ;;  %vm1237_vm6 = vweird.f32 %v1833_v40 }
 0x661   : > { %1834 = vrsqrt.f32 %v1209_v42  ;;  %vm1238_vm8 = vmor %vm1236_vm7, %vm1237_vm6  ;;  %vm1246_vm10 = vweird.f32 %v1209_v42 }
 0x662   : > { %v1229_v45 = vsel %vm1228_vm5, %v1831_v31, %v1225_v43  ;;  %v1232_v47 = vmul.f32 %v1833_v40, %v1231_v44 }
 0x663   : > { %v1251_v50 = vmul.f32 %v1229_v45, %v2152_v4 }
 0x664   : > { %v1233_v1 = vmul.f32 0.5, %v1232_v47 }
 0x665   : > { %v1259_v53 = vmul.f32 %v1782_v41, %v1251_v50 }
 0x666   : > { %v1234_v54 = vsub.f32 1.5, %v1233_v1 }
 0x667   : > { %v1835_v5 = vpop.eup %1834  ;;  %v1267_v57 = vadd.f32 %v1783_v14, %v1259_v53  ;;  %v1745_v53 = vld [vmem:[%s2298_s13 + $0x8] sm:$0xff] }
 0x668   : > { %v1235_v0 = vmul.f32 %v1833_v40, %v1234_v54  ;;  %v1241_v58 = vmul.f32 %v1835_v5, %v1209_v42  ;;  %vm1247_vm9 = vweird.f32 %v1835_v5 }
 0x669   : > { %v1270_v59 = vpack.c.bf16 %v1267_v57, %v1266_v56  ;;  %vm1248_vm11 = vmor %vm1246_vm10, %vm1247_vm9 }
 0x66a   : > { %v1242_v48 = vmul.f32 %v1835_v5, %v1241_v58  ;;  %v1239_v61 = vsel %vm1238_vm8, %v1833_v40, %v1235_v0 }
 0x66b   : > { %1701 = vmatmul.msk.bf16.vlgmr.msra.gmra.mxu2 %vm612_vm0, %v1270_v59  ;;  %v1252_v4 = vmul.f32 %v1239_v61, %v2159_v6 }
 0x66c   : > { %v1243_v62 = vmul.f32 0.5, %v1242_v48 }
 0x66d   : > { %v1260_v60 = vmul.f32 %v1782_v41, %v1252_v4 }
 0x66e   : > { %v1244_v63 = vsub.f32 1.5, %v1243_v62  ;;  %v1744_v62 = vld [vmem:[%s2298_s13] sm:$0xff] }
 0x66f   : > { %v1268_v9 = vadd.f32 %v1783_v14, %v1260_v60 }
 0x670   : > { %v1245_v2 = vmul.f32 %v1835_v5, %v1244_v63 }
 0x672   : > { %v1249_v3 = vsel %vm1248_vm11, %v1835_v5, %v1245_v2 }
 0x673   : > { %v1253_v7 = vmul.f32 %v1249_v3, %v2166_v10  ;;  %v1751_v10 = vld [vmem:[%s2298_s13 + $0x38] sm:$0xff] }
 0x674   : > { %1547 = vmatpush.bf16.msra.mxu3 %v1751_v10 }
 0x675   : > { %v1261_v8 = vmul.f32 %v1782_v41, %v1253_v7 }
 0x677   : > { %v1269_v11 = vadd.f32 %v1783_v14, %v1261_v8 }
 0x678   : > { %1548 = vmatpush.bf16.msra.mxu3 %v1750_v20 }
 0x679   : > { %v1271_v12 = vpack.c.bf16 %v1269_v11, %v1268_v9 }
 0x67b   : > { %1702 = vmatmul.msk.bf16.gmra.mxu2 %vm612_vm0, %v1271_v12 }
 0x67c   : > { %1549 = vmatpush.bf16.msra.mxu3 %v1749_v24 }
 0x680   : > { %1550 = vmatpush.bf16.msra.mxu3 %v1748_v27 }
 0x684   : > { %1551 = vmatpush.bf16.msra.mxu3 %v1747_v19 }
 0x688   : > { %1552 = vmatpush.bf16.msra.mxu3 %v1746_v52 }
 0x68c   : > { %1553 = vmatpush.bf16.msra.mxu3 %v1745_v53 }
 0x690   : > { %1554 = vmatpush.bf16.msra.mxu3 %v1744_v62 }
 0x6ee   : > { %v1307_v15 = vpop.f32.mrf.mxu2 }
 0x6ef   : > { %v2195_v16 = vadd.f32 %v1784_v13, %v1307_v15 }
 0x6f1   : > { %v2198_v6 = vmul.f32 0.70710677, %v2195_v16 }
 0x6f3   : > { %v1333_v17 = vand.u32 2147483647, %v2198_v6  ;;  %vm1325_vm11 = vcmp.ge.f32.partialorder %v2198_v6, 0.0 }
 0x6f5   : > { %v1337_v18 = vmul.f32 0.3275911, %v1333_v17  ;;  %v1441_v5 = vsub.f32 0.0, %v1333_v17 }
 0x6f6   : > { %v1309_v21 = vpop.f32.mrf.mxu2 }
 0x6f7   : > { %v1341_v23 = vadd.f32 1.0, %v1337_v18  ;;  %v2207_v22 = vadd.f32 %v1784_v13, %v1309_v21  ;;  %v1445_v4 = vmul.f32 %v1441_v5, %v1333_v17 }
 0x6f9   : > { %1836 = vrcp.f32 %v1341_v23  ;;  %v2213_v25 = vmul.f32 0.70710677, %v2207_v22  ;;  %v1356_v37 = vand.u32 2147483648, %v1341_v23  ;;  %v1354_v40 = vand.u32 2147483647, %v1341_v23 }
 0x6fa   : > { %vm1350_vm13 = vweird.f32 %v1341_v23  ;;  %v1449_v10 = vmul.f32 1.442695, %v1445_v4 }
 0x6fb   : > { %v2216_v26 = vand.u32 2147483647, %v2213_v25  ;;  %v1357_v44 = vor.u32 1.1754944e-38, %v1356_v37  ;;  %vm1355_vm15 = vcmp.eq.f32.partialorder %v1354_v40, 8.507059e+37 }
 0x6fd   : > { %v1338_v28 = vmul.f32 0.3275911, %v2216_v26  ;;  %v1442_v12 = vsub.f32 0.0, %v2216_v26 }
 0x6fe   : > { %v1312_v30 = vpop.f32.mrf.mxu2 }
 0x6ff   : > { %v1837_v31 = vpop.eup %1836  ;;  %v2222_v32 = vadd.f32 %v1784_v13, %v1312_v30  ;;  %v1342_v34 = vadd.f32 1.0, %v1338_v28  ;;  %v1446_v30 = vmul.f32 %v1442_v12, %v2216_v26 }
 0x700   : > { %v1346_v33 = vmul.f32 %v1837_v31, %v1341_v23  ;;  %vm1351_vm12 = vweird.f32 %v1837_v31 }
 0x701   : > { %v2225_v35 = vmul.f32 0.70710677, %v2222_v32  ;;  %1838 = vrcp.f32 %v1342_v34  ;;  %vm1352_vm14 = vmor %vm1350_vm13, %vm1351_vm12  ;;  %v1371_v58 = vand.u32 2147483648, %v1342_v34  ;;  %v1369_v48 = vand.u32 2147483647, %v1342_v34 }
 0x702   : > { %v1347_v36 = vsub.f32 1.0, %v1346_v33  ;;  %vm1365_vm2 = vweird.f32 %v1342_v34 }
 0x703   : > { %v2231_v38 = vand.u32 2147483647, %v2225_v35  ;;  %v1372_v8 = vor.u32 1.1754944e-38, %v1371_v58  ;;  %vm1370_vm4 = vcmp.eq.f32.partialorder %v1369_v48, 8.507059e+37 }
 0x704   : > { %v1348_v39 = vmul.f32 %v1837_v31, %v1347_v36 }
 0x705   : > { %v1339_v41 = vmul.f32 0.3275911, %v2231_v38  ;;  %v1443_v26 = vsub.f32 0.0, %v2231_v38 }
 0x706   : > { %v1349_v42 = vadd.f32 %v1837_v31, %v1348_v39  ;;  %v1314_v43 = vpop.f32.mrf.mxu2 }
 0x707   : > { %v1343_v45 = vadd.f32 1.0, %v1339_v41  ;;  %v2237_v47 = vadd.f32 %v1784_v13, %v1314_v43  ;;  %v1839_v14 = vpop.eup %1838  ;;  %v1451_v41 = vmul.f32 1.442695, %v1446_v30  ;;  %v1447_v48 = vmul.f32 %v1443_v26, %v2231_v38 }
 0x708   : > { %v1353_v49 = vsel %vm1352_vm14, %v1837_v31, %v1349_v42  ;;  %v1361_v1 = vmul.f32 %v1839_v14, %v1342_v34  ;;  %vm1366_vm1 = vweird.f32 %v1839_v14  ;;  %vm1326_vm14 = vcmp.ge.f32.partialorder %v2213_v25, 0.0 }
 0x709   : > { %v1358_v50 = vsel %vm1355_vm15, %v1357_v44, %v1353_v49  ;;  %1840 = vrcp.f32 %v1343_v45  ;;  %v2243_v57 = vmul.f32 0.70710677, %v2237_v47  ;;  %vm1367_vm3 = vmor %vm1365_vm2, %vm1366_vm1  ;;  %v1386_v21 = vand.u32 2147483648, %v1343_v45 }
 0x70a   : > { %v1405_v54 = vmul.f32 1.0614054, %v1358_v50  ;;  %v1362_v56 = vsub.f32 1.0, %v1361_v1  ;;  %v1384_v27 = vand.u32 2147483647, %v1343_v45  ;;  %vm1380_vm6 = vweird.f32 %v1343_v45 }
 0x70b   : > { %v2246_v61 = vand.u32 2147483647, %v2243_v57  ;;  %v1387_v19 = vor.u32 1.1754944e-38, %v1386_v21  ;;  %vm1327_vm15 = vcmp.ge.f32.partialorder %v2225_v35, 0.0  ;;  %vm1328_vm1 = vcmp.ge.f32.partialorder %v2243_v57, 0.0 }
 0x70c   : > { %v1409_v0 = vadd.f32 -1.4531521, %v1405_v54  ;;  %v1363_v59 = vmul.f32 %v1839_v14, %v1362_v56  ;;  %vm1385_vm8 = vcmp.eq.f32.partialorder %v1384_v27, 8.507059e+37  ;;  %v1785_v57 = vld [vmem:[%s2299_s14] ss:$0 sm:$0xff] }
 0x70d   : > { %v1340_v7 = vmul.f32 0.3275911, %v2246_v61 }
 0x70e   : > { %v1413_v63 = vmul.f32 %v1409_v0, %v1358_v50  ;;  %v1364_v3 = vadd.f32 %v1839_v14, %v1363_v59 }
 0x70f   : > { %v1841_v2 = vpop.eup %1840  ;;  %v1344_v13 = vadd.f32 1.0, %v1340_v7 }
 0x710   : > { %v1417_v60 = vadd.f32 1.4214138, %v1413_v63  ;;  %v1376_v9 = vmul.f32 %v1841_v2, %v1343_v45  ;;  %v1368_v11 = vsel %vm1367_vm3, %v1839_v14, %v1364_v3  ;;  %vm1381_vm5 = vweird.f32 %v1841_v2 }
 0x711   : > { %v1373_v18 = vsel %vm1370_vm4, %v1372_v8, %v1368_v11  ;;  %1842 = vrcp.f32 %v1344_v13  ;;  %vm1382_vm7 = vmor %vm1380_vm6, %vm1381_vm5  ;;  %v1401_v5 = vand.u32 2147483648, %v1344_v13  ;;  %v1399_v0 = vand.u32 2147483647, %v1344_v13 }
 0x712   : > { %v1421_v15 = vmul.f32 %v1417_v60, %v1358_v50  ;;  %v1377_v20 = vsub.f32 1.0, %v1376_v9  ;;  %v1406_v17 = vmul.f32 1.0614054, %v1373_v18  ;;  %1844 = vpow2.f32 %v1449_v10 }
 0x713   : > { %1846 = vpow2.f32 %v1451_v41  ;;  %vm1395_vm10 = vweird.f32 %v1344_v13  ;;  %vm1400_vm13 = vcmp.eq.f32.partialorder %v1399_v0, 8.507059e+37  ;;  %v1453_v9 = vmul.f32 1.442695, %v1447_v48 }
 0x714   : > { %v1425_v23 = vadd.f32 -0.28449672, %v1421_v15  ;;  %v1378_v24 = vmul.f32 %v1841_v2, %v1377_v20  ;;  %v1410_v28 = vadd.f32 -1.4531521, %v1406_v17  ;;  %v1444_v11 = vsub.f32 0.0, %v2246_v61 }
 0x715   : > { %v1867_v15 = vmov -1.0   ;;  %1848 = vpow2.f32 %v1453_v9  ;;  %v1319_v0 = vmul.f32 0.5, %v2222_v32 }
 0x716   : > { %v1429_v31 = vmul.f32 %v1425_v23, %v1358_v50  ;;  %v1379_v33 = vadd.f32 %v1841_v2, %v1378_v24  ;;  %v1414_v34 = vmul.f32 %v1410_v28, %v1373_v18  ;;  %v1329_v38 = vsel %vm1325_vm11, 1.0, %v1867_v15 }
 0x717   : > { %v1843_v39 = vpop.eup %1842  ;;  %v1448_v24 = vmul.f32 %v1444_v11, %v2246_v61  ;;  %v1330_v27 = vsel %vm1326_vm14, 1.0, %v1867_v15 }
 0x718   : > { %v1433_v36 = vadd.f32 0.2548296, %v1429_v31  ;;  %v1383_v37 = vsel %vm1382_vm7, %v1841_v2, %v1379_v33  ;;  %v1418_v40 = vadd.f32 1.4214138, %v1414_v34  ;;  %v1391_v43 = vmul.f32 %v1843_v39, %v1344_v13  ;;  %v1845_v49 = vpop.eup %1844 }
 0x719   : > { %v1388_v52 = vsel %vm1385_vm8, %v1387_v19, %v1383_v37  ;;  %vm1396_vm9 = vweird.f32 %v1843_v39  ;;  %v1402_v2 = vor.u32 1.1754944e-38, %v1401_v5  ;;  %v1847_v60 = vpop.eup %1846  ;;  %v1317_v19 = vmul.f32 0.5, %v2195_v16 }
 0x71a   : > { %v1437_v42 = vmul.f32 %v1433_v36, %v1358_v50  ;;  %v1407_v44 = vmul.f32 1.0614054, %v1388_v52  ;;  %v1422_v14 = vmul.f32 %v1418_v40, %v1373_v18  ;;  %v1392_v1 = vsub.f32 1.0, %v1391_v43  ;;  %vm1397_vm12 = vmor %vm1395_vm10, %vm1396_vm9 }
 0x71b   : > { %v1318_v36 = vmul.f32 0.5, %v2207_v22  ;;  %v1455_v25 = vmul.f32 1.442695, %v1448_v24  ;;  %v1849_v40 = vpop.eup %1848 }
 0x71c   : > { %v1411_v45 = vadd.f32 -1.4531521, %v1407_v44  ;;  %v1457_v53 = vmul.f32 %v1845_v49, %v1437_v42  ;;  %v1426_v54 = vadd.f32 -0.28449672, %v1422_v14  ;;  %v1393_v56 = vmul.f32 %v1843_v39, %v1392_v1 }
 0x71d   : > { %1850 = vpow2.f32 %v1455_v25  ;;  %v1331_v1 = vsel %vm1327_vm15, 1.0, %v1867_v15 }
 0x71e   : > { %v1415_v58 = vmul.f32 %v1411_v45, %v1388_v52  ;;  %v1430_v59 = vmul.f32 %v1426_v54, %v1373_v18  ;;  %v1394_v50 = vadd.f32 %v1843_v39, %v1393_v56  ;;  %v1461_v63 = vsub.f32 1.0, %v1457_v53 }
 0x71f   : > { %v1332_v54 = vsel %vm1328_vm1, 1.0, %v1867_v15 }
 0x720   : > { %v1419_v62 = vadd.f32 1.4214138, %v1415_v58  ;;  %v1434_v4 = vadd.f32 0.2548296, %v1430_v59  ;;  %v1398_v3 = vsel %vm1397_vm12, %v1843_v39, %v1394_v50  ;;  %v1465_v20 = vmul.f32 %v1461_v63, %v1329_v38 }
 0x721   : > { %v1403_v12 = vsel %vm1400_vm13, %v1402_v2, %v1398_v3  ;;  %v1320_v58 = vmul.f32 0.5, %v2237_v47 }
 0x722   : > { %v1423_v7 = vmul.f32 %v1419_v62, %v1388_v52  ;;  %v1438_v8 = vmul.f32 %v1434_v4, %v1373_v18  ;;  %v1408_v13 = vmul.f32 1.0614054, %v1403_v12  ;;  %v1469_v30 = vadd.f32 1.0, %v1465_v20 }
 0x723   : > { %v1851_v16 = vpop.eup %1850 }
 0x724   : > { %v1427_v10 = vadd.f32 -0.28449672, %v1423_v7  ;;  %v1458_v6 = vmul.f32 %v1847_v60, %v1438_v8  ;;  %v1412_v17 = vadd.f32 -1.4531521, %v1408_v13  ;;  %v1473_v41 = vmul.f32 %v1469_v30, %v1317_v19 }
 0x726   : > { %v1431_v21 = vmul.f32 %v1427_v10, %v1388_v52  ;;  %v1462_v23 = vsub.f32 1.0, %v1458_v6  ;;  %v1416_v18 = vmul.f32 %v1412_v17, %v1403_v12 }
 0x728   : > { %v1435_v28 = vadd.f32 0.2548296, %v1431_v21  ;;  %v1466_v31 = vmul.f32 %v1462_v23, %v1330_v27  ;;  %v1420_v33 = vadd.f32 1.4214138, %v1416_v18 }
 0x72a   : > { %v1439_v34 = vmul.f32 %v1435_v28, %v1388_v52  ;;  %v1470_v37 = vadd.f32 1.0, %v1466_v31  ;;  %v1424_v39 = vmul.f32 %v1420_v33, %v1403_v12 }
 0x72c   : > { %v1474_v42 = vmul.f32 %v1470_v37, %v1318_v36  ;;  %v1428_v43 = vadd.f32 -0.28449672, %v1424_v39  ;;  %v1459_v44 = vmul.f32 %v1849_v40, %v1439_v34 }
 0x72e   : > { %v1477_v61 = vpack.c.bf16 %v1474_v42, %v1473_v41  ;;  %v1432_v14 = vmul.f32 %v1428_v43, %v1403_v12  ;;  %v1463_v52 = vsub.f32 1.0, %v1459_v44 }
 0x730   : > { %1555 = vmatmul.bf16.vlgmr.msra.gmra.mxu3 %v1477_v61  ;;  %v1436_v26 = vadd.f32 0.2548296, %v1432_v14  ;;  %v1467_v45 = vmul.f32 %v1463_v52, %v1331_v1 }
 0x732   : > { %v1440_v49 = vmul.f32 %v1436_v26, %v1403_v12  ;;  %v1471_v56 = vadd.f32 1.0, %v1467_v45 }
 0x734   : > { %v1460_v22 = vmul.f32 %v1851_v16, %v1440_v49  ;;  %v1475_v35 = vmul.f32 %v1471_v56, %v1319_v0 }
 0x736   : > { %v1464_v53 = vsub.f32 1.0, %v1460_v22 }
 0x738   : > { %v1468_v5 = vmul.f32 %v1464_v53, %v1332_v54 }
 0x73a   : > { %v1472_v59 = vadd.f32 1.0, %v1468_v5 }
 0x73c   : > { %v1476_v48 = vmul.f32 %v1472_v59, %v1320_v58 }
 0x73e   : > { %v1478_v50 = vpack.c.bf16 %v1476_v48, %v1475_v35 }
 0x740   : > { %1560 = vmatmul.bf16.gmra.mxu3 %v1478_v50 }
 0x7b3   : > { %v1556_v62 = vpop.f32.mrf.mxu3 }
 0x7b4   : > { %v1557_v63 = vadd.f32 %v1785_v57, %v1556_v62 }
 0x7b6   : > { %v1566_v32 = vadd.f32 %v1557_v63, %v2128_v29 }
 0x7b8   : > { %1570 = vst.msk [vmem:[%s605_s17] sm:$0xff] %vm612_vm0, %v1566_v32 }
 0x7bb   : > { %v1558_v47 = vpop.f32.mrf.mxu3 }
 0x7bc   : > { %v1559_v4 = vadd.f32 %v1785_v57, %v1558_v47 }
 0x7be   : > { %v1567_v2 = vadd.f32 %v1559_v4, %v2133_v46 }
 0x7c0   : > { %1571 = vst.msk [vmem:[%s605_s17 + $0x8] sm:$0xff] %vm612_vm0, %v1567_v2 }
 0x7c3   : > { %v1561_v3 = vpop.f32.mrf.mxu3 }
 0x7c4   : > { %v1562_v7 = vadd.f32 %v1785_v57, %v1561_v3 }
 0x7c6   : > { %v1568_v60 = vadd.f32 %v1562_v7, %v2138_v51 }
 0x7c8   : > { %1572 = vst.msk [vmem:[%s605_s17 + $0x10] sm:$0xff] %vm612_vm0, %v1568_v60 }
 0x7cb   : > { %v1563_v8 = vpop.f32.mrf.mxu3 }
 0x7cc   : > { %v1564_v9 = vadd.f32 %v1785_v57, %v1563_v8 }
 0x7ce   : > { %v1569_v11 = vadd.f32 %v1564_v9, %v2143_v55 }
 0x7d0   : > { %1573 = vst.msk [vmem:[%s605_s17 + $0x18] sm:$0xff] %vm612_vm0, %v1569_v11 }
 0x7d1 PF: > { %s25_s18 = sadd.s32 1, %s1858_s18  }
 0x7d2   : > { %p22_p7 = scmp.ge.s32.totalorder %s25_s18, 6  }
 0x7d4   :  { %24 = sbr.rel (!%p22_p7) target bundleno = 1 (0x1), region = 114 }

</bundles_post_ra>
